<compile_context>
chip_gen: v7x
topology: tpu7x:2x2x1
jax: 0.10.0
libtpu: 0.0.40
codegen_flags: <defaults>
</compile_context>

<pallas_src>
import functools

import jax
import jax.numpy as jnp
from jax import lax
from jax.experimental import pallas as pl
from jax.experimental.pallas import tpu as pltpu

# ---- hyper-parameters (from the PyTorch module __init__) -------------------
GAMMA = 0.8
EPS = 1e-14
TAU_MIN, TAU_MAX = 0.005, 0.05
RHO = 8.0
ETA_INIT = 0.03
BETA_U = 0.5
GRAD_CLIP = 5.0
TAU_INIT = 0.01

# rows of the packed (4, ...) state / output slabs
_ROW_TAU, _ROW_B, _ROW_S, _ROW_DIAG = 0, 1, 2, 3
_ROW_LOSS, _ROW_NEWB, _ROW_NEWS, _ROW_TW = 0, 1, 2, 3
# rows of the per-block text-side partials
_P_MAX, _P_EXP, _P_NUM = 0, 1, 2


def _isogclr_kernel(b_actual,                     # static: true batch size
                    epoch_ref,                    # SMEM scalar prefetch, (1,) int32
                    img_ref,                      # (TM, D) image features (native dtype)
                    txt_ref,                      # (Bp, D) text features, VMEM-resident
                    img_state_ref,                # (4, TM) f32 [tau_i, b_i, s_i, diag_rows]
                    txt_state_ref,                # (4, Bp) f32 [tau_t, b_t, s_t, diag_full]
                    img_out_ref,                  # (4, TM) f32 [loss_i, new_b_i, new_s_i, tw_i]
                    txt_part_ref):                # (3, Bp) f32 per-block text partials
    i = pl.program_id(0)
    TM = img_ref.shape[0]
    Bp = txt_ref.shape[0]
    row0 = i * TM

    tau_i = img_state_ref[_ROW_TAU, :]            # (TM,)
    old_b_i = img_state_ref[_ROW_B, :]
    old_s_i = img_state_ref[_ROW_S, :]
    diag_i = img_state_ref[_ROW_DIAG, :]          # diag(sim) for these rows
    tau_t = txt_state_ref[_ROW_TAU, :]            # (Bp,)
    diag_full = txt_state_ref[_ROW_DIAG, :]

    inv_tau_i = pl.reciprocal(tau_i)              # exact; B-length only
    inv_tau_t = pl.reciprocal(tau_t)

    # (TM, Bp) similarity tile on the MXU, f32 accumulation, native-dtype operands.
    sim = lax.dot_general(img_ref[...], txt_ref[...],
                          (((1,), (1,)), ((), ())),
                          preferred_element_type=jnp.float32)

    rows = lax.broadcasted_iota(jnp.int32, (TM, Bp), 0) + row0
    cols = lax.broadcasted_iota(jnp.int32, (TM, Bp), 1)
    off_diag = rows != cols
    padded = (b_actual != Bp)                     # static Python bool
    if padded:
        col_valid = cols < b_actual
        row_valid = rows < b_actual
        mask_i = off_diag & col_valid
        mask_t = off_diag & row_valid
    else:
        mask_i = off_diag
        mask_t = off_diag

    # epoch == 0 -> s = g ; else EMA (scalar-gated coefficients).
    is_ema = (epoch_ref[0] != 0).astype(jnp.float32)
    c_old = is_ema * (1.0 - GAMMA)
    c_g = 1.0 - is_ema * (1.0 - GAMMA)
    inv_bm1 = 1.0 / float(b_actual - 1)

    # ---------------- image side: local to this row block --------------------
    idt = (sim - diag_i[:, None]) * inv_tau_i[:, None]      # image_diffs_d_temps
    if padded:
        row_max = jnp.max(jnp.where(col_valid, idt, -jnp.inf), axis=1)
    else:
        row_max = jnp.max(idt, axis=1)
    new_b_i = jnp.maximum(row_max, old_b_i)
    exp_i = jnp.where(mask_i, jnp.exp(idt - new_b_i[:, None]), 0.0)

    # pure row sum on the (otherwise idle) MXU; weighted row sum stays on XLU.
    ones_col = jnp.ones((Bp, 1), jnp.float32)
    g_i = lax.dot_general(exp_i, ones_col, (((1,), (0,)), ((), ())),
                          precision=lax.Precision.HIGHEST,
                          preferred_element_type=jnp.float32)[:, 0]
    num_i = jnp.sum(exp_i * idt, axis=1)          # = sum(exp * image_diffs) / tau_i

    s_i = c_old * old_s_i * jnp.exp(old_b_i - new_b_i) + c_g * g_i
    s_i_c = jnp.maximum(s_i, EPS)
    inv_s_i = pl.reciprocal(s_i_c)                # exact (feeds log / eps regime)
    img_out_ref[_ROW_LOSS, :] = tau_i * num_i * inv_s_i
    img_out_ref[_ROW_NEWB, :] = new_b_i
    img_out_ref[_ROW_NEWS, :] = s_i               # stored pre-clamp
    img_out_ref[_ROW_TW, :] = (jnp.log(s_i_c * inv_bm1) + new_b_i + RHO
                               - num_i * inv_s_i)

    # ---------------- text side: per-block partials (merged in wrapper) ------
    tdt = (sim - diag_full[None, :]) * inv_tau_t[None, :]   # text_diffs_d_temps
    if padded:
        col_max = jnp.max(jnp.where(row_valid, tdt, -jnp.inf), axis=0)
    else:
        col_max = jnp.max(tdt, axis=0)
    exp_t = jnp.where(mask_t, jnp.exp(tdt - col_max[None, :]), 0.0)

    ones_row = jnp.ones((1, TM), jnp.float32)
    e_sum = lax.dot_general(ones_row, exp_t, (((1,), (0,)), ((), ())),
                            precision=lax.Precision.HIGHEST,
                            preferred_element_type=jnp.float32)[0, :]
    n_sum = lax.dot_general(ones_row, exp_t * tdt, (((1,), (0,)), ((), ())),
                            precision=lax.Precision.HIGHEST,
                            preferred_element_type=jnp.float32)[0, :]

    txt_part_ref[_P_MAX, :] = col_max
    txt_part_ref[_P_EXP, :] = e_sum
    txt_part_ref[_P_NUM, :] = n_sum


def _round_up(x, m):
    return (x + m - 1) // m * m


def _choose_tiling(B):
    """Generation-aware row-block size and VMEM limit."""
    try:
        vmem_bytes = int(getattr(pltpu.get_tpu_info(), "vmem_capacity_bytes",
                                 64 << 20))
    except Exception:
        vmem_bytes = 64 << 20                       # conservative (v7x-sized)
    vmem_limit = max(32 << 20, min(3 * vmem_bytes // 4, 100 << 20))
    big_vmem = vmem_bytes >= (100 << 20)            # v5e / v6e: 128 MiB physical
    tm = 256 if (big_vmem and B >= 256 and B % 256 == 0) else 128
    b_pad = _round_up(max(B, 128), tm)
    # keep ~5 live (tm, b_pad) f32 temporaries comfortably inside the limit
    if tm > 128 and 6 * tm * b_pad * 4 > vmem_limit // 2:
        tm = 128
        b_pad = _round_up(max(B, 128), tm)
    return tm, b_pad, vmem_limit


def _run_kernel(epoch_arr, img, txt, img_state, txt_state, *,
                b_actual, tm, vmem_limit):
    b_pad, d = img.shape
    n_blk = b_pad // tm
    kernel = functools.partial(_isogclr_kernel, b_actual)
    return pl.pallas_call(
        kernel,
        out_shape=(jax.ShapeDtypeStruct((4, b_pad), jnp.float32),
                   jax.ShapeDtypeStruct((n_blk, 3, b_pad), jnp.float32)),
        grid_spec=pltpu.PrefetchScalarGridSpec(
            num_scalar_prefetch=1,
            grid=(n_blk,),
            in_specs=[
                pl.BlockSpec((tm, d), lambda i, ep: (i, 0)),       # image rows (tiled)
                pl.BlockSpec((b_pad, d), lambda i, ep: (0, 0)),    # full text (resident)
                pl.BlockSpec((4, tm), lambda i, ep: (0, i)),       # image-side state slab
                pl.BlockSpec((4, b_pad), lambda i, ep: (0, 0)),    # text-side state slab
            ],
            out_specs=[
                pl.BlockSpec((4, tm), lambda i, ep: (0, i)),           # image-side outputs
                pl.BlockSpec((None, 3, b_pad), lambda i, ep: (i, 0, 0)),  # text partials
            ],
        ),
        compiler_params=pltpu.CompilerParams(
            dimension_semantics=("parallel",),     # every row block is independent
            vmem_limit_bytes=vmem_limit),
    )(epoch_arr, img, txt, img_state, txt_state)


def isogclr_loss(state, image_features, text_features, image_ids, text_ids,
                 epoch, max_epoch=None):
    """Functional equivalent of iSogCLR_Loss.forward (world_size == 1).

    Returns (total_loss, tau_image, tau_text, new_state)."""
    del max_epoch  # unused by the reference forward as well
    B, _ = image_features.shape
    f32 = jnp.float32

    # gathers from the big per-sample state arrays (glue)
    tau_image = state['tau_I'][image_ids].astype(f32)
    tau_text = state['tau_T'][text_ids].astype(f32)
    old_b_I = state['b_I'][image_ids].astype(f32)
    old_b_T = state['b_T'][text_ids].astype(f32)
    old_s_I = state['s_I'][image_ids].astype(f32)
    old_s_T = state['s_T'][text_ids].astype(f32)

    # diag(sim) from the features: one cheap (B, D) multiply+reduce.
    diag = jnp.sum(image_features.astype(f32) * text_features.astype(f32), axis=-1)

    tm, b_pad, vmem_limit = _choose_tiling(B)
    pad = b_pad - B

    def pad1(x, val=0.0):
        return jnp.pad(x, (0, pad), constant_values=val) if pad else x

    if pad:
        img_f = jnp.pad(image_features, ((0, pad), (0, 0)))
        txt_f = jnp.pad(text_features, ((0, pad), (0, 0)))
    else:
        img_f, txt_f = image_features, text_features

    img_state = jnp.stack([pad1(tau_image, TAU_INIT), pad1(old_b_I),
                           pad1(old_s_I), pad1(diag)], axis=0)       # (4, Bp)
    txt_state = jnp.stack([pad1(tau_text, TAU_INIT), pad1(old_b_T),
                           pad1(old_s_T), pad1(diag)], axis=0)       # (4, Bp)
    epoch_arr = jnp.asarray(epoch, jnp.int32).reshape((1,))

    img_out, txt_part = _run_kernel(epoch_arr, img_f, txt_f, img_state, txt_state,
                                    b_actual=B, tm=tm, vmem_limit=vmem_limit)

    loss_i = img_out[_ROW_LOSS, :B]
    new_b_I = img_out[_ROW_NEWB, :B]
    new_s_I = img_out[_ROW_NEWS, :B]
    tw_i = img_out[_ROW_TW, :B]

    # ---- text side: online-softmax merge of per-block partials (tiny work) --
    old_b_T_p = pad1(old_b_T)
    old_s_T_p = pad1(old_s_T)
    tau_text_p = pad1(tau_text, TAU_INIT)
    m_blk = txt_part[:, _P_MAX, :]                 # (n_blk, Bp)
    e_blk = txt_part[:, _P_EXP, :]
    n_blk_sums = txt_part[:, _P_NUM, :]

    new_b_T_p = jnp.maximum(jnp.max(m_blk, axis=0), old_b_T_p)
    scale = jnp.exp(m_blk - new_b_T_p[None, :])    # <= 1, no overflow
    g_T = jnp.sum(e_blk * scale, axis=0)
    num_T = jnp.sum(n_blk_sums * scale, axis=0)    # sum(exp * tdt)

    is_ema = (jnp.asarray(epoch) != 0).astype(f32)
    c_old = is_ema * (1.0 - GAMMA)
    c_g = 1.0 - is_ema * (1.0 - GAMMA)
    s_T_p = c_old * old_s_T_p * jnp.exp(old_b_T_p - new_b_T_p) + c_g * g_T
    s_T_c = jnp.maximum(s_T_p, EPS)
    loss_t = (tau_text_p * num_T / s_T_c)[:B]
    tw_t = (jnp.log(s_T_c / float(B - 1)) + new_b_T_p + RHO - num_T / s_T_c)[:B]
    new_b_T = new_b_T_p[:B]
    new_s_T = s_T_p[:B]

    total_loss = loss_i.mean() + loss_t.mean()

    # u / tau EMA updates (elementwise over B values — plain JAX glue)
    u_I_new = ((1.0 - BETA_U) * state['u_I'][image_ids]
               + BETA_U * jnp.clip(tw_i, -GRAD_CLIP, GRAD_CLIP))
    u_T_new = ((1.0 - BETA_U) * state['u_T'][text_ids]
               + BETA_U * jnp.clip(tw_t, -GRAD_CLIP, GRAD_CLIP))
    tau_I_new = jnp.clip(tau_image - ETA_INIT * u_I_new, TAU_MIN, TAU_MAX)
    tau_T_new = jnp.clip(tau_text - ETA_INIT * u_T_new, TAU_MIN, TAU_MAX)

    new_state = dict(state)
    new_state['b_I'] = state['b_I'].at[image_ids].set(new_b_I)
    new_state['b_T'] = state['b_T'].at[text_ids].set(new_b_T)
    new_state['s_I'] = state['s_I'].at[image_ids].set(new_s_I)
    new_state['s_T'] = state['s_T'].at[text_ids].set(new_s_T)
    new_state['u_I'] = state['u_I'].at[image_ids].set(u_I_new)
    new_state['u_T'] = state['u_T'].at[text_ids].set(u_T_new)
    new_state['tau_I'] = state['tau_I'].at[image_ids].set(tau_I_new)
    new_state['tau_T'] = state['tau_T'].at[text_ids].set(tau_T_new)

    # torch returns the (pre-update) gathered temperatures
    return total_loss, tau_image, tau_text, new_state


# ---------------------------------------------------------------------------
# Pure-JAX reference (faithful translation of the PyTorch forward), used only
# to validate the kernel in the demo below.
# ---------------------------------------------------------------------------
def isogclr_reference(state, image_features, text_features, image_ids, text_ids, epoch):
    f32 = jnp.float32
    imgf = image_features.astype(f32)
    txtf = text_features.astype(f32)
    sim = jnp.einsum('id,jd->ij', imgf, txtf)
    diag = jnp.diagonal(sim)
    B = sim.shape[0]
    mask_neg = 1.0 - jnp.eye(B, dtype=f32)

    tau_image = state['tau_I'][image_ids]
    tau_text = state['tau_T'][text_ids]
    image_diffs = sim - diag[:, None]
    text_diffs = sim - diag[None, :]
    idt = image_diffs / tau_image[:, None]
    tdt = text_diffs / tau_text[None, :]

    old_b_I = state['b_I'][image_ids]
    old_b_T = state['b_T'][text_ids]
    new_b_I = jnp.maximum(jnp.max(idt, axis=1), old_b_I)
    new_b_T = jnp.maximum(jnp.max(tdt, axis=0), old_b_T)

    exp_i = jnp.exp(idt - new_b_I[:, None]) * mask_neg
    exp_t = jnp.exp(tdt - new_b_T[None, :]) * mask_neg
    g_I = exp_i.sum(1)
    g_T = exp_t.sum(0)

    if epoch == 0:
        s_I, s_T = g_I, g_T
    else:
        s_I = (1.0 - GAMMA) * state['s_I'][image_ids] * jnp.exp(old_b_I - new_b_I) + GAMMA * g_I
        s_T = (1.0 - GAMMA) * state['s_T'][text_ids] * jnp.exp(old_b_T - new_b_T) + GAMMA * g_T
    new_s_I, new_s_T = s_I, s_T

    s_Ic = jnp.maximum(s_I, EPS)
    s_Tc = jnp.maximum(s_T, EPS)
    w_i = exp_i / s_Ic[:, None]
    w_t = exp_t / s_Tc[None, :]
    loss_i = (w_i * image_diffs).sum(1)
    loss_t = (w_t * text_diffs).sum(0)
    total_loss = loss_i.mean() + loss_t.mean()

    tw_i = jnp.log(s_Ic / (B - 1)) + new_b_I + RHO - (w_i * idt).sum(1)
    tw_t = jnp.log(s_Tc / (B - 1)) + new_b_T + RHO - (w_t * tdt).sum(0)

    u_I_new = (1.0 - BETA_U) * state['u_I'][image_ids] + BETA_U * jnp.clip(tw_i, -GRAD_CLIP, GRAD_CLIP)
    u_T_new = (1.0 - BETA_U) * state['u_T'][text_ids] + BETA_U * jnp.clip(tw_t, -GRAD_CLIP, GRAD_CLIP)
    tau_I_new = jnp.clip(tau_image - ETA_INIT * u_I_new, TAU_MIN, TAU_MAX)
    tau_T_new = jnp.clip(tau_text - ETA_INIT * u_T_new, TAU_MIN, TAU_MAX)

    new_state = dict(state)
    new_state['b_I'] = state['b_I'].at[image_ids].set(new_b_I)
    new_state['b_T'] = state['b_T'].at[text_ids].set(new_b_T)
    new_state['s_I'] = state['s_I'].at[image_ids].set(new_s_I)
    new_state['s_T'] = state['s_T'].at[text_ids].set(new_s_T)
    new_state['u_I'] = state['u_I'].at[image_ids].set(u_I_new)
    new_state['u_T'] = state['u_T'].at[text_ids].set(u_T_new)
    new_state['tau_I'] = state['tau_I'].at[image_ids].set(tau_I_new)
    new_state['tau_T'] = state['tau_T'].at[text_ids].set(tau_T_new)
    return total_loss, tau_image, tau_text, new_state


def _init_state(N):
    return {
        's_I': jnp.zeros(N, jnp.float32), 's_T': jnp.zeros(N, jnp.float32),
        'b_I': jnp.zeros(N, jnp.float32), 'b_T': jnp.zeros(N, jnp.float32),
        'u_I': jnp.zeros(N, jnp.float32), 'u_T': jnp.zeros(N, jnp.float32),
        'tau_I': jnp.full((N,), TAU_INIT, jnp.float32),
        'tau_T': jnp.full((N,), TAU_INIT, jnp.float32),
    }


def _run_case(B, D, case_idx):
    N = 4096
    key = jax.random.fold_in(jax.random.PRNGKey(0), case_idx)
    k1, k2 = jax.random.split(key)
    # moderately-scaled features, stored in bf16 (the kernel feeds bf16 to the MXU)
    img = (0.35 * jax.random.normal(k1, (B, D), jnp.float32)).astype(jnp.bfloat16)
    txt = (0.35 * jax.random.normal(k2, (B, D), jnp.float32)).astype(jnp.bfloat16)
    image_ids = jnp.arange(B, dtype=jnp.int32)
    text_ids = jnp.arange(B, dtype=jnp.int32) + B

    state_k = _init_state(N)   # state driven by the Pallas kernel
    state_r = _init_state(N)   # state driven by the pure-JAX reference

    for epoch in (0, 1):       # epoch 0 path and EMA path
        loss_k, tau_i_k, tau_t_k, state_k = isogclr_loss(
            state_k, img, txt, image_ids, text_ids, epoch)
        loss_r, _, _, state_r = isogclr_reference(
            state_r, img, txt, image_ids, text_ids, epoch)
        jax.block_until_ready((loss_k, tau_i_k, tau_t_k, state_k))

        assert bool(jnp.isfinite(loss_k))
        assert jnp.allclose(loss_k, loss_r, rtol=1e-2, atol=5e-2), (B, epoch, loss_k, loss_r)
        for name in ('b_I', 'b_T', 's_I', 's_T', 'u_I', 'u_T', 'tau_I', 'tau_T'):
            assert jnp.allclose(state_k[name], state_r[name], rtol=1e-2, atol=1e-2), (B, epoch, name)


if __name__ == "__main__":
    _run_case(256, 64, 0)   # batch divisible by the row tile
    _run_case(200, 64, 1)   # batch NOT divisible -> padded / masked path
    print("KERNEL_OK")
</pallas_src>

<mosaic_0001>
module attributes {stable_mosaic.version = 11 : i64} {
  func.func @_isogclr_kernel(%arg0: i32, %arg1: memref<1xi32, #tpu.memory_space<smem>>, %arg2: memref<128x64xbf16, #tpu.memory_space<vmem>>, %arg3: memref<256x64xbf16, #tpu.memory_space<vmem>>, %arg4: memref<4x128xf32, #tpu.memory_space<vmem>>, %arg5: memref<4x256xf32, #tpu.memory_space<vmem>>, %arg6: memref<4x128xf32, #tpu.memory_space<vmem>>, %arg7: memref<1x3x256xf32, #tpu.memory_space<vmem>>) attributes {dimension_semantics = [#tpu.dimension_semantics<parallel>], iteration_bounds = array<i64: 2>, scalar_prefetch = 1 : i64, scratch_operands = 0 : i64, tpu.core_type = #tpu.core_type<tc>, window_params = [{transform_indices = @transform_0, window_bounds = array<i64: 128, 64>}, {pipeline_mode = #tpu.pipeline_mode<synchronous>, transform_indices = @transform_1, window_bounds = array<i64: 256, 64>}, {transform_indices = @transform_2, window_bounds = array<i64: 4, 128>}, {pipeline_mode = #tpu.pipeline_mode<synchronous>, transform_indices = @transform_3, window_bounds = array<i64: 4, 256>}, {transform_indices = @transform_4, window_bounds = array<i64: 4, 128>}, {transform_indices = @transform_5, window_bounds = array<i64: 1, 3, 256>}]} {
    %c128_i32 = arith.constant 128 : i32
    %0 = arith.muli %arg0, %c128_i32 : i32
    %c0 = arith.constant 0 : index
    %c0_0 = arith.constant 0 : index
    %1 = vector.load %arg4[%c0, %c0_0] : memref<4x128xf32, #tpu.memory_space<vmem>>, vector<1x128xf32>
    %2 = vector.shape_cast %1 : vector<1x128xf32> to vector<128xf32>
    %c1 = arith.constant 1 : index
    %c0_1 = arith.constant 0 : index
    %3 = vector.load %arg4[%c1, %c0_1] : memref<4x128xf32, #tpu.memory_space<vmem>>, vector<1x128xf32>
    %4 = vector.shape_cast %3 : vector<1x128xf32> to vector<128xf32>
    %c2 = arith.constant 2 : index
    %c0_2 = arith.constant 0 : index
    %5 = vector.load %arg4[%c2, %c0_2] : memref<4x128xf32, #tpu.memory_space<vmem>>, vector<1x128xf32>
    %6 = vector.shape_cast %5 : vector<1x128xf32> to vector<128xf32>
    %c3 = arith.constant 3 : index
    %c0_3 = arith.constant 0 : index
    %7 = vector.load %arg4[%c3, %c0_3] : memref<4x128xf32, #tpu.memory_space<vmem>>, vector<1x128xf32>
    %8 = vector.shape_cast %7 : vector<1x128xf32> to vector<128xf32>
    %c0_4 = arith.constant 0 : index
    %c0_5 = arith.constant 0 : index
    %9 = vector.load %arg5[%c0_4, %c0_5] : memref<4x256xf32, #tpu.memory_space<vmem>>, vector<1x256xf32>
    %10 = vector.shape_cast %9 : vector<1x256xf32> to vector<256xf32>
    %c3_6 = arith.constant 3 : index
    %c0_7 = arith.constant 0 : index
    %11 = vector.load %arg5[%c3_6, %c0_7] : memref<4x256xf32, #tpu.memory_space<vmem>>, vector<1x256xf32>
    %12 = vector.shape_cast %11 : vector<1x256xf32> to vector<256xf32>
    %13 = tpu.reciprocal %2 : vector<128xf32> -> vector<128xf32>
    %14 = tpu.reciprocal %10 : vector<256xf32> -> vector<256xf32>
    %c0_8 = arith.constant 0 : index
    %c0_9 = arith.constant 0 : index
    %15 = vector.load %arg2[%c0_8, %c0_9] : memref<128x64xbf16, #tpu.memory_space<vmem>>, vector<128x64xbf16>
    %c0_10 = arith.constant 0 : index
    %c0_11 = arith.constant 0 : index
    %16 = vector.load %arg3[%c0_10, %c0_11] : memref<256x64xbf16, #tpu.memory_space<vmem>>, vector<256x64xbf16>
    %cst = arith.constant dense<0.000000e+00> : vector<128x256xf32>
    %17 = tpu.matmul %15, %16, %cst {dimension_numbers = #tpu.dot_dimension_numbers<[1], [1], [0], [0], [0, 0, 1, 0], [], []>} : vector<128x64xbf16>, vector<256x64xbf16>, vector<128x256xf32> -> vector<128x256xf32>
    %18 = tpu.iota {dimensions = array<i32: 0>} : vector<128x256xi32>
    %19 = vector.broadcast %0 : i32 to vector<128x256xi32>
    %20 = arith.addi %18, %19 : vector<128x256xi32>
    %21 = tpu.iota {dimensions = array<i32: 1>} : vector<128x256xi32>
    %22 = arith.cmpi ne, %20, %21 : vector<128x256xi32>
    %c0_12 = arith.constant 0 : index
    %23 = memref.load %arg1[%c0_12] : memref<1xi32, #tpu.memory_space<smem>>
    %c0_i32 = arith.constant 0 : i32
    %24 = arith.cmpi ne, %23, %c0_i32 : i32
    %25 = arith.extui %24 : i1 to i32
    %26 = arith.sitofp %25 : i32 to f32
    %cst_13 = arith.constant 2.000000e-01 : f32
    %27 = arith.mulf %26, %cst_13 : f32
    %cst_14 = arith.constant 2.000000e-01 : f32
    %28 = arith.mulf %26, %cst_14 : f32
    %cst_15 = arith.constant 1.000000e+00 : f32
    %29 = arith.subf %cst_15, %28 : f32
    %30 = vector.shape_cast %8 : vector<128xf32> to vector<128x1xf32>
    %31 = vector.broadcast %30 : vector<128x1xf32> to vector<128x256xf32>
    %32 = arith.subf %17, %31 : vector<128x256xf32>
    %33 = vector.shape_cast %13 : vector<128xf32> to vector<128x1xf32>
    %34 = vector.broadcast %33 : vector<128x1xf32> to vector<128x256xf32>
    %35 = arith.mulf %32, %34 : vector<128x256xf32>
    %cst_16 = arith.constant dense<0xFF800000> : vector<128xf32>
    %36 = vector.multi_reduction <maximumf>, %35, %cst_16 [1] : vector<128x256xf32> to vector<128xf32>
    %37 = arith.maximumf %36, %4 : vector<128xf32>
    %38 = vector.shape_cast %37 : vector<128xf32> to vector<128x1xf32>
    %39 = vector.broadcast %38 : vector<128x1xf32> to vector<128x256xf32>
    %40 = arith.subf %35, %39 : vector<128x256xf32>
    %41 = math.exp %40 : vector<128x256xf32>
    %cst_17 = arith.constant 0.000000e+00 : f32
    %42 = vector.broadcast %cst_17 : f32 to vector<128x256xf32>
    %43 = arith.select %22, %41, %42 : vector<128x256xi1>, vector<128x256xf32>
    %cst_18 = arith.constant 1.000000e+00 : f32
    %44 = vector.broadcast %cst_18 : f32 to vector<256x1xf32>
    %cst_19 = arith.constant dense<0.000000e+00> : vector<128x1xf32>
    %45 = tpu.matmul %43, %44, %cst_19 {dimension_numbers = #tpu.dot_dimension_numbers<[1], [0], [0], [1], [0, 0, 1, 1], [], []>, precision = #tpu.contract_precision<fp32>} : vector<128x256xf32>, vector<256x1xf32>, vector<128x1xf32> -> vector<128x1xf32>
    %46 = vector.shape_cast %45 : vector<128x1xf32> to vector<128xf32>
    %47 = arith.mulf %43, %35 : vector<128x256xf32>
    %cst_20 = arith.constant dense<0.000000e+00> : vector<128xf32>
    %48 = vector.multi_reduction <add>, %47, %cst_20 [1] : vector<128x256xf32> to vector<128xf32>
    %49 = vector.broadcast %27 : f32 to vector<128xf32>
    %50 = arith.mulf %49, %6 : vector<128xf32>
    %51 = arith.subf %4, %37 : vector<128xf32>
    %52 = math.exp %51 : vector<128xf32>
    %53 = arith.mulf %50, %52 : vector<128xf32>
    %54 = vector.broadcast %29 : f32 to vector<128xf32>
    %55 = arith.mulf %54, %46 : vector<128xf32>
    %56 = arith.addf %53, %55 : vector<128xf32>
    %cst_21 = arith.constant 9.99999982E-15 : f32
    %57 = vector.broadcast %cst_21 : f32 to vector<128xf32>
    %58 = arith.maximumf %56, %57 : vector<128xf32>
    %59 = tpu.reciprocal %58 : vector<128xf32> -> vector<128xf32>
    %60 = arith.mulf %2, %48 : vector<128xf32>
    %61 = arith.mulf %60, %59 : vector<128xf32>
    %c0_22 = arith.constant 0 : index
    %c0_23 = arith.constant 0 : index
    %62 = vector.load %arg6[%c0_22, %c0_23] : memref<4x128xf32, #tpu.memory_space<vmem>>, vector<1x128xf32>
    %63 = vector.shape_cast %62 : vector<1x128xf32> to vector<128xf32>
    %64 = vector.shape_cast %61 : vector<128xf32> to vector<1x128xf32>
    tpu.vector_store %arg6[%c0_22, %c0_23], %64 {strides = array<i32>} : memref<4x128xf32, #tpu.memory_space<vmem>>, vector<1x128xf32>,
    %c1_24 = arith.constant 1 : index
    %c0_25 = arith.constant 0 : index
    %65 = vector.load %arg6[%c1_24, %c0_25] : memref<4x128xf32, #tpu.memory_space<vmem>>, vector<1x128xf32>
    %66 = vector.shape_cast %65 : vector<1x128xf32> to vector<128xf32>
    %67 = vector.shape_cast %37 : vector<128xf32> to vector<1x128xf32>
    tpu.vector_store %arg6[%c1_24, %c0_25], %67 {strides = array<i32>} : memref<4x128xf32, #tpu.memory_space<vmem>>, vector<1x128xf32>,
    %c2_26 = arith.constant 2 : index
    %c0_27 = arith.constant 0 : index
    %68 = vector.load %arg6[%c2_26, %c0_27] : memref<4x128xf32, #tpu.memory_space<vmem>>, vector<1x128xf32>
    %69 = vector.shape_cast %68 : vector<1x128xf32> to vector<128xf32>
    %70 = vector.shape_cast %56 : vector<128xf32> to vector<1x128xf32>
    tpu.vector_store %arg6[%c2_26, %c0_27], %70 {strides = array<i32>} : memref<4x128xf32, #tpu.memory_space<vmem>>, vector<1x128xf32>,
    %cst_28 = arith.constant 0.00392156886 : f32
    %71 = vector.broadcast %cst_28 : f32 to vector<128xf32>
    %72 = arith.mulf %58, %71 : vector<128xf32>
    %73 = math.log %72 : vector<128xf32>
    %74 = arith.addf %73, %37 : vector<128xf32>
    %cst_29 = arith.constant 8.000000e+00 : f32
    %75 = vector.broadcast %cst_29 : f32 to vector<128xf32>
    %76 = arith.addf %74, %75 : vector<128xf32>
    %77 = arith.mulf %48, %59 : vector<128xf32>
    %78 = arith.subf %76, %77 : vector<128xf32>
    %c3_30 = arith.constant 3 : index
    %c0_31 = arith.constant 0 : index
    %79 = vector.load %arg6[%c3_30, %c0_31] : memref<4x128xf32, #tpu.memory_space<vmem>>, vector<1x128xf32>
    %80 = vector.shape_cast %79 : vector<1x128xf32> to vector<128xf32>
    %81 = vector.shape_cast %78 : vector<128xf32> to vector<1x128xf32>
    tpu.vector_store %arg6[%c3_30, %c0_31], %81 {strides = array<i32>} : memref<4x128xf32, #tpu.memory_space<vmem>>, vector<1x128xf32>,
    %82 = vector.shape_cast %12 : vector<256xf32> to vector<1x256xf32>
    %83 = vector.broadcast %82 : vector<1x256xf32> to vector<128x256xf32>
    %84 = arith.subf %17, %83 : vector<128x256xf32>
    %85 = vector.shape_cast %14 : vector<256xf32> to vector<1x256xf32>
    %86 = vector.broadcast %85 : vector<1x256xf32> to vector<128x256xf32>
    %87 = arith.mulf %84, %86 : vector<128x256xf32>
    %cst_32 = arith.constant dense<0xFF800000> : vector<256xf32>
    %88 = vector.multi_reduction <maximumf>, %87, %cst_32 [0] : vector<128x256xf32> to vector<256xf32>
    %89 = vector.shape_cast %88 : vector<256xf32> to vector<1x256xf32>
    %90 = vector.broadcast %89 : vector<1x256xf32> to vector<128x256xf32>
    %91 = arith.subf %87, %90 : vector<128x256xf32>
    %92 = math.exp %91 : vector<128x256xf32>
    %cst_33 = arith.constant 0.000000e+00 : f32
    %93 = vector.broadcast %cst_33 : f32 to vector<128x256xf32>
    %94 = arith.select %22, %92, %93 : vector<128x256xi1>, vector<128x256xf32>
    %cst_34 = arith.constant 1.000000e+00 : f32
    %95 = vector.broadcast %cst_34 : f32 to vector<1x128xf32>
    %cst_35 = arith.constant dense<0.000000e+00> : vector<1x256xf32>
    %96 = tpu.matmul %95, %94, %cst_35 {dimension_numbers = #tpu.dot_dimension_numbers<[1], [0], [0], [1], [0, 0, 1, 1], [], []>, precision = #tpu.contract_precision<fp32>} : vector<1x128xf32>, vector<128x256xf32>, vector<1x256xf32> -> vector<1x256xf32>
    %97 = vector.shape_cast %96 : vector<1x256xf32> to vector<256xf32>
    %98 = arith.mulf %94, %87 : vector<128x256xf32>
    %cst_36 = arith.constant dense<0.000000e+00> : vector<1x256xf32>
    %99 = tpu.matmul %95, %98, %cst_36 {dimension_numbers = #tpu.dot_dimension_numbers<[1], [0], [0], [1], [0, 0, 1, 1], [], []>, precision = #tpu.contract_precision<fp32>} : vector<1x128xf32>, vector<128x256xf32>, vector<1x256xf32> -> vector<1x256xf32>
    %100 = vector.shape_cast %99 : vector<1x256xf32> to vector<256xf32>
    %c0_37 = arith.constant 0 : index
    %c0_38 = arith.constant 0 : index
    %c0_39 = arith.constant 0 : index
    %101 = vector.load %arg7[%c0_37, %c0_38, %c0_39] : memref<1x3x256xf32, #tpu.memory_space<vmem>>, vector<1x1x256xf32>
    %102 = vector.shape_cast %101 : vector<1x1x256xf32> to vector<256xf32>
    %103 = vector.shape_cast %88 : vector<256xf32> to vector<1x1x256xf32>
    tpu.vector_store %arg7[%c0_37, %c0_38, %c0_39], %103 {strides = array<i32>} : memref<1x3x256xf32, #tpu.memory_space<vmem>>, vector<1x1x256xf32>,
    %c0_40 = arith.constant 0 : index
    %c1_41 = arith.constant 1 : index
    %c0_42 = arith.constant 0 : index
    %104 = vector.load %arg7[%c0_40, %c1_41, %c0_42] : memref<1x3x256xf32, #tpu.memory_space<vmem>>, vector<1x1x256xf32>
    %105 = vector.shape_cast %104 : vector<1x1x256xf32> to vector<256xf32>
    %106 = vector.shape_cast %97 : vector<256xf32> to vector<1x1x256xf32>
    tpu.vector_store %arg7[%c0_40, %c1_41, %c0_42], %106 {strides = array<i32>} : memref<1x3x256xf32, #tpu.memory_space<vmem>>, vector<1x1x256xf32>,
    %c0_43 = arith.constant 0 : index
    %c2_44 = arith.constant 2 : index
    %c0_45 = arith.constant 0 : index
    %107 = vector.load %arg7[%c0_43, %c2_44, %c0_45] : memref<1x3x256xf32, #tpu.memory_space<vmem>>, vector<1x1x256xf32>
    %108 = vector.shape_cast %107 : vector<1x1x256xf32> to vector<256xf32>
    %109 = vector.shape_cast %100 : vector<256xf32> to vector<1x1x256xf32>
    tpu.vector_store %arg7[%c0_43, %c2_44, %c0_45], %109 {strides = array<i32>} : memref<1x3x256xf32, #tpu.memory_space<vmem>>, vector<1x1x256xf32>,
    return
  }
  func.func @transform_0(%arg0: i32, %arg1: memref<1xi32, #tpu.memory_space<smem>>) -> (i32, i32) {
    %c0_i32 = arith.constant 0 : i32
    %c0_i32_0 = arith.constant 0 : i32
    return %arg0, %c0_i32 : i32, i32
  }
  func.func @transform_1(%arg0: i32, %arg1: memref<1xi32, #tpu.memory_space<smem>>) -> (i32, i32) {
    %c0_i32 = arith.constant 0 : i32
    %c0_i32_0 = arith.constant 0 : i32
    %c0_i32_1 = arith.constant 0 : i32
    return %c0_i32, %c0_i32_0 : i32, i32
  }
  func.func @transform_2(%arg0: i32, %arg1: memref<1xi32, #tpu.memory_space<smem>>) -> (i32, i32) {
    %c0_i32 = arith.constant 0 : i32
    %c0_i32_0 = arith.constant 0 : i32
    return %c0_i32, %arg0 : i32, i32
  }
  func.func @transform_3(%arg0: i32, %arg1: memref<1xi32, #tpu.memory_space<smem>>) -> (i32, i32) {
    %c0_i32 = arith.constant 0 : i32
    %c0_i32_0 = arith.constant 0 : i32
    %c0_i32_1 = arith.constant 0 : i32
    return %c0_i32, %c0_i32_0 : i32, i32
  }
  func.func @transform_4(%arg0: i32, %arg1: memref<1xi32, #tpu.memory_space<smem>>) -> (i32, i32) {
    %c0_i32 = arith.constant 0 : i32
    %c0_i32_0 = arith.constant 0 : i32
    return %c0_i32, %arg0 : i32, i32
  }
  func.func @transform_5(%arg0: i32, %arg1: memref<1xi32, #tpu.memory_space<smem>>) -> (i32, i32, i32) {
    %c0_i32 = arith.constant 0 : i32
    %c0_i32_0 = arith.constant 0 : i32
    %c0_i32_1 = arith.constant 0 : i32
    return %arg0, %c0_i32, %c0_i32_0 : i32, i32, i32
  }
}

</mosaic_0001>

<bundles_post_ra>
// kernel: tpu_custom_call.1
= control target key start
LH: loop header
LB: loop body
LE: loop exit
PB: predicated region body
PF: predicated region fallthrough
CT: control target
= control target key end

     0   :  { %s10295_s0 = inlined_call_operand.<no memory space> [shape: s32[1], index: 0, kind: input, shape index: {}]   ;;  %s10296_s1 = inlined_call_operand.vmem [shape: bf16[256,64], index: 1, kind: input, shape index: {}]   ;;  %s10297_s2 = inlined_call_operand.vmem [shape: bf16[256,64], index: 2, kind: input, shape index: {}]   ;;  %s10298_s3 = inlined_call_operand.vmem [shape: f32[4,256], index: 3, kind: input, shape index: {}]   ;;  %s10299_s4 = inlined_call_operand.vmem [shape: f32[4,256], index: 4, kind: input, shape index: {}]   ;;  %s10300_s5 = inlined_call_operand.hbm [shape: f32[4,256], index: 5, kind: output, shape index: {0}]   ;;  %s10301_s6 = inlined_call_operand.vmem [shape: f32[2,3,256], index: 6, kind: output, shape index: {1}]  }
   0x1   :  { %12 = sst [smem:[#allocation3]] %s10295_s0 }
   0x2   :  { %13 = vsyncpa [#allocation5], 0 }
   0x3   :  { %15 = vsyncpa [#allocation5 + $0x1], 0  ;;  %s6521_s23 = smov 0   ;;  %s6523_s24 = smov 0  }
   0x4   :  { %s6525_s25 = smov 0   ;;  %s6527_s26 = smov 0  }
   0x5 LB: > { %s6542_s0 = sadd.s32 4294967295, %s6475_s26   ;;  %s5402_s27 = sadd.s32 4294967294, %s6475_s26   ;;  %s6475_s26 = sphi %s6527_s26, %s11883_s26   ;;  %s6471_s25 = sphi %s6525_s25, %s11882_s25   ;;  %s6467_s24 = sphi %s6523_s24, %s11881_s24   ;;  %s6463_s23 = sphi %s6521_s23, %s11880_s23  }
   0x6   : > { %s6546_s28 = sadd.s32 1, %s6475_s26   ;;  %s122_s29 = sadd.s32 1, %s6471_s25 }
   0x7   : > { %s119_s30 = ssub.s32 %s6475_s26, %s6546_s28  ;;  %p132_p0 = scmp.ne.s32.totalorder %s6471_s25, %s6467_s24 }
   0x8   : > { %p120_p1 = scmp.eq.s32.totalorder %s119_s30, 0  ;;  %p133_p2 = scmp.eq.s32.totalorder %s6542_s0, 1 }
   0x9   : > { %p138_p3 = scmp.ne.s32.totalorder %s6467_s24, %s6463_s23  ;;  %p139_p4 = scmp.eq.s32.totalorder %s5402_s27, 1 }
   0xa   : > { %s6557_s7 = scalar_select %p120_p1, %s6471_s25, %s122_s29  }
   0xb   : > { %p6559_p5 = por %p133_p2, %p132_p0  ;;  %p6563_p6 = por %p139_p4, %p138_p3 }
   0xc   : > { %p5405_p7 = scmp.ge.s32.totalorder %s6475_s26, 1  ;;  %p205_p8 = scmp.lt.s32.totalorder %s6475_s26, 3 }
   0xe   : > { %p206_p9 = pnand %p5405_p7, %p205_p8 }
  0x10   : > { %209 = sbr.rel (%p206_p9) target bundleno = 1592 (0x638), region = 36 }
  0x17   : > { %v6248_v0 = vld [vmem:[%s10297_s2 + $0x40] sm:$0xff]   ;;  %vm436_vm0 = vcmask 523264   ;;  %s5407_s14 = sshll.u32 %s6542_s0, 4  ;;  %v6250_v2 = vld [vmem:[%s10297_s2 + $0x48] sm:$0xff]   ;;  %p248_p11 = scmp.lt.s32.totalorder %s6542_s0, 1  ;;  %v6252_v6 = vld [vmem:[%s10297_s2 + $0x50] sm:$0xff]   ;;  %v10302_v13 = vlaneseq }
  0x18   : > { %v6249_v1 = vld [vmem:[%s10297_s2] sm:$0xff]   ;;  %6194 = vmatprep.subr.msk.bf16.mxu0 %vm436_vm0, %v6248_v0  ;;  %p243_p10 = scmp.lt.s32.totalorder %s5407_s14, 31  ;;  %v6251_v4 = vld [vmem:[%s10297_s2 + $0x8] sm:$0xff]   ;;  %v6253_v7 = vld [vmem:[%s10297_s2 + $0x10] sm:$0xff]   ;;  %s5412_s29 = sshll.u32 %s6542_s0, 7 }
  0x19   : > { %v462_v3 = vsel %vm436_vm0, %v6249_v1, 0  ;;  %v465_v5 = vsel %vm436_vm0, %v6251_v4, 0  ;;  %s6591_s22 = scalar_select %p248_p11, %s6542_s0, 1  ;;  %v468_v9 = vsel %vm436_vm0, %v6253_v7, 0  ;;  %v6254_v10 = vld [vmem:[%s10297_s2 + $0x58] sm:$0xff]   ;;  %v6256_v16 = vld [vmem:[%s10297_s2 + $0x60] sm:$0xff]   ;;  %v6718_v42 = vstv %s5412_s29 }
  0x1a   : > { %5455 = vmatpush3.bf16.xpose.msra.mxu0 %v462_v3  ;;  %s11885_s14 = smov (!%p243_p10, %s5407_s14), 31  ;;  %v6255_v11 = vld [vmem:[%s10297_s2 + $0x18] sm:$0xff]   ;;  %v6629_v17 = vshrl.u32 %v10302_v13, 7  ;;  %v6257_v18 = vld [vmem:[%s10297_s2 + $0x20] sm:$0xff]   ;;  %v6258_v22 = vld [vmem:[%s10297_s2 + $0x68] sm:$0xff]   ;;  %v6716_v41 = vand.u32 127, %v10302_v13 }
  0x1b   : > { %6195 = vmatprep.subr.msk.bf16.mxu0 %vm436_vm0, %v6250_v2  ;;  %s5408_s21 = sshll.u32 %s11885_s14, 2  ;;  %s5409_s12 = sshll.u32 %s6591_s22, 2  ;;  %v471_v15 = vsel %vm436_vm0, %v6255_v11, 0  ;;  %v474_v21 = vsel %vm436_vm0, %v6257_v18, 0  ;;  %v6259_v24 = vld [vmem:[%s10297_s2 + $0x28] sm:$0xff]   ;;  %v6260_v26 = vld [vmem:[%s10297_s2 + $0x70] sm:$0xff]  }
  0x1c   : > { %s6600_s11 = scalar_lea.vmem %s10296_s1, %s5408_s21  ;;  %s6612_s17 = scalar_lea.vmem %s10298_s3, %s5409_s12  ;;  %10871 = vst [vmem:[#allocation7_spill] sm:$0xff] %v6629_v17  ;;  %v6637_v19 = vsub.s32 0, %v6629_v17  ;;  %v477_v25 = vsel %vm436_vm0, %v6259_v24, 0  ;;  %v6261_v27 = vld [vmem:[%s10297_s2 + $0x30] sm:$0xff]   ;;  %v6262_v29 = vld [vmem:[%s10297_s2 + $0x78] sm:$0xff]   ;;  %v638_v40 = vadd.s32 120, %v6629_v17  ;;  %v6736_v49 = vadd.s32 %v6718_v42, %v6629_v17 }
  0x1d   : > { %v6264_v8 = vld [vmem:[%s6600_s11] sm:$0xff]   ;;  %v480_v28 = vsel %vm436_vm0, %v6261_v27, 0  ;;  %v6263_v30 = vld [vmem:[%s10297_s2 + $0x38] sm:$0xff]   ;;  %v6265_v32 = vld [vmem:[%s6600_s11 + $0x8] sm:$0xff]   ;;  %10873 = vst [vmem:[#allocation9_spill] sm:$0xff] %v6716_v41  ;;  %v6724_v44 = vadd.s32 128, %v6716_v41 }
  0x1e   : > { %5470 = vmatprep.mubr.msk.bf16.mxu0 %vm436_vm0, %v6264_v8  ;;  %v6619_v12 = vld [vmem:[%s6612_s17 + $0x3] ss:$0 sm:$0xff]  ;;  %v259_v14 = vld [vmem:[%s6612_s17] sm:$0x1]  ;;  %10872 = vst [vmem:[#allocation8_spill] sm:$0xff] %v6637_v19  ;;  %v483_v31 = vsel %vm436_vm0, %v6263_v30, 0  ;;  %v6721_v43 = vadd.s32 %v6718_v42, %v638_v40 }
  0x1f   : > { %718 = vbcast.lane.b32.xlu0 %v6619_v12, 288  ;;  %6272 = vrcp.f32 %v259_v14  ;;  %722 = vbcast.lane.b32.xlu1 %v6619_v12, 296  ;;  %v6266_v33 = vld [vmem:[%s6600_s11 + $0x10] sm:$0xff]   ;;  %v6267_v34 = vld [vmem:[%s6600_s11 + $0x18] sm:$0xff]   ;;  %v6687_v35 = vld [vmem:[%s6612_s17 + $0x1] ss:$0 sm:$0xff]  ;;  %vm10425_vm4 = vcmp.ne.s32.totalorder %v6736_v49, %v6724_v44 }
  0x20   : > { %v6268_v36 = vld [vmem:[%s6600_s11 + $0x20] sm:$0xff]   ;;  %v6269_v37 = vld [vmem:[%s6600_s11 + $0x28] sm:$0xff]   ;;  %v6270_v38 = vld [vmem:[%s6600_s11 + $0x30] sm:$0xff]   ;;  %10874 = vst [vmem:[#allocation10_spill] sm:$0xff] %v6718_v42  ;;  %v635_v45 = vadd.s32 96, %v6629_v17  ;;  %v636_v46 = vadd.s32 104, %v6629_v17  ;;  %vm690_vm1 = vcmp.ne.s32.totalorder %v6721_v43, %v6724_v44 }
  0x21   : > { %v6271_v39 = vld [vmem:[%s6600_s11 + $0x38] sm:$0xff]   ;;  %10875 = vst [vmem:[#allocation11_spill] sm:$0xff] %v6721_v43  ;;  %10876 = vst [vmem:[#allocation12_spill] sm:$0xff] %v6724_v44  ;;  %v637_v50 = vadd.s32 112, %v6629_v17  ;;  %v624_v51 = vadd.s32 8, %v6629_v17  ;;  %v625_v52 = vadd.s32 16, %v6629_v17 }
  0x22   : > { %5457 = vmatpush3.bf16.xpose.msra.mxu0 %v465_v5  ;;  %v6729_v47 = vadd.s32 %v6718_v42, %v635_v45  ;;  %v6732_v48 = vadd.s32 %v6718_v42, %v636_v46  ;;  %10879 = vst [vmem:[#allocation15_spill] sm:$0xff] %v6736_v49  ;;  %v626_v56 = vadd.s32 24, %v6629_v17  ;;  %v263_v45 = vld [vmem:[%s10299_s4] ss:$4 sm:$0x3]  ;;  %s5453_s13 = sshll.u32 %s6591_s22, 3 }
  0x23   : > { %6196 = vmatprep.subr.msk.bf16.mxu0 %vm436_vm0, %v6252_v6  ;;  %726 = vbcast.lane.b32.xlu0 %v6619_v12, 304  ;;  %v6750_v53 = vadd.s32 %v6718_v42, %v637_v50  ;;  %v6753_v54 = vadd.s32 %v6718_v42, %v624_v51  ;;  %v6756_v55 = vadd.s32 %v6718_v42, %v625_v52  ;;  %6274 = vrcp.f32 %v263_v45  ;;  %s8294_s16 = scalar_lea.vmem %s10301_s6, %s5453_s13  ;;  %s232_s22 = sand.u32 1, %s6467_s24  }
  0x24   : > { %10877 = vst [vmem:[#allocation13_spill] sm:$0xff] %v6729_v47  ;;  %10878 = vst [vmem:[#allocation14_spill] sm:$0xff] %v6732_v48  ;;  %v6766_v57 = vadd.s32 %v6718_v42, %v626_v56  ;;  %v6477_v45 = vmov 0   ;;  %s5406_s18 = sshll.u32 %s232_s22, 2  ;;  %s10005_s20 = sld [smem:[#allocation3]] }
  0x25   : > { %10880 = vst [vmem:[#allocation16_spill] sm:$0xff] %v6750_v53  ;;  %10881 = vst [vmem:[#allocation17_spill] sm:$0xff] %v6753_v54  ;;  %vm10423_vm6 = vcmp.ne.s32.totalorder %v6753_v54, %v6724_v44  ;;  %vm10455_vm7 = vcmp.ne.s32.totalorder %v6756_v55, %v6724_v44  ;;  %6246 = vset.pattern.permute.xlu1 %v6477_v45  ;;  %6247 = vset.pattern.permute.xlu0 %v6477_v45  ;;  %s9025_s19 = scalar_lea.vmem [#allocation4], %s5406_s18  ;;  %s6482_s15 = smov [#allocation4]  }
  0x26   : > { %10882 = vst [vmem:[#allocation18_spill] sm:$0xff] %v6756_v55  ;;  %10883 = vst [vmem:[#allocation19_spill] sm:$0xff] %v6766_v57  ;;  %vm10452_vm8 = vcmp.ne.s32.totalorder %v6766_v57, %v6724_v44  ;;  %s5303_s30 = sshll.u32 %s9025_s19, 4  ;;  %s10252_s30 = int_to_ptr.vmem [resolvable:$true] %s5303_s30 }
  0x27   : > { %730 = vbcast.lane.b32.xlu0 %v6619_v12, 312  ;;  %s6413_s14 = scalar_lea.vmem %s10252_s30, 64 }
  0x28   : > { %p6414_p13 = scmp.ne.s32.totalorder %s10252_s30, %s6413_s14 }
  0x29   : > { %v6273_v20 = vpop.eup %6272 }
  0x2a   : > { %5459 = vmatpush3.bf16.xpose.msra.mxu0 %v468_v9  ;;  %v799_v23 = vrot.slane %v6273_v20, %v6637_v19  ;;  %p692_p12 = scmp.ne.s32.totalorder %s10005_s20, 0  ;;  %p6415_p0 = pnand %p6414_p13, %p6559_p5 }
  0x2b   : > { %6197 = vmatprep.subr.msk.bf16.mxu0 %vm436_vm0, %v6254_v10  ;;  %734 = vbcast.lane.b32.xlu0 %v6619_v12, 320 }
  0x2c   : > { %821 = vbcast.lane.b32.xlu1 %v799_v23, 296  ;;  %s693_s21 = scalar_select %p692_p12, 1, 0 }
  0x2d   : > { %p6416_p1 = pneg %p6415_p0 }
  0x2e   : > { %s694_s27 = scvt.s32.f32 %s693_s21 }
  0x2f   : > { %738 = vbcast.lane.b32.xlu0 %v6619_v12, 328 }
  0x30   : > { %825 = vbcast.lane.b32.xlu1 %v799_v23, 304  ;;  %s10035_s29 = smul.f32 0.2, %s694_s27 }
  0x32   : > { %5461 = vmatpush3.bf16.xpose.msra.mxu0 %v471_v15  ;;  %s696_s11 = ssub.f32 1.0, %s10035_s29 }
  0x33   : > { %6198 = vmatprep.subr.msk.bf16.mxu0 %vm436_vm0, %v6256_v16  ;;  %817 = vbcast.lane.b32.xlu0 %v799_v23, 288 }
  0x34   : > { %829 = vbcast.lane.b32.xlu1 %v799_v23, 312 }
  0x37   : > { %742 = vbcast.lane.b32.xlu0 %v6619_v12, 336 }
  0x38   : > { %833 = vbcast.lane.b32.xlu1 %v799_v23, 320 }
  0x3a   : > { %5463 = vmatpush3.bf16.xpose.msra.mxu0 %v474_v21 }
  0x3b   : > { %6199 = vmatprep.subr.msk.bf16.mxu0 %vm436_vm0, %v6258_v22  ;;  %746 = vbcast.lane.b32.xlu0 %v6619_v12, 344 }
  0x3c   : > { %837 = vbcast.lane.b32.xlu1 %v799_v23, 328 }
  0x3f   : > { %750 = vbcast.lane.b32.xlu0 %v6619_v12, 352 }
  0x40   : > { %841 = vbcast.lane.b32.xlu1 %v799_v23, 336 }
  0x42   : > { %5465 = vmatpush3.bf16.xpose.msra.mxu0 %v477_v25 }
  0x43   : > { %6200 = vmatprep.subr.msk.bf16.mxu0 %vm436_vm0, %v6260_v26  ;;  %754 = vbcast.lane.b32.xlu0 %v6619_v12, 360 }
  0x44   : > { %845 = vbcast.lane.b32.xlu1 %v799_v23, 344 }
  0x47   : > { %758 = vbcast.lane.b32.xlu0 %v6619_v12, 368 }
  0x48   : > { %849 = vbcast.lane.b32.xlu1 %v799_v23, 352 }
  0x4a   : > { %5467 = vmatpush3.bf16.xpose.msra.mxu0 %v480_v28 }
  0x4b   : > { %6201 = vmatprep.subr.msk.bf16.mxu0 %vm436_vm0, %v6262_v29  ;;  %762 = vbcast.lane.b32.xlu0 %v6619_v12, 376 }
  0x4c   : > { %853 = vbcast.lane.b32.xlu1 %v799_v23, 360 }
  0x4f   : > { %702 = vbcast.lane.b32.xlu0 %v6619_v12, 256 }
  0x50   : > { %857 = vbcast.lane.b32.xlu1 %v799_v23, 368 }
  0x52   : > { %5469 = vmatpush3.bf16.xpose.msra.mxu0 %v483_v31 }
  0x53   : > { %706 = vbcast.lane.b32.xlu0 %v6619_v12, 264 }
  0x54   : > { %861 = vbcast.lane.b32.xlu1 %v799_v23, 376 }
  0x57   : > { %710 = vbcast.lane.b32.xlu0 %v6619_v12, 272 }
  0x58   : > { %801 = vbcast.lane.b32.xlu1 %v799_v23, 256 }
  0x59   : > { %5471 = vmatmul.mubr.msk.bf16.vlgmr.msra.gmra.mrb[0].mxu0 %vm436_vm0, %v6264_v8 }
  0x5a   : > { %5472 = vmatprep.mubr.msk.bf16.mxu0 %vm436_vm0, %v6265_v32 }
  0x5b   : > { %809 = vbcast.lane.b32.xlu0 %v799_v23, 272 }
  0x5c   : > { %805 = vbcast.lane.b32.xlu1 %v799_v23, 264 }
  0x5f   : > { %714 = vbcast.lane.b32.xlu0 %v6619_v12, 280 }
  0x60   : > { %813 = vbcast.lane.b32.xlu1 %v799_v23, 280 }
  0x61   : > { %5473 = vmatmul.mubr.msk.bf16.gmra.mrb[4].mxu0 %vm436_vm0, %v6265_v32 }
  0x62   : > { %5474 = vmatprep.mubr.msk.bf16.mxu0 %vm436_vm0, %v6266_v33 }
  0x63   : > { %965 = vbcast.lane.b32.xlu0 %v6687_v35, 288 }
  0x64   : > { %973 = vbcast.lane.b32.xlu1 %v6687_v35, 304 }
  0x67   : > { %969 = vbcast.lane.b32.xlu0 %v6687_v35, 296 }
  0x68   : > { %981 = vbcast.lane.b32.xlu1 %v6687_v35, 320 }
  0x69   : > { %5475 = vmatmul.mubr.msk.bf16.gmra.mrb[8].mxu0 %vm436_vm0, %v6266_v33 }
  0x6a   : > { %5476 = vmatprep.mubr.msk.bf16.mxu0 %vm436_vm0, %v6267_v34 }
  0x6b   : > { %977 = vbcast.lane.b32.xlu0 %v6687_v35, 312 }
  0x6c   : > { %989 = vbcast.lane.b32.xlu1 %v6687_v35, 336 }
  0x6f   : > { %985 = vbcast.lane.b32.xlu0 %v6687_v35, 328 }
  0x70   : > { %997 = vbcast.lane.b32.xlu1 %v6687_v35, 352 }
  0x71   : > { %5477 = vmatmul.mubr.msk.bf16.gmra.mrb[12].mxu0 %vm436_vm0, %v6267_v34 }
  0x72   : > { %5478 = vmatprep.mubr.msk.bf16.mxu0 %vm436_vm0, %v6268_v36 }
  0x73   : > { %993 = vbcast.lane.b32.xlu0 %v6687_v35, 344 }
  0x77   : > { %1005 = vbcast.lane.b32.xlu0 %v6687_v35, 368 }
  0x79   : > { %5479 = vmatmul.mubr.msk.bf16.gmra.mrb[16].mxu0 %vm436_vm0, %v6268_v36 }
  0x7a   : > { %5480 = vmatprep.mubr.msk.bf16.mxu0 %vm436_vm0, %v6269_v37 }
  0x81   : > { %5481 = vmatmul.mubr.msk.bf16.gmra.mrb[20].mxu0 %vm436_vm0, %v6269_v37 }
  0x82   : > { %5482 = vmatprep.mubr.msk.bf16.mxu0 %vm436_vm0, %v6270_v38 }
  0x89   : > { %5483 = vmatmul.mubr.msk.bf16.gmra.mrb[24].mxu0 %vm436_vm0, %v6270_v38 }
  0x8a   : > { %5484 = vmatprep.mubr.msk.bf16.mxu0 %vm436_vm0, %v6271_v39 }
  0x91   : > { %5485 = vmatmul.mubr.msk.bf16.gmra.mrb[28].mxu0 %vm436_vm0, %v6271_v39  ;;  %v719_v58 = vpop.permute.xlu0 %718  ;;  %v723_v60 = vpop.permute.xlu1 %722 }
  0x95   : > { %v727_v59 = vpop.permute.xlu0 %726 }
  0x99   : > { %v731_v61 = vpop.permute.xlu0 %730 }
  0x9d   : > { %v6778_v3 = vpop.permute.xlu0 %734 }
  0x9e   : > { %v822_v62 = vpop.permute.xlu1 %821 }
  0xa1   : > { %v739_v8 = vpop.permute.xlu0 %738 }
  0xa2   : > { %v826_v4 = vpop.permute.xlu1 %825 }
  0xa5   : > { %v818_v12 = vpop.permute.xlu0 %817 }
  0xa6   : > { %v830_v10 = vpop.permute.xlu1 %829 }
  0xa9   : > { %v6819_v34 = vpop.permute.xlu0 %742 }
  0xaa   : > { %v6793_v16 = vpop.permute.xlu1 %833 }
  0xae   : > { %v838_v29 = vpop.permute.xlu1 %837 }
  0xb2   : > { %v6835_v51 = vpop.permute.xlu1 %841 }
 0x12c   : > { %v6770_v63 = vpop.f32.mrb[0].mxu0 }
 0x12d   : > { %v6772_v0 = vpop.f32.mrb[1].mxu0 }
 0x12e   : > { %v6774_v1 = vpop.f32.mrb[2].mxu0 }
 0x12f   : > { %v6776_v2 = vpop.f32.mrb[3].mxu0 }
 0x134   : > { %v6780_v5 = vpop.f32.mrb[4].mxu0 }
 0x135   : > { %v6782_v6 = vpop.f32.mrb[5].mxu0 }
 0x136   : > { %v6784_v7 = vpop.f32.mrb[6].mxu0 }
 0x137   : > { %v6786_v9 = vpop.f32.mrb[7].mxu0 }
 0x13c   : > { %v6788_v11 = vpop.f32.mrb[8].mxu0 }
 0x13d   : > { %v772_v14 = vsub.f32 %v6788_v11, %v719_v58  ;;  %v6791_v15 = vpop.f32.mrb[9].mxu0 }
 0x13e   : > { %v773_v18 = vsub.f32 %v6791_v15, %v719_v58  ;;  %v6796_v20 = vpop.f32.mrb[10].mxu0 }
 0x13f   : > { %v6798_v21 = vmul.f32 %v818_v12, %v772_v14  ;;  %v774_v22 = vsub.f32 %v6796_v20, %v723_v60  ;;  %v6801_v23 = vpop.f32.mrb[11].mxu0 }
 0x140   : > { %v6803_v24 = vmul.f32 %v818_v12, %v773_v18  ;;  %v775_v25 = vsub.f32 %v6801_v23, %v723_v60  ;;  %v3256_v18 = vsub.s32 1, %v6629_v17 }
 0x141   : > { %10884 = vst [vmem:[#allocation20_spill] sm:$0xff] %v6798_v21  ;;  %v6806_v26 = vmul.f32 %v822_v62, %v774_v22 }
 0x142   : > { %10885 = vst [vmem:[#allocation21_spill] sm:$0xff] %v6803_v24  ;;  %v6808_v27 = vmul.f32 %v822_v62, %v775_v25  ;;  %v907_v28 = vmax.f32 %v6798_v21, %v6803_v24  ;;  %v6859_v25 = vld [vmem:[%s10299_s4 + $0x3] ss:$4 sm:$0x3] }
 0x143   : > { %10886 = vst [vmem:[#allocation22_spill] sm:$0xff] %v6806_v26 }
 0x144   : > { %10887 = vst [vmem:[#allocation23_spill] sm:$0xff] %v6808_v27  ;;  %908 = vmax.xlane.f32.xlu1 %v907_v28  ;;  %v6812_v30 = vpop.f32.mrb[12].mxu0  ;;  %v910_v31 = vmax.f32 %v6806_v26, %v6808_v27 }
 0x145   : > { %v776_v32 = vsub.f32 %v6812_v30, %v727_v59  ;;  %v6817_v33 = vpop.f32.mrb[13].mxu0 }
 0x146   : > { %v777_v36 = vsub.f32 %v6817_v33, %v727_v59  ;;  %911 = vmax.xlane.f32.xlu0 %v910_v31  ;;  %v6822_v37 = vpop.f32.mrb[14].mxu0  ;;  %v747_v59 = vpop.permute.xlu0 %746 }
 0x147   : > { %v6824_v38 = vmul.f32 %v826_v4, %v776_v32  ;;  %v778_v39 = vsub.f32 %v6822_v37, %v731_v61  ;;  %v6827_v40 = vpop.f32.mrb[15].mxu0 }
 0x148   : > { %v6832_v46 = vmul.f32 %v826_v4, %v777_v36  ;;  %v779_v50 = vsub.f32 %v6827_v40, %v731_v61  ;;  %v6868_v36 = vrot.slane %v6859_v25, %v3256_v18 }
 0x149   : > { %10888 = vst [vmem:[#allocation24_spill] sm:$0xff] %v6824_v38  ;;  %v6837_v52 = vmul.f32 %v830_v10, %v778_v39 }
 0x14a   : > { %10889 = vst [vmem:[#allocation25_spill] sm:$0xff] %v6832_v46  ;;  %v6839_v56 = vmul.f32 %v830_v10, %v779_v50  ;;  %v913_v58 = vmax.f32 %v6824_v38, %v6832_v46  ;;  %v846_v10 = vpop.permute.xlu1 %845  ;;  %v6863_v31 = vpop.permute.xlu0 %750  ;;  %v3263_v46 = vsub.f32 %v6776_v2, %v6868_v36  ;;  %v3271_v38 = vsub.f32 %v6801_v23, %v6868_v36 }
 0x14b   : > { %10890 = vst [vmem:[#allocation26_spill] sm:$0xff] %v6837_v52  ;;  %v6874_v50 = vpop.eup %6274 }
 0x14c   : > { %10891 = vst [vmem:[#allocation27_spill] sm:$0xff] %v6839_v56  ;;  %914 = vmax.xlane.f32.xlu0 %v913_v58  ;;  %v6843_v60 = vpop.f32.mrb[16].mxu0  ;;  %v916_v61 = vmax.f32 %v6837_v52, %v6839_v56  ;;  %v6891_v56 = vrot.slane %v6874_v50, %v3256_v18 }
 0x14d   : > { %v6845_v62 = vpop.f32.mrb[17].mxu0 }
 0x14e   : > { %v6847_v4 = vpop.f32.mrb[18].mxu0 }
 0x14f   : > { %v782_v12 = vsub.f32 %v6847_v4, %v739_v8  ;;  %v6852_v14 = vpop.f32.mrb[19].mxu0 }
 0x150   : > { %v783_v22 = vsub.f32 %v6852_v14, %v739_v8  ;;  %917 = vmax.xlane.f32.xlu0 %v916_v61  ;;  %v6879_v61 = vpop.permute.xlu1 %849 }
 0x151   : > { %v6861_v28 = vmul.f32 %v838_v29, %v782_v12 }
 0x152   : > { %v6865_v32 = vmul.f32 %v838_v29, %v783_v22  ;;  %v3265_v29 = vsub.f32 %v6782_v6, %v6868_v36  ;;  %v3267_v22 = vsub.f32 %v6786_v9, %v6868_v36 }
 0x153   : > { %10892 = vst [vmem:[#allocation28_spill] sm:$0xff] %v6861_v28 }
 0x154   : > { %10893 = vst [vmem:[#allocation29_spill] sm:$0xff] %v6865_v32  ;;  %v6870_v39 = vpop.f32.mrb[20].mxu0  ;;  %v922_v8 = vmax.f32 %v6861_v28, %v6865_v32  ;;  %v755_v32 = vpop.permute.xlu0 %754  ;;  %v3261_v28 = vsub.f32 %v6772_v0, %v6868_v36  ;;  %v6902_v26 = vmul.f32 %v6891_v56, %v3265_v29  ;;  %v6907_v18 = vmul.f32 %v6891_v56, %v3267_v22 }
 0x155   : > { %1001 = vbcast.lane.b32.xlu1 %v6687_v35, 360  ;;  %v6877_v58 = vpop.f32.mrb[21].mxu0  ;;  %v854_v21 = vpop.permute.xlu1 %853 }
 0x156   : > { %923 = vmax.xlane.f32.xlu0 %v922_v8  ;;  %v6883_v12 = vpop.f32.mrb[22].mxu0  ;;  %v3269_v8 = vsub.f32 %v6791_v15, %v6868_v36  ;;  %10895 = vst [vmem:[#allocation31_spill] sm:$0xff] %v6902_v26  ;;  %10897 = vst [vmem:[#allocation33_spill] sm:$0xff] %v6907_v18  ;;  %v6912_v53 = vmul.f32 %v6891_v56, %v3261_v28  ;;  %v3275_v15 = vsub.f32 %v6827_v40, %v6868_v36 }
 0x157   : > { %v786_v13 = vsub.f32 %v6883_v12, %v747_v59  ;;  %v599_v45 = vpop.f32.mrb[23].mxu0  ;;  %v3277_v28 = vsub.f32 %v6845_v62, %v6868_v36 }
 0x158   : > { %v787_v52 = vsub.f32 %v599_v45, %v747_v59  ;;  %v3273_v59 = vsub.f32 %v6817_v33, %v6868_v36  ;;  %v6927_v33 = vmul.f32 %v6891_v56, %v3271_v38  ;;  %v6933_v40 = vpop.permute.xlu0 %758  ;;  %v3356_v22 = vmax.f32 %v6912_v53, %v6902_v26 }
 0x159   : > { %v6899_v27 = vmul.f32 %v846_v10, %v786_v13  ;;  %v6950_v57 = vmul.f32 %v6891_v56, %v3275_v15  ;;  %v6956_v41 = vmul.f32 %v6891_v56, %v3277_v28  ;;  %v6960_v42 = vpop.permute.xlu1 %857 }
 0x15a   : > { %v6904_v24 = vmul.f32 %v846_v10, %v787_v52  ;;  %v6921_v52 = vmul.f32 %v6891_v56, %v3263_v46  ;;  %v6924_v10 = vmul.f32 %v6891_v56, %v3269_v8  ;;  %10899 = vst [vmem:[#allocation35_spill] sm:$0xff] %v6927_v33  ;;  %v3279_v46 = vsub.f32 %v6852_v14, %v6868_v36 }
 0x15b   : > { %10894 = vst [vmem:[#allocation30_spill] sm:$0xff] %v6899_v27  ;;  %v6944_v8 = vmul.f32 %v6891_v56, %v3273_v59  ;;  %10901 = vst [vmem:[#allocation37_spill] sm:$0xff] %v6950_v57  ;;  %v3283_v14 = vsub.f32 %v599_v45, %v6868_v36 }
 0x15c   : > { %10896 = vst [vmem:[#allocation32_spill] sm:$0xff] %v6904_v24  ;;  %v6916_v13 = vpop.f32.mrb[24].mxu0  ;;  %v928_v23 = vmax.f32 %v6899_v27, %v6904_v24  ;;  %10898 = vst [vmem:[#allocation34_spill] sm:$0xff] %v6924_v10  ;;  %v3357_v38 = vmax.f32 %v6921_v52, %v6907_v18  ;;  %v3281_v27 = vsub.f32 %v6877_v58, %v6868_v36  ;;  %v763_v28 = vpop.permute.xlu0 %762 }
 0x15d   : > { %v6931_v29 = vpop.f32.mrb[25].mxu0  ;;  %10900 = vst [vmem:[#allocation36_spill] sm:$0xff] %v6944_v8  ;;  %v3358_v55 = vmax.f32 %v3356_v22, %v6924_v10  ;;  %10902 = vst [vmem:[#allocation38_spill] sm:$0xff] %v6956_v41  ;;  %v6963_v18 = vmul.f32 %v6891_v56, %v3279_v46 }
 0x15e   : > { %929 = vmax.xlane.f32.xlu0 %v928_v23  ;;  %v6939_v24 = vpop.f32.mrb[26].mxu0  ;;  %v3359_v43 = vmax.f32 %v3357_v38, %v6927_v33  ;;  %v3285_v15 = vsub.f32 %v6931_v29, %v6868_v36  ;;  %v6972_v22 = vmul.f32 %v6891_v56, %v3281_v27  ;;  %v6976_v38 = vmul.f32 %v6891_v56, %v3283_v14 }
 0x15f   : > { %v790_v48 = vsub.f32 %v6939_v24, %v755_v32  ;;  %v609_v47 = vpop.f32.mrb[27].mxu0  ;;  %10904 = vst [vmem:[#allocation40_spill] sm:$0xff] %v6963_v18  ;;  %v3360_v45 = vmax.f32 %v3358_v55, %v6944_v8 }
 0x160   : > { %v791_v23 = vsub.f32 %v609_v47, %v755_v32  ;;  %v3287_v32 = vsub.f32 %v609_v47, %v6868_v36  ;;  %10906 = vst [vmem:[#allocation42_spill] sm:$0xff] %v6972_v22  ;;  %10907 = vst [vmem:[#allocation43_spill] sm:$0xff] %v6976_v38  ;;  %v6985_v55 = vmul.f32 %v6891_v56, %v3285_v15 }
 0x161   : > { %v6958_v59 = vmul.f32 %v854_v21, %v790_v48  ;;  %v3361_v48 = vmax.f32 %v3359_v43, %v6950_v57  ;;  %v703_v57 = vpop.permute.xlu0 %702 }
 0x162   : > { %v6967_v26 = vmul.f32 %v854_v21, %v791_v23  ;;  %v3362_v21 = vmax.f32 %v3360_v45, %v6956_v41  ;;  %10908 = vst [vmem:[#allocation44_spill] sm:$0xff] %v6985_v55  ;;  %v6988_v27 = vmul.f32 %v6891_v56, %v3287_v32  ;;  %v862_v45 = vpop.permute.xlu1 %861 }
 0x163   : > { %10903 = vst [vmem:[#allocation39_spill] sm:$0xff] %v6958_v59  ;;  %v3363_v47 = vmax.f32 %v3361_v48, %v6963_v18 }
 0x164   : > { %10905 = vst [vmem:[#allocation41_spill] sm:$0xff] %v6967_v26  ;;  %v6978_v46 = vpop.f32.mrb[28].mxu0  ;;  %v934_v33 = vmax.f32 %v6958_v59, %v6967_v26  ;;  %v3364_v10 = vmax.f32 %v3362_v21, %v6972_v22 }
 0x165   : > { %v615_v23 = vpop.f32.mrb[29].mxu0  ;;  %v3365_v41 = vmax.f32 %v3363_v47, %v6976_v38 }
 0x166   : > { %v3289_v43 = vsub.f32 %v615_v23, %v6868_v36  ;;  %935 = vmax.xlane.f32.xlu0 %v934_v33  ;;  %v6991_v14 = vpop.f32.mrb[30].mxu0  ;;  %v3366_v33 = vmax.f32 %v3364_v10, %v6985_v55  ;;  %v7017_v10 = vpop.permute.xlu0 %706 }
 0x167   : > { %v794_v26 = vsub.f32 %v6991_v14, %v763_v28  ;;  %v619_v59 = vpop.f32.mrb[31].mxu0  ;;  %v3367_v8 = vmax.f32 %v3365_v41, %v6988_v27  ;;  %v781_v41 = vsub.f32 %v6845_v62, %v6778_v3 }
 0x168   : > { %v6997_v48 = vmul.f32 %v6891_v56, %v3289_v43  ;;  %v795_v15 = vsub.f32 %v619_v59, %v763_v28  ;;  %v3291_v32 = vsub.f32 %v619_v59, %v6868_v36 }
 0x169   : > { %v7000_v18 = vmul.f32 %v862_v45, %v794_v26  ;;  %v780_v26 = vsub.f32 %v6843_v60, %v6778_v3 }
 0x16a   : > { %v7004_v21 = vmul.f32 %v862_v45, %v795_v15  ;;  %v7007_v22 = vmul.f32 %v6891_v56, %v3291_v32  ;;  %v3368_v47 = vmax.f32 %v3366_v33, %v6997_v48  ;;  %v784_v56 = vsub.f32 %v6870_v39, %v6819_v34 }
 0x16b   : > { %10909 = vst [vmem:[#allocation45_spill] sm:$0xff] %v7000_v18  ;;  %v7024_v15 = vmul.f32 %v6793_v16, %v780_v26  ;;  %v7027_v32 = vmul.f32 %v6793_v16, %v781_v41 }
 0x16c   : > { %10910 = vst [vmem:[#allocation46_spill] sm:$0xff] %v7004_v21  ;;  %10911 = vst [vmem:[#allocation47_spill] sm:$0xff] %v7007_v22  ;;  %v3369_v43 = vmax.f32 %v3367_v8, %v7007_v22  ;;  %v940_v28 = vmax.f32 %v7000_v18, %v7004_v21  ;;  %v785_v8 = vsub.f32 %v6877_v58, %v6819_v34 }
 0x16d   : > { %10912 = vst [vmem:[#allocation48_spill] sm:$0xff] %v7024_v15  ;;  %10913 = vst [vmem:[#allocation49_spill] sm:$0xff] %v7027_v32  ;;  %v7030_v3 = vmul.f32 %v6835_v51, %v784_v56  ;;  %v789_v34 = vsub.f32 %v6931_v29, %v6863_v31  ;;  %v919_v58 = vmax.f32 %v7024_v15, %v7027_v32  ;;  %v802_v29 = vpop.permute.xlu1 %801  ;;  %v634_v32 = vadd.s32 88, %v6629_v17  ;;  %v10954_v15 = vld [vmem:[#allocation37_spill] sm:$0xff] }
 0x16e   : > { %v3370_v36 = vmax.f32 %v3368_v47, %v3369_v43  ;;  %941 = vmax.xlane.f32.xlu0 %v940_v28  ;;  %v711_v47 = vpop.permute.xlu0 %710  ;;  %v7033_v62 = vmul.f32 %v6835_v51, %v785_v8  ;;  %v788_v28 = vsub.f32 %v6916_v13, %v6863_v31  ;;  %v793_v31 = vsub.f32 %v615_v23, %v6933_v40 }
 0x16f   : > { %10914 = vst [vmem:[#allocation50_spill] sm:$0xff] %v7030_v3  ;;  %v7049_v41 = vmul.f32 %v6879_v61, %v789_v34 }
 0x170   : > { %v3371_v59 = vrot.slane %v3370_v36, 4  ;;  %10915 = vst [vmem:[#allocation51_spill] sm:$0xff] %v7033_v62  ;;  %v925_v26 = vmax.f32 %v7030_v3, %v7033_v62  ;;  %v7046_v51 = vmul.f32 %v6879_v61, %v788_v28  ;;  %v7064_v34 = vmul.f32 %v6960_v42, %v793_v31 }
 0x171   : > { %10918 = vst [vmem:[#allocation54_spill] sm:$0xff] %v7049_v41 }
 0x172   : > { %v3372_v45 = vmax.f32 %v3370_v36, %v3371_v59  ;;  %10917 = vst [vmem:[#allocation53_spill] sm:$0xff] %v7046_v51  ;;  %v792_v59 = vsub.f32 %v6978_v46, %v6933_v40  ;;  %v810_v56 = vpop.permute.xlu0 %809  ;;  %10920 = vst [vmem:[#allocation56_spill] sm:$0xff] %v7064_v34  ;;  %v931_v40 = vmax.f32 %v7046_v51, %v7049_v41 }
 0x174   : > { %v3373_v33 = vrot.slane %v3372_v45, 2  ;;  %v7061_v28 = vmul.f32 %v6960_v42, %v792_v59  ;;  %v768_v42 = vsub.f32 %v6780_v5, %v711_v47  ;;  %v769_v59 = vsub.f32 %v6782_v6, %v711_v47 }
 0x176   : > { %v3374_v43 = vmax.f32 %v3372_v45, %v3373_v33  ;;  %v764_v33 = vsub.f32 %v6770_v63, %v703_v57  ;;  %10919 = vst [vmem:[#allocation55_spill] sm:$0xff] %v7061_v28  ;;  %v937_v31 = vmax.f32 %v7061_v28, %v7064_v34  ;;  %v631_v28 = vadd.s32 64, %v6629_v17 }
 0x178   : > { %v3375_v16 = vrot.slane %v3374_v43, 1 }
 0x179   : > { %920 = vmax.xlane.f32.xlu1 %v919_v58  ;;  %v7068_v58 = vmul.f32 %v802_v29, %v764_v33  ;;  %v7093_v33 = vmul.f32 %v810_v56, %v768_v42 }
 0x17a   : > { %v7041_v36 = vmax.f32 %v3374_v43, %v3375_v16  ;;  %v765_v43 = vsub.f32 %v6772_v0, %v703_v57  ;;  %v7072_v16 = vrot.slane %v6859_v25, %v6637_v19  ;;  %v7076_v57 = vpop.permute.xlu1 %805  ;;  %v715_v0 = vpop.permute.xlu0 %714 }
 0x17b   : > { %10921 = vst [vmem:[#allocation57_spill] sm:$0xff] %v7068_v58  ;;  %v770_v25 = vsub.f32 %v6784_v7, %v715_v0  ;;  %10923 = vst [vmem:[#allocation59_spill] sm:$0xff] %v7093_v33 }
 0x17c   : > { %10916 = vst [vmem:[#allocation52_spill] sm:$0xff] %v7041_v36  ;;  %v3378_v8 = vsub.f32 %v6912_v53, %v7041_v36  ;;  %v3380_v45 = vsub.f32 %v6921_v52, %v7041_v36  ;;  %v3262_v6 = vsub.f32 %v6774_v1, %v7072_v16  ;;  %v3392_v21 = vsub.f32 %v10954_v15, %v7041_v36 }
 0x17d   : > { %926 = vmax.xlane.f32.xlu1 %v925_v26  ;;  %v7074_v26 = vmul.f32 %v802_v29, %v765_v43  ;;  %v771_v29 = vsub.f32 %v6786_v9, %v715_v0  ;;  %v7095_v43 = vmul.f32 %v810_v56, %v769_v59  ;;  %v3264_v9 = vsub.f32 %v6780_v5, %v7072_v16 }
 0x17e   : > { %v3411_v61 = vmul.f32 1.442695, %v3378_v8  ;;  %v3415_v23 = vmul.f32 1.442695, %v3380_v45  ;;  %v3266_v8 = vsub.f32 %v6784_v7, %v7072_v16  ;;  %v7089_v45 = vrot.slane %v6874_v50, %v6637_v19  ;;  %v814_v47 = vpop.permute.xlu1 %813 }
 0x17f   : > { %10922 = vst [vmem:[#allocation58_spill] sm:$0xff] %v7074_v26  ;;  %10924 = vst [vmem:[#allocation60_spill] sm:$0xff] %v7095_v43  ;;  %v3260_v7 = vsub.f32 %v6770_v63, %v7072_v16  ;;  %v3270_v56 = vsub.f32 %v6796_v20, %v7072_v16  ;;  %v3268_v63 = vsub.f32 %v6788_v11, %v7072_v16 }
 0x180   : > { %6276 = vpow2.f32 %v3411_v61  ;;  %v895_v61 = vmax.f32 %v7068_v58, %v7074_v26  ;;  %v7104_v50 = vmul.f32 %v7089_v45, %v3266_v8  ;;  %v7113_v0 = vmul.f32 %v7089_v45, %v3262_v6 }
 0x181   : > { %932 = vmax.xlane.f32.xlu1 %v931_v40  ;;  %6278 = vpow2.f32 %v3415_v23  ;;  %v7106_v40 = vmul.f32 %v814_v47, %v770_v25  ;;  %v7108_v23 = vmul.f32 %v814_v47, %v771_v29  ;;  %v3274_v5 = vsub.f32 %v6822_v37, %v7072_v16 }
 0x182   : > { %v901_v42 = vmax.f32 %v7093_v33, %v7095_v43  ;;  %v7125_v8 = vmul.f32 %v7089_v45, %v3264_v9  ;;  %v3336_v20 = vmax.f32 %v7113_v0, %v7104_v50  ;;  %v7130_v29 = vmul.f32 %v7089_v45, %v3270_v56  ;;  %v10947_v33 = vld [vmem:[#allocation10_spill] sm:$0xff] }
 0x183   : > { %10925 = vst [vmem:[#allocation61_spill] sm:$0xff] %v7106_v40  ;;  %10926 = vst [vmem:[#allocation62_spill] sm:$0xff] %v7108_v23  ;;  %v3272_v11 = vsub.f32 %v6812_v30, %v7072_v16  ;;  %v904_v37 = vmax.f32 %v7106_v40, %v7108_v23  ;;  %v3278_v47 = vsub.f32 %v6847_v4, %v7072_v16 }
 0x184   : > { %1009 = vbcast.lane.b32.xlu0 %v6687_v35, 376  ;;  %10927 = vst [vmem:[#allocation63_spill] sm:$0xff] %v7130_v29  ;;  %v7154_v9 = vmul.f32 %v7089_v45, %v3268_v63  ;;  %v7157_v56 = vmul.f32 %v7089_v45, %v3274_v5  ;;  %v3338_v5 = vmax.f32 %v3336_v20, %v7130_v29 }
 0x185   : > { %938 = vmax.xlane.f32.xlu1 %v937_v31  ;;  %v7122_v31 = vmul.f32 %v7089_v45, %v3260_v7  ;;  %v3286_v20 = vsub.f32 %v6939_v24, %v7072_v16  ;;  %v7331_v18 = vadd.s32 %v10947_v33, %v631_v28 }
 0x186   : > { %10930 = vst [vmem:[#allocation66_spill] sm:$0xff] %v7154_v9  ;;  %10931 = vst [vmem:[#allocation67_spill] sm:$0xff] %v7157_v56 }
 0x187   : > { %10955 = vst [vmem:[#allocation81_spill] sm:$0xff] %v7331_v18 }
 0x189   : > { %896 = vmax.xlane.f32.xlu1 %v895_v61 }
 0x18a   : > { %v6277_v59 = vpop.eup %6276 }
 0x18b   : > { %v6279_v25 = vpop.eup %6278  ;;  %v7139_v6 = vsel %vm10425_vm4, %v6277_v59, 0.0  ;;  %v3335_v59 = vmax.f32 %v7122_v31, %v7125_v8 }
 0x18c   : > { %10928 = vst [vmem:[#allocation64_spill] sm:$0xff] %v7139_v6  ;;  %v7146_v61 = vsel %vm10423_vm6, %v6279_v25, 0.0  ;;  %v10366_v7 = vand.u32 4294901760, %v7139_v6  ;;  %v7151_v30 = vmul.f32 %v7139_v6, %v6912_v53  ;;  %v3276_v25 = vsub.f32 %v6843_v60, %v7072_v16 }
 0x18d   : > { %902 = vmax.xlane.f32.xlu1 %v901_v42  ;;  %10929 = vst [vmem:[#allocation65_spill] sm:$0xff] %v7146_v61  ;;  %v7162_v4 = vmul.f32 %v7146_v61, %v6921_v52  ;;  %v3282_v53 = vsub.f32 %v6883_v12, %v7072_v16  ;;  %v7177_v42 = vmul.f32 %v7089_v45, %v3272_v11  ;;  %v10933_v52 = vand.u32 4294901760, %v7146_v61 }
 0x18e   : > { %v7173_v63 = vsub.f32 %v7139_v6, %v10366_v7  ;;  %v7186_v12 = vmul.f32 %v7089_v45, %v3278_v47  ;;  %v3280_v7 = vsub.f32 %v6870_v39, %v7072_v16  ;;  %v3337_v11 = vmax.f32 %v3335_v59, %v7154_v9 }
 0x18f   : > { %v7182_v19 = vsub.f32 %v7146_v61, %v10933_v52  ;;  %v7196_v52 = vmul.f32 %v7089_v45, %v3276_v25  ;;  %v7199_v60 = vmul.f32 %v7089_v45, %v3282_v53  ;;  %v3284_v47 = vsub.f32 %v6916_v13, %v7072_v16 }
 0x190   : > { %10932 = vst [vmem:[#allocation68_spill] sm:$0xff] %v7173_v63  ;;  %10935 = vst [vmem:[#allocation70_spill] sm:$0xff] %v7186_v12  ;;  %v10370_v63 = vand.u32 4294901760, %v7162_v4  ;;  %v3290_v39 = vsub.f32 %v6991_v14, %v7072_v16  ;;  %v3339_v24 = vmax.f32 %v3337_v11, %v7177_v42  ;;  %v10938_v59 = vand.u32 4294901760, %v7151_v30 }
 0x191   : > { %905 = vmax.xlane.f32.xlu1 %v904_v37  ;;  %10934 = vst [vmem:[#allocation69_spill] sm:$0xff] %v7182_v19  ;;  %v3340_v37 = vmax.f32 %v3338_v5, %v7157_v56  ;;  %10936 = vst [vmem:[#allocation71_spill] sm:$0xff] %v7196_v52  ;;  %v7214_v19 = vmul.f32 %v7089_v45, %v3280_v7  ;;  %v7217_v53 = vmul.f32 %v7089_v45, %v3286_v20 }
 0x192   : > { %10937 = vst [vmem:[#allocation72_spill] sm:$0xff] %v7199_v60  ;;  %v7210_v5 = vpack.c.bf16 %v10370_v63, %v10938_v59  ;;  %v3288_v13 = vsub.f32 %v6978_v46, %v7072_v16  ;;  %v3341_v14 = vmax.f32 %v3339_v24, %v7196_v52  ;;  %v7224_v61 = vmul.f32 %v7089_v45, %v3284_v47 }
 0x193   : > { %v3342_v25 = vmax.f32 %v3340_v37, %v7186_v12  ;;  %10940 = vst [vmem:[#allocation74_spill] sm:$0xff] %v7214_v19  ;;  %v7227_v59 = vmul.f32 %v7089_v45, %v3290_v39  ;;  %v766_v7 = vsub.f32 %v6774_v1, %v7017_v10  ;;  %v767_v20 = vsub.f32 %v6776_v2, %v7017_v10 }
 0x194   : > { %10939 = vst [vmem:[#allocation73_spill] sm:$0xff] %v7210_v5  ;;  %v3343_v37 = vmax.f32 %v3341_v14, %v7214_v19  ;;  %v7236_v16 = vmul.f32 %v7089_v45, %v3288_v13  ;;  %v630_v63 = vadd.s32 56, %v6629_v17  ;;  %v10944_v5 = vld [vmem:[#allocation31_spill] sm:$0xff] }
 0x195   : > { %v3344_v11 = vmax.f32 %v3342_v25, %v7199_v60  ;;  %v7241_v39 = vmul.f32 %v7076_v57, %v766_v7  ;;  %v7244_v25 = vmul.f32 %v7076_v57, %v767_v20  ;;  %v7251_v7 = vpop.permute.xlu0 %965  ;;  %v3382_v6 = vsub.f32 %v10944_v5, %v7041_v36 }
 0x196   : > { %v3345_v24 = vmax.f32 %v3343_v37, %v7224_v61  ;;  %v7311_v41 = vadd.s32 %v10947_v33, %v630_v63  ;;  %v10952_v63 = vld [vmem:[#allocation36_spill] sm:$0xff] }
 0x197   : > { %v3346_v46 = vmax.f32 %v3344_v11, %v7217_v53  ;;  %10941 = vst [vmem:[#allocation75_spill] sm:$0xff] %v7241_v39  ;;  %10942 = vst [vmem:[#allocation76_spill] sm:$0xff] %v7244_v25  ;;  %v898_v10 = vmax.f32 %v7241_v39, %v7244_v25  ;;  %v10946_v25 = vld [vmem:[#allocation33_spill] sm:$0xff]  ;;  %v3390_v3 = vsub.f32 %v10952_v63, %v7041_v36  ;;  %v10958_v63 = vld [vmem:[#allocation11_spill] sm:$0xff] }
 0x198   : > { %v3347_v1 = vmax.f32 %v3345_v24, %v7236_v16  ;;  %v7263_v24 = vpop.permute.xlu1 %973  ;;  %v3384_v39 = vsub.f32 %v10946_v25, %v7041_v36  ;;  %10951 = vst [vmem:[#allocation79_spill] sm:$0xff] %v7311_v41  ;;  %vm674_vm15 = vcmp.ne.s32.totalorder %v7311_v41, %v6724_v44 }
 0x199   : > { %v3348_v47 = vmax.f32 %v3346_v46, %v7227_v59  ;;  %v7253_v57 = vpop.permute.xlu0 %969  ;;  %v10414_v46 = vmov 1.0|1.0  }
 0x19a   : > { %6158 = vmatprep.subr.bf16.mxu1 %v10414_v46  ;;  %5726 = vmatprep.subr.bf16.mxu0 %v10414_v46  ;;  %v3423_v62 = vmul.f32 1.442695, %v3384_v39 }
 0x19b   : > { %v3349_v2 = vmax.f32 %v3347_v1, %v3348_v47  ;;  %6166 = vmatpush3.bf16.msra.mxu1 %v10414_v46  ;;  %5727 = vmatpush3.bf16.msra.mxu0 %v10414_v46  ;;  %v3408_v1 = vsub.f32 %v7007_v22, %v7041_v36  ;;  %v10957_v22 = vld [vmem:[#allocation9_spill] sm:$0xff] }
 0x19c   : > { %6159 = vmatprep.subr.bf16.mxu1 %v10414_v46  ;;  %5728 = vmatprep.subr.bf16.mxu0 %v10414_v46  ;;  %v7286_v40 = vpop.permute.xlu1 %981  ;;  %vm10426_vm9 = vcmp.ne.s32.totalorder %v10958_v63, %v10957_v22  ;;  %vm10432_vm10 = vcmp.ne.s32.totalorder %v6736_v49, %v10957_v22  ;;  %vm10433_vm12 = vcmp.ne.s32.totalorder %v6753_v54, %v10957_v22 }
 0x19d   : > { %v3350_v45 = vrot.slane %v3349_v2, 4  ;;  %v3471_v23 = vmul.f32 1.442695, %v3408_v1  ;;  %10945 = vst [vmem:[#allocation31_spill] sm:$0xff] %v7286_v40  ;;  %vm673_vm5 = vcmp.ne.s32.totalorder %v7311_v41, %v10957_v22 }
 0x19f   : > { %v3351_v13 = vmax.f32 %v3349_v2, %v3350_v45  ;;  %v7270_v2 = vpop.permute.xlu0 %977  ;;  %6167 = vmatpush3.bf16.msra.mxu1 %v10414_v46  ;;  %v628_v45 = vadd.s32 40, %v6629_v17  ;;  %5729 = vmatpush3.bf16.msra.mxu0 %v10414_v46 }
 0x1a0   : > { %6160 = vmatprep.subr.bf16.mxu1 %v10414_v46  ;;  %5730 = vmatprep.subr.bf16.mxu0 %v10414_v46 }
 0x1a1   : > { %v3352_v14 = vrot.slane %v3351_v13, 2 }
 0x1a2   : > { %949 = vbcast.lane.b32.xlu1 %v6687_v35, 256 }
 0x1a3   : > { %899 = vmax.xlane.f32.xlu0 %v898_v10  ;;  %v3353_v11 = vmax.f32 %v3351_v13, %v3352_v14  ;;  %v627_v10 = vadd.s32 32, %v6629_v17  ;;  %v629_v14 = vadd.s32 48, %v6629_v17  ;;  %6168 = vmatpush3.bf16.msra.mxu1 %v10414_v46  ;;  %v7301_v58 = vpop.permute.xlu0 %985 }
 0x1a4   : > { %6161 = vmatprep.subr.bf16.mxu1 %v10414_v46  ;;  %5731 = vmatpush3.bf16.msra.mxu0 %v10414_v46 }
 0x1a5   : > { %v3354_v37 = vrot.slane %v3353_v11, 1  ;;  %v7293_v43 = vadd.s32 %v10947_v33, %v627_v10  ;;  %v7304_v34 = vadd.s32 %v10947_v33, %v629_v14  ;;  %5732 = vmatprep.subr.bf16.mxu0 %v10414_v46  ;;  %v632_v14 = vadd.s32 72, %v6629_v17 }
 0x1a6   : > { %957 = vbcast.lane.b32.xlu1 %v6687_v35, 272 }
 0x1a7   : > { %v7255_v20 = vmax.f32 %v3353_v11, %v3354_v37  ;;  %10948 = vst [vmem:[#allocation33_spill] sm:$0xff] %v7293_v43  ;;  %10950 = vst [vmem:[#allocation78_spill] sm:$0xff] %v7304_v34  ;;  %6169 = vmatpush3.bf16.msra.mxu1 %v10414_v46  ;;  %vm10434_vm11 = vcmp.ne.s32.totalorder %v7293_v43, %v10957_v22  ;;  %vm10436_vm14 = vcmp.ne.s32.totalorder %v7304_v34, %v6724_v44 }
 0x1a8   : > { %6162 = vmatprep.subr.bf16.mxu1 %v10414_v46  ;;  %5733 = vmatpush3.bf16.msra.mxu0 %v10414_v46  ;;  %vm668_vm6 = vcmp.ne.s32.totalorder %v7293_v43, %v6724_v44 }
 0x1a9   : > { %10943 = vst [vmem:[#allocation77_spill] sm:$0xff] %v7255_v20  ;;  %v3407_v47 = vsub.f32 %v7227_v59, %v7255_v20  ;;  %v3377_v13 = vsub.f32 %v7122_v31, %v7255_v20  ;;  %v3379_v11 = vsub.f32 %v7113_v0, %v7255_v20  ;;  %v3381_v1 = vsub.f32 %v7125_v8, %v7255_v20 }
 0x1aa   : > { %v3385_v51 = vsub.f32 %v7154_v9, %v7255_v20  ;;  %5734 = vmatprep.subr.bf16.mxu0 %v10414_v46  ;;  %v3389_v15 = vsub.f32 %v7177_v42, %v7255_v20 }
 0x1ab   : > { %v3469_v37 = vmul.f32 1.442695, %v3407_v47  ;;  %v7296_v47 = vadd.s32 %v10947_v33, %v628_v45  ;;  %v3409_v26 = vmul.f32 1.442695, %v3377_v13  ;;  %v3413_v10 = vmul.f32 1.442695, %v3379_v11  ;;  %6170 = vmatpush3.bf16.msra.mxu1 %v10414_v46 }
 0x1ac   : > { %v3383_v45 = vsub.f32 %v7104_v50, %v7255_v20  ;;  %v3419_v13 = vmul.f32 1.442695, %v3382_v6  ;;  %v3387_v11 = vsub.f32 %v7130_v29, %v7255_v20  ;;  %v3417_v6 = vmul.f32 1.442695, %v3381_v1  ;;  %6163 = vmatprep.subr.bf16.mxu1 %v10414_v46  ;;  %5735 = vmatpush3.bf16.msra.mxu0 %v10414_v46 }
 0x1ad   : > { %10949 = vst [vmem:[#allocation10_spill] sm:$0xff] %v7296_v47  ;;  %6280 = vpow2.f32 %v3469_v37  ;;  %v633_v37 = vadd.s32 80, %v6629_v17  ;;  %v3425_v40 = vmul.f32 1.442695, %v3385_v51  ;;  %v3435_v51 = vmul.f32 1.442695, %v3390_v3  ;;  %5736 = vmatprep.subr.bf16.mxu0 %v10414_v46 }
 0x1ae   : > { %6282 = vpow2.f32 %v3471_v23  ;;  %v7324_v23 = vpop.permute.xlu1 %989  ;;  %v3421_v39 = vmul.f32 1.442695, %v3383_v45  ;;  %v10960_v45 = vld [vmem:[#allocation35_spill] sm:$0xff]  ;;  %v3429_v17 = vmul.f32 1.442695, %v3387_v11  ;;  %v3391_v11 = vsub.f32 %v7157_v56, %v7255_v20  ;;  %v10964_v3 = vld [vmem:[#allocation40_spill] sm:$0xff] }
 0x1af   : > { %6284 = vpow2.f32 %v3409_v26  ;;  %10953 = vst [vmem:[#allocation80_spill] sm:$0xff] %v7324_v23  ;;  %v10956_v26 = vld [vmem:[#allocation34_spill] sm:$0xff]  ;;  %v7337_v23 = vpop.permute.xlu0 %993  ;;  %v3388_v28 = vsub.f32 %v10960_v45, %v7041_v36  ;;  %6171 = vmatpush3.bf16.msra.mxu1 %v10414_v46  ;;  %vm10435_vm13 = vcmp.ne.s32.totalorder %v7296_v47, %v10957_v22  ;;  %v10972_v56 = vmov 1.0|1.0  }
 0x1b0   : > { %6286 = vpow2.f32 %v3413_v10  ;;  %v3386_v1 = vsub.f32 %v10956_v26, %v7041_v36  ;;  %v7341_v10 = vadd.s32 %v10947_v33, %v632_v14  ;;  %v7353_v14 = vadd.s32 %v10947_v33, %v634_v32  ;;  %6164 = vmatprep.subr.bf16.mxu1 %v10414_v46  ;;  %5737 = vmatpush3.bf16.msra.mxu0 %v10414_v46 }
 0x1b1   : > { %6288 = vpow2.f32 %v3419_v13  ;;  %v7347_v13 = vadd.s32 %v10947_v33, %v633_v37  ;;  %v10963_v37 = vld [vmem:[#allocation38_spill] sm:$0xff]  ;;  %v3431_v32 = vmul.f32 1.442695, %v3388_v28  ;;  %5738 = vmatprep.subr.bf16.mxu0 %v10414_v46  ;;  %vm670_vm4 = vcmp.ne.s32.totalorder %v7296_v47, %v6724_v44 }
 0x1b2   : > { %10959 = vst [vmem:[#allocation34_spill] sm:$0xff] %v7341_v10  ;;  %6290 = vpow2.f32 %v3423_v62  ;;  %10962 = vst [vmem:[#allocation83_spill] sm:$0xff] %v7353_v14  ;;  %v3439_v62 = vmul.f32 1.442695, %v3392_v21  ;;  %v3427_v29 = vmul.f32 1.442695, %v3386_v1  ;;  %v3394_v9 = vsub.f32 %v10963_v37, %v7041_v36  ;;  %v7362_v45 = vpop.permute.xlu1 %997 }
 0x1b3   : > { %10961 = vst [vmem:[#allocation82_spill] sm:$0xff] %v7347_v13  ;;  %6292 = vpow2.f32 %v3417_v6  ;;  %v3396_v6 = vsub.f32 %v10964_v3, %v7041_v36  ;;  %10965 = vst [vmem:[#allocation84_spill] sm:$0xff] %v7362_v45  ;;  %v3393_v21 = vsub.f32 %v7196_v52, %v7255_v20  ;;  %v3433_v1 = vmul.f32 1.442695, %v3389_v15  ;;  %6172 = vmatpush3.bf16.msra.mxu1 %v10972_v56 }
 0x1b4   : > { %6294 = vpow2.f32 %v3421_v39  ;;  %v3395_v45 = vsub.f32 %v7186_v12, %v7255_v20  ;;  %v3437_v15 = vmul.f32 1.442695, %v3391_v11  ;;  %v10971_v12 = vld [vmem:[#allocation42_spill] sm:$0xff]  ;;  %6165 = vmatprep.subr.bf16.mxu1 %v10972_v56  ;;  %5739 = vmatpush3.bf16.msra.mxu0 %v10972_v56  ;;  %vm678_vm2 = vcmp.ne.s32.totalorder %v7341_v10, %v6724_v44 }
 0x1b5   : > { %6296 = vpow2.f32 %v3425_v40  ;;  %v10966_v40 = vand.u32 4294901760, %v7151_v30  ;;  %v3447_v46 = vmul.f32 1.442695, %v3396_v6  ;;  %v3398_v52 = vsub.f32 %v10971_v12, %v7041_v36  ;;  %5740 = vmatprep.subr.bf16.mxu0 %v10972_v56 }
 0x1b6   : > { %6298 = vpow2.f32 %v3429_v17  ;;  %v7380_v17 = vpop.permute.xlu0 %1005  ;;  %v3445_v6 = vmul.f32 1.442695, %v3395_v45  ;;  %vm681_vm3 = vcmp.ne.s32.totalorder %v7353_v14, %v10957_v22 }
 0x1b7   : > { %v6281_v33 = vpop.eup %6280  ;;  %v7374_v39 = vsub.f32 %v7151_v30, %v10966_v40  ;;  %6300 = vpow2.f32 %v3435_v51  ;;  %10968 = vst [vmem:[#allocation86_spill] sm:$0xff] %v7380_v17  ;;  %v10969_v30 = vand.u32 4294901760, %v7162_v4  ;;  %v3443_v17 = vmul.f32 1.442695, %v3394_v9  ;;  %6173 = vmatpush3.bf16.msra.mxu1 %v10972_v56 }
 0x1b8   : > { %v7378_v28 = vpop.eup %6282  ;;  %6302 = vpow2.f32 %v3439_v62  ;;  %v3400_v62 = vsub.f32 %v6976_v38, %v7041_v36  ;;  %v7424_v45 = vsel %vm10426_vm9, %v6281_v33, 0.0  ;;  %5741 = vmatpush3.bf16.msra.mxu0 %v10972_v56 }
 0x1b9   : > { %953 = vbcast.lane.b32.xlu0 %v6687_v35, 264  ;;  %10967 = vst [vmem:[#allocation85_spill] sm:$0xff] %v7374_v39  ;;  %v7390_v51 = vsub.f32 %v7162_v4, %v10969_v30  ;;  %v6285_v40 = vpop.eup %6284  ;;  %6304 = vpow2.f32 %v3427_v29  ;;  %v3441_v4 = vmul.f32 1.442695, %v3393_v21  ;;  %v3397_v29 = vsub.f32 %v7214_v19, %v7255_v20  ;;  %10973 = vst [vmem:[#allocation88_spill] sm:$0xff] %v7424_v45 }
 0x1ba   : > { %v6287_v3 = vpop.eup %6286  ;;  %6306 = vpow2.f32 %v3431_v32  ;;  %v10424_v30 = vand.u32 4294901760, %v7374_v39  ;;  %v3399_v19 = vsub.f32 %v7199_v60, %v7255_v20  ;;  %v7452_v49 = vmul.f32 %v7424_v45, %v7227_v59 }
 0x1bb   : > { %10970 = vst [vmem:[#allocation87_spill] sm:$0xff] %v7390_v51  ;;  %v7405_v9 = vpop.eup %6288  ;;  %6308 = vpow2.f32 %v3433_v1  ;;  %v3451_v1 = vmul.f32 1.442695, %v3398_v52  ;;  %v3449_v12 = vmul.f32 1.442695, %v3397_v29  ;;  %v10975_v33 = vand.u32 4294901760, %v7390_v51 }
 0x1bc   : > { %v7411_v32 = vpop.eup %6290  ;;  %6310 = vpow2.f32 %v3437_v15  ;;  %v4485_v15 = vsub.f32 %v7374_v39, %v10424_v30  ;;  %v7443_v30 = vsel %vm10432_vm10, %v6285_v40, 0.0  ;;  %v10977_v29 = vld [vmem:[#allocation19_spill] sm:$0xff]  ;;  %10978 = vst [vmem:[#allocation90_spill] sm:$0xff] %v7452_v49  ;;  %v3404_v40 = vsub.f32 %v6988_v27, %v7041_v36  ;;  %v11167_v39 = vld [vmem:[#allocation84_spill] sm:$0xff] }
 0x1bd   : > { %v7419_v38 = vpop.eup %6292  ;;  %6312 = vpow2.f32 %v3443_v17  ;;  %10976 = vst [vmem:[#allocation89_spill] sm:$0xff] %v7443_v30  ;;  %vm10453_vm9 = vcmp.ne.s32.totalorder %v10977_v29, %v10957_v22  ;;  %vm671_vm10 = vcmp.ne.s32.totalorder %v7304_v34, %v10957_v22  ;;  %v11001_v29 = vand.u32 4294901760, %v7424_v45 }
 0x1be   : > { %v7429_v60 = vpop.eup %6294  ;;  %6314 = vpow2.f32 %v3447_v46  ;;  %v4486_v46 = vand.u32 4294901760, %v4485_v15 }
 0x1bf   : > { %v6297_v17 = vpop.eup %6296  ;;  %6316 = vpow2.f32 %v3441_v4 }
 0x1c0   : > { %6318 = vpow2.f32 %v3445_v6 }
 0x1c1   : > { %6320 = vpow2.f32 %v3451_v1 }
 0x1d1   : > { %v909_v37 = vpop.xlane.xlu1 %908 }
 0x1d2   : > { %v1031_v11 = vmax.f32 %v909_v37, %v7251_v7  ;;  %v3402_v7 = vsub.f32 %v6985_v55, %v7041_v36  ;;  %v10974_v37 = vld [vmem:[#allocation18_spill] sm:$0xff]  ;;  %v3455_v55 = vmul.f32 1.442695, %v3400_v62  ;;  %v6299_v62 = vpop.eup %6298 }
 0x1d3   : > { %v912_v21 = vpop.xlane.xlu0 %911  ;;  %vm10454_vm0 = vcmp.ne.s32.totalorder %v10974_v37, %v10957_v22 }
 0x1d4   : > { %1065 = vperm.xlu1 %6246, %v1031_v11   ;;  %v4497_v11 = vsub.f32 %v7390_v51, %v10975_v33  ;;  %v1032_v52 = vmax.f32 %v912_v21, %v7253_v57  ;;  %v3453_v57 = vmul.f32 1.442695, %v3399_v19  ;;  %v6301_v33 = vpop.eup %6300  ;;  %v3459_v4 = vmul.f32 1.442695, %v3402_v7 }
 0x1d5   : > { %v6303_v15 = vpop.eup %6302  ;;  %v7458_v51 = vmul.f32 %v7443_v30, %v7122_v31  ;;  %v7463_v19 = vsel %vm10433_vm12, %v6287_v3, 0.0  ;;  %6322 = vpow2.f32 %v3455_v55  ;;  %v7475_v31 = vsel %vm10434_vm11, %v6297_v17, 0.0 }
 0x1d6   : > { %v4498_v21 = vand.u32 4294901760, %v4497_v11  ;;  %10980 = vst [vmem:[#allocation92_spill] sm:$0xff] %v7463_v19  ;;  %v6305_v6 = vpop.eup %6304  ;;  %10982 = vst [vmem:[#allocation94_spill] sm:$0xff] %v7475_v31  ;;  %6324 = vpow2.f32 %v3449_v12  ;;  %v3401_v55 = vsub.f32 %v7224_v61, %v7255_v20  ;;  %vm676_vm12 = vcmp.ne.s32.totalorder %v7331_v18, %v6724_v44 }
 0x1d7   : > { %10979 = vst [vmem:[#allocation91_spill] sm:$0xff] %v7458_v51  ;;  %v6307_v3 = vpop.eup %6306  ;;  %v7493_v12 = vsel %vm10436_vm14, %v6301_v33, 0.0  ;;  %6326 = vpow2.f32 %v3453_v57  ;;  %vm677_vm11 = vcmp.ne.s32.totalorder %v7341_v10, %v10957_v22  ;;  %v7507_v11 = vsel %vm674_vm15, %v6303_v15, 0.0 }
 0x1d8   : > { %1070 = vperm.xlu1 %6246, %v1032_v52   ;;  %v7465_v59 = vpack.c.bf16 %v4498_v21, %v4486_v46  ;;  %10984 = vst [vmem:[#allocation96_spill] sm:$0xff] %v7493_v12  ;;  %v6309_v7 = vpop.eup %6308  ;;  %10985 = vst [vmem:[#allocation97_spill] sm:$0xff] %v7507_v11  ;;  %v3463_v17 = vmul.f32 1.442695, %v3404_v40  ;;  %v3406_v52 = vsub.f32 %v6997_v48, %v7041_v36  ;;  %v7525_v57 = vsel %vm10455_vm7, %v7405_v9, 0.0 }
 0x1d9   : > { %v915_v56 = vpop.xlane.xlu0 %914  ;;  %v6311_v46 = vpop.eup %6310  ;;  %vm679_vm14 = vcmp.ne.s32.totalorder %v7347_v13, %v10957_v22  ;;  %10987 = vst [vmem:[#allocation99_spill] sm:$0xff] %v7525_v57  ;;  %v3405_v33 = vsub.f32 %v7236_v16, %v7255_v20  ;;  %v3457_v9 = vmul.f32 1.442695, %v3401_v55  ;;  %v10451_v54 = vand.u32 4294901760, %v7507_v11 }
 0x1da   : > { %10981 = vst [vmem:[#allocation93_spill] sm:$0xff] %v7465_v59  ;;  %v1033_v1 = vmax.f32 %v915_v56, %v7263_v24  ;;  %v7488_v56 = vsel %vm10435_vm13, %v6299_v62, 0.0  ;;  %v3403_v24 = vsub.f32 %v7217_v53, %v7255_v20  ;;  %vm680_vm13 = vcmp.ne.s32.totalorder %v7347_v13, %v6724_v44  ;;  %v6313_v40 = vpop.eup %6312 }
 0x1db   : > { %10983 = vst [vmem:[#allocation95_spill] sm:$0xff] %v7488_v56  ;;  %v10447_v59 = vand.u32 4294901760, %v7493_v12  ;;  %v6315_v30 = vpop.eup %6314  ;;  %6328 = vpow2.f32 %v3459_v4  ;;  %v7545_v21 = vsel %vm10454_vm0, %v7419_v38, 0.0  ;;  %v7552_v4 = vsel %vm10453_vm9, %v7429_v60, 0.0 }
 0x1dc   : > { %961 = vbcast.lane.b32.xlu1 %v6687_v35, 280  ;;  %1075 = vperm.xlu0 %6247, %v1033_v1   ;;  %v7515_v35 = vsel %vm690_vm1, %v7378_v28, 0.0  ;;  %v7531_v28 = vsel %vm10452_vm8, %v7411_v32, 0.0  ;;  %v10445_v1 = vand.u32 4294901760, %v7488_v56  ;;  %v3461_v63 = vmul.f32 1.442695, %v3403_v24  ;;  %v6317_v36 = vpop.eup %6316 }
 0x1dd   : > { %10986 = vst [vmem:[#allocation98_spill] sm:$0xff] %v7515_v35  ;;  %v918_v62 = vpop.xlane.xlu0 %917  ;;  %10988 = vst [vmem:[#allocation100_spill] sm:$0xff] %v7531_v28  ;;  %6330 = vpow2.f32 %v3463_v17  ;;  %v6319_v55 = vpop.eup %6318  ;;  %v7557_v24 = vsel %vm668_vm6, %v6305_v6, 0.0  ;;  %v7561_v38 = vmul.f32 %v7463_v19, %v7113_v0  ;;  %v7581_v32 = vsub.f32 %v7493_v12, %v10447_v59 }
 0x1de   : > { %v1034_v15 = vmax.f32 %v918_v62, %v7270_v2  ;;  %10989 = vst [vmem:[#allocation101_spill] sm:$0xff] %v7545_v21  ;;  %v3467_v2 = vmul.f32 1.442695, %v3406_v52  ;;  %10990 = vst [vmem:[#allocation102_spill] sm:$0xff] %v7552_v4  ;;  %v6321_v17 = vpop.eup %6320  ;;  %v7566_v52 = vsel %vm670_vm4, %v6307_v3, 0.0  ;;  %v10994_v62 = vand.u32 4294901760, %v7475_v31 }
 0x1df   : > { %10991 = vst [vmem:[#allocation103_spill] sm:$0xff] %v7557_v24  ;;  %10992 = vst [vmem:[#allocation104_spill] sm:$0xff] %v7561_v38  ;;  %v7576_v6 = vsub.f32 %v7488_v56, %v10445_v1  ;;  %6332 = vpow2.f32 %v3457_v9  ;;  %v7586_v3 = vsub.f32 %v7507_v11, %v10451_v54  ;;  %v7597_v59 = vsub.f32 %v7424_v45, %v11001_v29  ;;  %v11003_v54 = vld [vmem:[#allocation13_spill] sm:$0xff] }
 0x1e0   : > { %1080 = vperm.xlu1 %6246, %v1034_v15   ;;  %v3465_v15 = vmul.f32 1.442695, %v3405_v33  ;;  %10993 = vst [vmem:[#allocation105_spill] sm:$0xff] %v7566_v52  ;;  %v7571_v60 = vsub.f32 %v7475_v31, %v10994_v62  ;;  %v6323_v33 = vpop.eup %6322  ;;  %10997 = vst [vmem:[#allocation108_spill] sm:$0xff] %v7581_v32  ;;  %6334 = vpow2.f32 %v3461_v63  ;;  %v10999_v62 = vand.u32 4294901760, %v7515_v35  ;;  %v11004_v63 = vld [vmem:[#allocation14_spill] sm:$0xff] }
 0x1e1   : > { %10996 = vst [vmem:[#allocation107_spill] sm:$0xff] %v7576_v6  ;;  %10998 = vst [vmem:[#allocation109_spill] sm:$0xff] %v7586_v3  ;;  %v6325_v1 = vpop.eup %6324  ;;  %6336 = vpow2.f32 %v3467_v2  ;;  %vm683_vm8 = vcmp.ne.s32.totalorder %v11003_v54, %v10957_v22  ;;  %vm685_vm9 = vcmp.ne.s32.totalorder %v11004_v63, %v10957_v22  ;;  %v7618_v2 = vsel %vm676_vm12, %v6313_v40, 0.0 }
 0x1e2   : > { %10995 = vst [vmem:[#allocation106_spill] sm:$0xff] %v7571_v60  ;;  %v7591_v19 = vsub.f32 %v7515_v35, %v10999_v62  ;;  %11002 = vst [vmem:[#allocation111_spill] sm:$0xff] %v7597_v59  ;;  %v6327_v47 = vpop.eup %6326  ;;  %v7607_v62 = vsel %vm671_vm10, %v6309_v7, 0.0  ;;  %6338 = vpow2.f32 %v3465_v15  ;;  %vm11009_vm0 = vcmp.ne.s32.totalorder %v7331_v18, %v10957_v22  ;;  %v11012_v15 = vld [vmem:[#allocation16_spill] sm:$0xff]  ;;  %v11059_v59 = vld [vmem:[#allocation35_spill] sm:$0xff] }
 0x1e3   : > { %v924_v0 = vpop.xlane.xlu0 %923  ;;  %11005 = vst [vmem:[#allocation112_spill] sm:$0xff] %v7607_v62  ;;  %11007 = vst [vmem:[#allocation114_spill] sm:$0xff] %v7618_v2  ;;  %v7628_v7 = vsel %vm11009_vm0, %v6317_v36, 0.0  ;;  %vm10587_vm7 = vcmp.ne.s32.totalorder %v11012_v15, %v10957_v22  ;;  %v7639_v40 = vsel %vm677_vm11, %v6319_v55, 0.0  ;;  %vm11015_vm0 = vcmp.ne.s32.totalorder %v7353_v14, %v6724_v44 }
 0x1e4   : > { %11000 = vst [vmem:[#allocation110_spill] sm:$0xff] %v7591_v19  ;;  %v1036_v9 = vmax.f32 %v924_v0, %v7301_v58  ;;  %v7612_v58 = vsel %vm673_vm5, %v6311_v46, 0.0  ;;  %v7623_v0 = vsel %vm678_vm2, %v6315_v30, 0.0  ;;  %11010 = vst [vmem:[#allocation116_spill] sm:$0xff] %v7628_v7  ;;  %v7632_v46 = vmul.f32 %v7525_v57, %v10944_v5 }
 0x1e5   : > { %11006 = vst [vmem:[#allocation113_spill] sm:$0xff] %v7612_v58  ;;  %11008 = vst [vmem:[#allocation115_spill] sm:$0xff] %v7623_v0  ;;  %v7644_v30 = vsel %vm680_vm13, %v6321_v17, 0.0  ;;  %v7649_v36 = vsel %vm11015_vm0, %v6323_v33, 0.0  ;;  %v7653_v5 = vmul.f32 %v7531_v28, %v10946_v25  ;;  %v7660_v55 = vsel %vm679_vm14, %v6325_v1, 0.0  ;;  %v6329_v33 = vpop.eup %6328 }
 0x1e6   : > { %1090 = vperm.xlu0 %6247, %v1036_v9   ;;  %11011 = vst [vmem:[#allocation117_spill] sm:$0xff] %v7632_v46  ;;  %11013 = vst [vmem:[#allocation118_spill] sm:$0xff] %v7639_v40  ;;  %v7665_v17 = vsel %vm681_vm3, %v6327_v47, 0.0  ;;  %v11020_v9 = vand.u32 4294901760, %v7458_v51  ;;  %v11022_v45 = vand.u32 4294901760, %v7561_v38  ;;  %v11024_v57 = vand.u32 4294901760, %v7607_v62 }
 0x1e7   : > { %11014 = vst [vmem:[#allocation119_spill] sm:$0xff] %v7644_v30  ;;  %11016 = vst [vmem:[#allocation120_spill] sm:$0xff] %v7649_v36  ;;  %v6331_v28 = vpop.eup %6330  ;;  %v11026_v13 = vand.u32 4294901760, %v7612_v58  ;;  %vm11028_vm0 = vcmp.ne.s32.totalorder %v11003_v54, %v6724_v44 }
 0x1e8   : > { %11017 = vst [vmem:[#allocation121_spill] sm:$0xff] %v7653_v5  ;;  %11018 = vst [vmem:[#allocation122_spill] sm:$0xff] %v7660_v55  ;;  %v7673_v29 = vsub.f32 %v7458_v51, %v11020_v9  ;;  %v7684_v14 = vsub.f32 %v7561_v38, %v11022_v45  ;;  %v7691_v47 = vsub.f32 %v7607_v62, %v11024_v57  ;;  %v7701_v45 = vsel %vm11028_vm0, %v6329_v33, 0.0 }
 0x1e9   : > { %11019 = vst [vmem:[#allocation123_spill] sm:$0xff] %v7665_v17  ;;  %v6333_v51 = vpop.eup %6332  ;;  %v7696_v37 = vsub.f32 %v7612_v58, %v11026_v13  ;;  %11029 = vst [vmem:[#allocation128_spill] sm:$0xff] %v7701_v45  ;;  %v11030_v9 = vand.u32 4294901760, %v7618_v2  ;;  %v11034_v38 = vand.u32 4294901760, %v7628_v7  ;;  %vm11036_vm0 = vcmp.ne.s32.totalorder %v11004_v63, %v6724_v44 }
 0x1ea   : > { %11021 = vst [vmem:[#allocation124_spill] sm:$0xff] %v7673_v29  ;;  %11023 = vst [vmem:[#allocation125_spill] sm:$0xff] %v7684_v14  ;;  %v6335_v25 = vpop.eup %6334  ;;  %v7721_v33 = vsel %vm11036_vm0, %v6331_v28, 0.0  ;;  %v11044_v28 = vand.u32 4294901760, %v7632_v46  ;;  %v11046_v14 = vand.u32 4294901760, %v7660_v55  ;;  %v11048_v29 = vand.u32 4294901760, %v7665_v17 }
 0x1eb   : > { %v930_v18 = vpop.xlane.xlu0 %929  ;;  %11025 = vst [vmem:[#allocation126_spill] sm:$0xff] %v7691_v47  ;;  %11027 = vst [vmem:[#allocation127_spill] sm:$0xff] %v7696_v37  ;;  %v7716_v13 = vsub.f32 %v7628_v7, %v11034_v38  ;;  %v6337_v10 = vpop.eup %6336  ;;  %v11042_v38 = vand.u32 4294901760, %v7649_v36  ;;  %vm11055_vm0 = vcmp.ne.s32.totalorder %v11012_v15, %v6724_v44 }
 0x1ec   : > { %v1038_v1 = vmax.f32 %v930_v18, %v7337_v23  ;;  %v7706_v18 = vsub.f32 %v7618_v2, %v11030_v9  ;;  %v11032_v23 = vand.u32 4294901760, %v7623_v0  ;;  %11037 = vst [vmem:[#allocation132_spill] sm:$0xff] %v7721_v33  ;;  %v11038_v9 = vand.u32 4294901760, %v7639_v40 }
 0x1ed   : > { %11035 = vst [vmem:[#allocation131_spill] sm:$0xff] %v7716_v13  ;;  %v7736_v43 = vsub.f32 %v7649_v36, %v11042_v38  ;;  %v7741_v20 = vsub.f32 %v7632_v46, %v11044_v28  ;;  %v11050_v38 = vand.u32 4294901760, %v7653_v5  ;;  %v7763_v46 = vsel %vm683_vm8, %v6333_v51, 0.0 }
 0x1ee   : > { %11031 = vst [vmem:[#allocation129_spill] sm:$0xff] %v7706_v18  ;;  %v7711_v57 = vsub.f32 %v7623_v0, %v11032_v23  ;;  %1100 = vperm.xlu0 %6247, %v1038_v1   ;;  %v7726_v41 = vsub.f32 %v7639_v40, %v11038_v9  ;;  %v11040_v23 = vand.u32 4294901760, %v7644_v30  ;;  %v6339_v1 = vpop.eup %6338  ;;  %v7746_v9 = vsub.f32 %v7660_v55, %v11046_v14 }
 0x1ef   : > { %11043 = vst [vmem:[#allocation135_spill] sm:$0xff] %v7736_v43  ;;  %11045 = vst [vmem:[#allocation136_spill] sm:$0xff] %v7741_v20  ;;  %v7757_v19 = vsub.f32 %v7653_v5, %v11050_v38  ;;  %v7768_v14 = vsel %vm685_vm9, %v6335_v25, 0.0  ;;  %v7777_v38 = vsel %vm11055_vm0, %v6337_v10, 0.0  ;;  %v7781_v28 = vmul.f32 %v7552_v4, %v7104_v50  ;;  %v11062_v5 = vld [vmem:[#allocation66_spill] sm:$0xff]  ;;  %v11066_v4 = vld [vmem:[#allocation36_spill] sm:$0xff] }
 0x1f0   : > { %11033 = vst [vmem:[#allocation130_spill] sm:$0xff] %v7711_v57  ;;  %11039 = vst [vmem:[#allocation133_spill] sm:$0xff] %v7726_v41  ;;  %v7731_v34 = vsub.f32 %v7644_v30, %v11040_v23  ;;  %v7751_v23 = vsub.f32 %v7665_v17, %v11048_v29  ;;  %v7772_v29 = vmul.f32 %v7545_v21, %v7125_v8  ;;  %v7794_v8 = vsel %vm10587_vm7, %v6339_v1, 0.0  ;;  %v11064_v21 = vld [vmem:[#allocation63_spill] sm:$0xff] }
 0x1f1   : > { %11047 = vst [vmem:[#allocation137_spill] sm:$0xff] %v7746_v9  ;;  %11051 = vst [vmem:[#allocation139_spill] sm:$0xff] %v7757_v19  ;;  %v7785_v51 = vmul.f32 %v7557_v24, %v10956_v26  ;;  %v7789_v25 = vmul.f32 %v7566_v52, %v11059_v59  ;;  %v7798_v10 = vmul.f32 %v7475_v31, %v11062_v5  ;;  %v1002_v24 = vpop.permute.xlu1 %1001  ;;  %v11068_v52 = vand.u32 4294901760, %v7701_v45  ;;  %v11070_v31 = vld [vmem:[#allocation37_spill] sm:$0xff]  ;;  %v11077_v5 = vld [vmem:[#allocation67_spill] sm:$0xff] }
 0x1f2   : > { %11041 = vst [vmem:[#allocation134_spill] sm:$0xff] %v7731_v34  ;;  %11049 = vst [vmem:[#allocation138_spill] sm:$0xff] %v7751_v23  ;;  %v7802_v50 = vmul.f32 %v7488_v56, %v11064_v21  ;;  %v7806_v26 = vmul.f32 %v7493_v12, %v11066_v4  ;;  %v7817_v54 = vmul.f32 %v7507_v11, %v11070_v31  ;;  %v11073_v31 = vand.u32 4294901760, %v7721_v33  ;;  %v11079_v56 = vld [vmem:[#allocation38_spill] sm:$0xff] }
 0x1f3   : > { %11052 = vst [vmem:[#allocation140_spill] sm:$0xff] %v7763_v46  ;;  %11053 = vst [vmem:[#allocation141_spill] sm:$0xff] %v7768_v14  ;;  %v936_v59 = vpop.xlane.xlu0 %935  ;;  %v7811_v15 = vsub.f32 %v7701_v45, %v11068_v52  ;;  %v7823_v12 = vmul.f32 %v7607_v62, %v7177_v42  ;;  %v11075_v52 = vand.u32 4294901760, %v7763_v46  ;;  %v11083_v42 = vand.u32 4294901760, %v7777_v38 }
 0x1f4   : > { %11054 = vst [vmem:[#allocation142_spill] sm:$0xff] %v7772_v29  ;;  %11056 = vst [vmem:[#allocation143_spill] sm:$0xff] %v7777_v38  ;;  %v1040_v21 = vmax.f32 %v936_v59, %v1002_v24  ;;  %v7832_v24 = vsub.f32 %v7721_v33, %v11073_v31  ;;  %v7849_v31 = vmul.f32 %v7618_v2, %v11079_v56  ;;  %v11081_v59 = vand.u32 4294901760, %v7768_v14 }
 0x1f5   : > { %11057 = vst [vmem:[#allocation144_spill] sm:$0xff] %v7781_v28  ;;  %11058 = vst [vmem:[#allocation145_spill] sm:$0xff] %v7785_v51  ;;  %v7840_v63 = vsub.f32 %v7763_v46, %v11075_v52  ;;  %v7859_v52 = vsub.f32 %v7777_v38, %v11083_v42  ;;  %v11085_v1 = vand.u32 4294901760, %v7772_v29  ;;  %v11087_v56 = vand.u32 4294901760, %v7794_v8 }
 0x1f6   : > { %11060 = vst [vmem:[#allocation35_spill] sm:$0xff] %v7789_v25  ;;  %11061 = vst [vmem:[#allocation146_spill] sm:$0xff] %v7794_v8  ;;  %1110 = vperm.xlu0 %6247, %v1040_v21   ;;  %v7845_v21 = vmul.f32 %v7612_v58, %v11077_v5  ;;  %v7854_v4 = vsub.f32 %v7768_v14, %v11081_v59  ;;  %v11089_v59 = vand.u32 4294901760, %v7781_v28  ;;  %v11091_v42 = vand.u32 4294901760, %v7785_v51 }
 0x1f7   : > { %11063 = vst [vmem:[#allocation66_spill] sm:$0xff] %v7798_v10  ;;  %11065 = vst [vmem:[#allocation63_spill] sm:$0xff] %v7802_v50  ;;  %v7864_v62 = vsub.f32 %v7772_v29, %v11085_v1  ;;  %v7870_v2 = vsub.f32 %v7794_v8, %v11087_v56  ;;  %v11093_v1 = vand.u32 4294901760, %v7789_v25  ;;  %v11095_v5 = vand.u32 4294901760, %v7798_v10 }
 0x1f8   : > { %11067 = vst [vmem:[#allocation36_spill] sm:$0xff] %v7806_v26  ;;  %11069 = vst [vmem:[#allocation147_spill] sm:$0xff] %v7811_v15  ;;  %v7875_v58 = vsub.f32 %v7781_v28, %v11089_v59  ;;  %v7880_v11 = vsub.f32 %v7785_v51, %v11091_v42  ;;  %v11097_v44 = vand.u32 4294901760, %v7802_v50  ;;  %v11099_v28 = vand.u32 4294901760, %v7806_v26  ;;  %v11101_v51 = vld [vmem:[#allocation40_spill] sm:$0xff] }
 0x1f9   : > { %11071 = vst [vmem:[#allocation37_spill] sm:$0xff] %v7817_v54  ;;  %11072 = vst [vmem:[#allocation148_spill] sm:$0xff] %v7823_v12  ;;  %v7885_v29 = vsub.f32 %v7789_v25, %v11093_v1  ;;  %v7890_v56 = vsub.f32 %v7798_v10, %v11095_v5  ;;  %v7904_v22 = vmul.f32 %v7623_v0, %v11101_v51  ;;  %v11103_v25 = vand.u32 4294901760, %v7817_v54  ;;  %v11109_v51 = vld [vmem:[#allocation70_spill] sm:$0xff]  ;;  %v11113_v10 = vld [vmem:[#allocation43_spill] sm:$0xff] }
 0x1fa   : > { %11074 = vst [vmem:[#allocation149_spill] sm:$0xff] %v7832_v24  ;;  %11076 = vst [vmem:[#allocation150_spill] sm:$0xff] %v7840_v63  ;;  %v7895_v59 = vsub.f32 %v7802_v50, %v11097_v44  ;;  %v7900_v42 = vsub.f32 %v7806_v26, %v11099_v28  ;;  %v11105_v50 = vld [vmem:[#allocation71_spill] sm:$0xff]  ;;  %v11107_v28 = vand.u32 4294901760, %v7823_v12  ;;  %v7924_v0 = vmul.f32 %v7639_v40, %v11109_v51 }
 0x1fb   : > { %11078 = vst [vmem:[#allocation67_spill] sm:$0xff] %v7845_v21  ;;  %11080 = vst [vmem:[#allocation38_spill] sm:$0xff] %v7849_v31  ;;  %v942_v1 = vpop.xlane.xlu0 %941  ;;  %v7909_v5 = vsub.f32 %v7817_v54, %v11103_v25  ;;  %v7932_v44 = vmul.f32 %v7649_v36, %v11113_v10  ;;  %v11115_v54 = vld [vmem:[#allocation74_spill] sm:$0xff]  ;;  %v7952_v10 = vmul.f32 %v7763_v46, %v7224_v61 }
 0x1fc   : > { %11082 = vst [vmem:[#allocation151_spill] sm:$0xff] %v7854_v4  ;;  %11084 = vst [vmem:[#allocation152_spill] sm:$0xff] %v7859_v52  ;;  %v7920_v26 = vsub.f32 %v7823_v12, %v11107_v28  ;;  %v11119_v12 = vld [vmem:[#allocation44_spill] sm:$0xff] }
 0x1fd   : > { %11086 = vst [vmem:[#allocation153_spill] sm:$0xff] %v7864_v62  ;;  %11088 = vst [vmem:[#allocation154_spill] sm:$0xff] %v7870_v2  ;;  %v7944_v51 = vmul.f32 %v7701_v45, %v11119_v12 }
 0x1fe   : > { %11090 = vst [vmem:[#allocation155_spill] sm:$0xff] %v7875_v58  ;;  %11092 = vst [vmem:[#allocation156_spill] sm:$0xff] %v7880_v11 }
 0x1ff   : > { %11094 = vst [vmem:[#allocation157_spill] sm:$0xff] %v7885_v29  ;;  %11096 = vst [vmem:[#allocation158_spill] sm:$0xff] %v7890_v56  ;;  %v1010_v45 = vpop.permute.xlu0 %1009 }
 0x200   : > { %11098 = vst [vmem:[#allocation159_spill] sm:$0xff] %v7895_v59  ;;  %11100 = vst [vmem:[#allocation160_spill] sm:$0xff] %v7900_v42  ;;  %v7915_v59 = vmul.f32 %v7628_v7, %v11105_v50  ;;  %v11111_v42 = vld [vmem:[#allocation42_spill] sm:$0xff]  ;;  %v7936_v50 = vmul.f32 %v7660_v55, %v11115_v54  ;;  %v11117_v7 = vld [vmem:[#allocation72_spill] sm:$0xff]  ;;  %v7956_v54 = vmul.f32 %v7768_v14, %v7217_v53 }
 0x201   : > { %11102 = vst [vmem:[#allocation40_spill] sm:$0xff] %v7904_v22  ;;  %11104 = vst [vmem:[#allocation161_spill] sm:$0xff] %v7909_v5  ;;  %v7928_v25 = vmul.f32 %v7644_v30, %v11111_v42  ;;  %v7940_v28 = vmul.f32 %v7665_v17, %v11117_v7  ;;  %v7948_v42 = vmul.f32 %v7721_v33, %v6988_v27  ;;  %v11125_v17 = vld [vmem:[#allocation47_spill] sm:$0xff]  ;;  %v11127_v27 = vand.u32 4294901760, %v7845_v21  ;;  %v11165_v55 = vld [vmem:[#allocation124_spill] sm:$0xff] }
 0x202   : > { %11106 = vst [vmem:[#allocation71_spill] sm:$0xff] %v7915_v59  ;;  %11108 = vst [vmem:[#allocation162_spill] sm:$0xff] %v7920_v26  ;;  %v7960_v7 = vmul.f32 %v7777_v38, %v6997_v48  ;;  %v7964_v12 = vmul.f32 %v7515_v35, %v11125_v17  ;;  %v7975_v53 = vmul.f32 %v7794_v8, %v7236_v16  ;;  %v10526_v38 = vand.u32 4294901760, %v7924_v0  ;;  %v11166_v30 = vld [vmem:[#allocation125_spill] sm:$0xff] }
 0x203   : > { %11110 = vst [vmem:[#allocation70_spill] sm:$0xff] %v7924_v0  ;;  %11112 = vst [vmem:[#allocation42_spill] sm:$0xff] %v7928_v25  ;;  %v7969_v33 = vsub.f32 %v7845_v21, %v11127_v27  ;;  %v1042_v48 = vmax.f32 %v942_v1, %v1010_v45  ;;  %v10531_v14 = vand.u32 4294901760, %v7936_v50  ;;  %v11130_v17 = vand.u32 4294901760, %v7849_v31 }
 0x204   : > { %11114 = vst [vmem:[#allocation43_spill] sm:$0xff] %v7932_v44  ;;  %11116 = vst [vmem:[#allocation74_spill] sm:$0xff] %v7936_v50  ;;  %v11132_v27 = vand.u32 4294901760, %v7904_v22  ;;  %v11134_v16 = vand.u32 4294901760, %v7915_v59  ;;  %v8008_v1 = vsub.f32 %v7924_v0, %v10526_v38  ;;  %v11142_v46 = vand.u32 4294901760, %v7940_v28 }
 0x205   : > { %11118 = vst [vmem:[#allocation72_spill] sm:$0xff] %v7940_v28  ;;  %11120 = vst [vmem:[#allocation44_spill] sm:$0xff] %v7944_v51  ;;  %1120 = vperm.xlu0 %6247, %v1042_v48   ;;  %v7991_v35 = vsub.f32 %v7849_v31, %v11130_v17  ;;  %v11137_v17 = vand.u32 4294901760, %v7928_v25  ;;  %v11144_v0 = vand.u32 4294901760, %v7944_v51  ;;  %v11163_v31 = vld [vmem:[#allocation110_spill] sm:$0xff]  ;;  %v11174_v8 = vand.u32 4294901760, %v7581_v32 }
 0x206   : > { %11121 = vst [vmem:[#allocation163_spill] sm:$0xff] %v7948_v42  ;;  %11122 = vst [vmem:[#allocation164_spill] sm:$0xff] %v7952_v10  ;;  %v7996_v21 = vsub.f32 %v7904_v22, %v11132_v27  ;;  %v8003_v45 = vsub.f32 %v7915_v59, %v11134_v16  ;;  %v11139_v27 = vand.u32 4294901760, %v7932_v44  ;;  %v8023_v16 = vsub.f32 %v7936_v50, %v10531_v14  ;;  %v11316_v32 = vld [vmem:[#allocation56_spill] sm:$0xff] }
 0x207   : > { %11123 = vst [vmem:[#allocation165_spill] sm:$0xff] %v7956_v54  ;;  %11124 = vst [vmem:[#allocation166_spill] sm:$0xff] %v7960_v7  ;;  %v8013_v61 = vsub.f32 %v7928_v25, %v11137_v17  ;;  %v8028_v38 = vsub.f32 %v7940_v28, %v11142_v46  ;;  %v8033_v17 = vsub.f32 %v7944_v51, %v11144_v0  ;;  %v11146_v25 = vand.u32 4294901760, %v7948_v42  ;;  %v11169_v40 = vld [vmem:[#allocation160_spill] sm:$0xff] }
 0x208   : > { %11126 = vst [vmem:[#allocation47_spill] sm:$0xff] %v7964_v12  ;;  %11128 = vst [vmem:[#allocation167_spill] sm:$0xff] %v7969_v33  ;;  %v8018_v48 = vsub.f32 %v7932_v44, %v11139_v27  ;;  %v921_v44 = vpop.xlane.xlu1 %920  ;;  %v11148_v59 = vand.u32 4294901760, %v7952_v10  ;;  %v11150_v50 = vand.u32 4294901760, %v7956_v54  ;;  %v11152_v28 = vand.u32 4294901760, %v7960_v7 }
 0x209   : > { %11129 = vst [vmem:[#allocation168_spill] sm:$0xff] %v7975_v53  ;;  %11131 = vst [vmem:[#allocation169_spill] sm:$0xff] %v7991_v35  ;;  %v8038_v27 = vsub.f32 %v7948_v42, %v11146_v25  ;;  %v11154_v51 = vand.u32 4294901760, %v7964_v12  ;;  %v11156_v42 = vld [vmem:[#allocation31_spill] sm:$0xff] }
 0x20a   : > { %11133 = vst [vmem:[#allocation170_spill] sm:$0xff] %v7996_v21  ;;  %11135 = vst [vmem:[#allocation171_spill] sm:$0xff] %v8003_v45  ;;  %v8043_v14 = vsub.f32 %v7952_v10, %v11148_v59  ;;  %v8048_v46 = vsub.f32 %v7956_v54, %v11150_v50  ;;  %v8053_v0 = vsub.f32 %v7960_v7, %v11152_v28  ;;  %v11157_v59 = vand.u32 4294901760, %v7975_v53 }
 0x20b   : > { %11136 = vst [vmem:[#allocation172_spill] sm:$0xff] %v8008_v1  ;;  %11138 = vst [vmem:[#allocation173_spill] sm:$0xff] %v8013_v61  ;;  %v8058_v25 = vsub.f32 %v7964_v12, %v11154_v51  ;;  %v1035_v22 = vmax.f32 %v921_v44, %v11156_v42  ;;  %v11159_v50 = vand.u32 4294901760, %v7452_v49  ;;  %v11161_v12 = vld [vmem:[#allocation80_spill] sm:$0xff]  ;;  %v11168_v42 = vld [vmem:[#allocation159_spill] sm:$0xff]  ;;  %v11175_v28 = vand.u32 4294901760, %v7586_v3 }
 0x20c   : > { %11140 = vst [vmem:[#allocation174_spill] sm:$0xff] %v8018_v48  ;;  %11141 = vst [vmem:[#allocation175_spill] sm:$0xff] %v8023_v16  ;;  %v8064_v10 = vsub.f32 %v7975_v53, %v11157_v59  ;;  %v11171_v53 = vand.u32 4294901760, %v7571_v60  ;;  %v11189_v59 = vand.u32 4294901760, %v7746_v9  ;;  %v11320_v60 = vld [vmem:[#allocation81_spill] sm:$0xff] }
 0x20d   : > { %11143 = vst [vmem:[#allocation176_spill] sm:$0xff] %v8028_v38  ;;  %11145 = vst [vmem:[#allocation177_spill] sm:$0xff] %v8033_v17  ;;  %v8069_v54 = vsub.f32 %v7452_v49, %v11159_v50  ;;  %1085 = vperm.xlu1 %6246, %v1035_v22   ;;  %v927_v49 = vpop.xlane.xlu1 %926 }
 0x20e   : > { %11147 = vst [vmem:[#allocation178_spill] sm:$0xff] %v8038_v27  ;;  %11149 = vst [vmem:[#allocation179_spill] sm:$0xff] %v8043_v14  ;;  %v1037_v44 = vmax.f32 %v927_v49, %v11161_v12  ;;  %v11164_v12 = vld [vmem:[#allocation111_spill] sm:$0xff]  ;;  %v11178_v49 = vand.u32 4294901760, %v7696_v37 }
 0x20f   : > { %11151 = vst [vmem:[#allocation180_spill] sm:$0xff] %v8048_v46  ;;  %11153 = vst [vmem:[#allocation181_spill] sm:$0xff] %v8053_v0 }
 0x210   : > { %11155 = vst [vmem:[#allocation182_spill] sm:$0xff] %v8058_v25  ;;  %11158 = vst [vmem:[#allocation31_spill] sm:$0xff] %v8064_v10 }
 0x211   : > { %11160 = vst [vmem:[#allocation183_spill] sm:$0xff] %v8069_v54  ;;  %1095 = vperm.xlu1 %6246, %v1037_v44   ;;  %v933_v36 = vpop.xlane.xlu1 %932  ;;  %v11170_v44 = vld [vmem:[#allocation86_spill] sm:$0xff] }
 0x212   : > { %v1039_v7 = vmax.f32 %v933_v36, %v11167_v39  ;;  %v8136_v39 = vpack.c.bf16 %v11175_v28, %v11174_v8  ;;  %v11177_v36 = vand.u32 4294901760, %v7691_v47  ;;  %v11184_v8 = vand.u32 4294901760, %v7726_v41 }
 0x214   : > { %11176 = vst [vmem:[#allocation84_spill] sm:$0xff] %v8136_v39  ;;  %v8142_v22 = vpack.c.bf16 %v11178_v49, %v11177_v36  ;;  %v11186_v39 = vand.u32 4294901760, %v7731_v34  ;;  %v11187_v49 = vand.u32 4294901760, %v7736_v43  ;;  %v11286_v43 = vmov 0.0  }
 0x215   : > { %1105 = vperm.xlu1 %6246, %v1039_v7   ;;  %v939_v51 = vpop.xlane.xlu1 %938  ;;  %v11180_v7 = vand.u32 4294901760, %v7706_v18 }
 0x216   : > { %v1041_v50 = vmax.f32 %v939_v51, %v11170_v44  ;;  %v11172_v51 = vand.u32 4294901760, %v7576_v6  ;;  %11179 = vst [vmem:[#allocation86_spill] sm:$0xff] %v8142_v22  ;;  %v8161_v36 = vpack.c.bf16 %v11187_v49, %v11186_v39  ;;  %v11190_v22 = vand.u32 4294901760, %v7751_v23 }
 0x217   : > { %v11198_v39 = vand.u32 4294901760, %v7859_v52  ;;  %v11199_v49 = vand.u32 4294901760, %v11163_v31 }
 0x218   : > { %v8130_v44 = vpack.c.bf16 %v11172_v51, %v11171_v53  ;;  %v11181_v53 = vand.u32 4294901760, %v7711_v57  ;;  %11188 = vst [vmem:[#allocation186_spill] sm:$0xff] %v8161_v36  ;;  %v8167_v18 = vpack.c.bf16 %v11190_v22, %v11189_v59  ;;  %v11201_v22 = vand.u32 4294901760, %v7870_v2 }
 0x219   : > { %1115 = vperm.xlu1 %6246, %v1041_v50   ;;  %v897_v50 = vpop.xlane.xlu1 %896  ;;  %v8185_v36 = vpack.c.bf16 %v11199_v49, %v11198_v39  ;;  %v11210_v49 = vand.u32 4294901760, %v7864_v62  ;;  %v11211_v59 = vand.u32 4294901760, %v7875_v58 }
 0x21a   : > { %11173 = vst [vmem:[#allocation80_spill] sm:$0xff] %v8130_v44  ;;  %v8149_v51 = vpack.c.bf16 %v11181_v53, %v11180_v7  ;;  %v11183_v44 = vand.u32 4294901760, %v7716_v13  ;;  %11191 = vst [vmem:[#allocation187_spill] sm:$0xff] %v8167_v18  ;;  %v11192_v7 = vand.u32 4294901760, %v7811_v15  ;;  %v11193_v53 = vand.u32 4294901760, %v7832_v24 }
 0x21b   : > { %11200 = vst [vmem:[#allocation190_spill] sm:$0xff] %v8185_v36  ;;  %v11202_v18 = vand.u32 4294901760, %v11164_v12  ;;  %v8210_v36 = vpack.c.bf16 %v11211_v59, %v11210_v49  ;;  %v11222_v49 = vand.u32 4294901760, %v7920_v26 }
 0x21c   : > { %11182 = vst [vmem:[#allocation184_spill] sm:$0xff] %v8149_v51  ;;  %v8155_v28 = vpack.c.bf16 %v11184_v8, %v11183_v44  ;;  %v8173_v51 = vpack.c.bf16 %v11193_v53, %v11192_v7  ;;  %v11195_v44 = vand.u32 4294901760, %v7840_v63  ;;  %v11196_v8 = vand.u32 4294901760, %v7854_v4 }
 0x21d   : > { %v8192_v7 = vpack.c.bf16 %v11202_v18, %v11201_v22  ;;  %v11204_v53 = vand.u32 4294901760, %v11165_v55  ;;  %11212 = vst [vmem:[#allocation194_spill] sm:$0xff] %v8210_v36  ;;  %v11213_v18 = vand.u32 4294901760, %v7880_v11  ;;  %v11214_v22 = vand.u32 4294901760, %v7885_v29  ;;  %v903_v59 = vpop.xlane.xlu1 %902 }
 0x21e   : > { %11185 = vst [vmem:[#allocation185_spill] sm:$0xff] %v8155_v28  ;;  %11194 = vst [vmem:[#allocation188_spill] sm:$0xff] %v8173_v51  ;;  %v8179_v28 = vpack.c.bf16 %v11196_v8, %v11195_v44  ;;  %v11205_v51 = vand.u32 4294901760, %v11166_v30  ;;  %v11207_v8 = vand.u32 4294901760, %v7741_v20  ;;  %v11223_v36 = vand.u32 4294901760, %v7969_v33  ;;  %v11277_v20 = vld [vmem:[#allocation78_spill] sm:$0xff] }
 0x21f   : > { %11203 = vst [vmem:[#allocation191_spill] sm:$0xff] %v8192_v7  ;;  %v8216_v7 = vpack.c.bf16 %v11214_v22, %v11213_v18  ;;  %v11225_v22 = vand.u32 4294901760, %v7991_v35 }
 0x220   : > { %11197 = vst [vmem:[#allocation189_spill] sm:$0xff] %v8179_v28  ;;  %v8198_v44 = vpack.c.bf16 %v11205_v51, %v11204_v53  ;;  %v11208_v28 = vand.u32 4294901760, %v7757_v19  ;;  %v11216_v51 = vand.u32 4294901760, %v7890_v56  ;;  %v11217_v53 = vand.u32 4294901760, %v11168_v42 }
 0x221   : > { %11215 = vst [vmem:[#allocation195_spill] sm:$0xff] %v8216_v7  ;;  %v8234_v18 = vpack.c.bf16 %v11223_v36, %v11222_v49  ;;  %v11226_v7 = vand.u32 4294901760, %v7996_v21  ;;  %v11234_v36 = vand.u32 4294901760, %v8023_v16  ;;  %v11235_v49 = vand.u32 4294901760, %v8028_v38  ;;  %v11270_v21 = vld [vmem:[#allocation29_spill] sm:$0xff] }
 0x222   : > { %11206 = vst [vmem:[#allocation192_spill] sm:$0xff] %v8198_v44  ;;  %v8204_v39 = vpack.c.bf16 %v11208_v28, %v11207_v8  ;;  %v8222_v44 = vpack.c.bf16 %v11217_v53, %v11216_v51  ;;  %v11219_v28 = vand.u32 4294901760, %v11169_v40  ;;  %v11220_v8 = vand.u32 4294901760, %v7909_v5 }
 0x223   : > { %11224 = vst [vmem:[#allocation198_spill] sm:$0xff] %v8234_v18  ;;  %v8240_v51 = vpack.c.bf16 %v11226_v7, %v11225_v22  ;;  %v11228_v53 = vand.u32 4294901760, %v8003_v45  ;;  %v8258_v18 = vpack.c.bf16 %v11235_v49, %v11234_v36  ;;  %v11237_v7 = vand.u32 4294901760, %v8033_v17 }
 0x224   : > { %11209 = vst [vmem:[#allocation193_spill] sm:$0xff] %v8204_v39  ;;  %11218 = vst [vmem:[#allocation196_spill] sm:$0xff] %v8222_v44  ;;  %v8228_v39 = vpack.c.bf16 %v11220_v8, %v11219_v28  ;;  %v11229_v44 = vand.u32 4294901760, %v8008_v1  ;;  %v11231_v8 = vand.u32 4294901760, %v8013_v61  ;;  %v11238_v22 = vand.u32 4294901760, %v8038_v27  ;;  %v11250_v27 = vld [vmem:[#allocation77_spill] sm:$0xff] }
 0x225   : > { %11227 = vst [vmem:[#allocation199_spill] sm:$0xff] %v8240_v51  ;;  %11236 = vst [vmem:[#allocation202_spill] sm:$0xff] %v8258_v18  ;;  %v11246_v36 = vand.u32 4294901760, %v8064_v10  ;;  %v11247_v49 = vand.u32 4294901760, %v8069_v54  ;;  %v11262_v10 = vld [vmem:[#allocation25_spill] sm:$0xff] }
 0x226   : > { %11221 = vst [vmem:[#allocation197_spill] sm:$0xff] %v8228_v39  ;;  %v8246_v28 = vpack.c.bf16 %v11229_v44, %v11228_v53  ;;  %v11232_v39 = vand.u32 4294901760, %v8018_v48  ;;  %v8264_v51 = vpack.c.bf16 %v11238_v22, %v11237_v7  ;;  %v11240_v44 = vand.u32 4294901760, %v8043_v14  ;;  %v11249_v14 = vld [vmem:[#allocation52_spill] sm:$0xff]  ;;  %v11265_v61 = vld [vmem:[#allocation33_spill] sm:$0xff] }
 0x227   : > { %v11241_v53 = vand.u32 4294901760, %v8048_v46  ;;  %v8282_v18 = vpack.c.bf16 %v11247_v49, %v11246_v36  ;;  %v6479_v7 = vmov 1966171168   ;;  %v5223_v46 = vcombine.low %v11250_v27, %v11249_v14  ;;  %v11266_v1 = vld [vmem:[#allocation9_spill] sm:$0xff] }
 0x228   : > { %11230 = vst [vmem:[#allocation200_spill] sm:$0xff] %v8246_v28  ;;  %v8252_v26 = vpack.c.bf16 %v11232_v39, %v11231_v8  ;;  %11239 = vst [vmem:[#allocation203_spill] sm:$0xff] %v8264_v51  ;;  %v11243_v39 = vand.u32 4294901760, %v8053_v0  ;;  %v11244_v8 = vand.u32 4294901760, %v8058_v25  ;;  %v5225_v22 = vunpack.c.l.s4 %v6479_v7  ;;  %v906_v51 = vpop.xlane.xlu1 %905 }
 0x229   : > { %v8270_v28 = vpack.c.bf16 %v11241_v53, %v11240_v44  ;;  %11248 = vst [vmem:[#allocation206_spill] sm:$0xff] %v8282_v18  ;;  %v11251_v53 = vld [vmem:[#allocation7_spill] sm:$0xff]  ;;  %v11253_v36 = vlaneseq  ;;  %v11254_v49 = vmov 0  ;;  %vm11267_vm7 = vcmp.ne.s32.totalorder %v11265_v61, %v11266_v1 }
 0x22a   : > { %11233 = vst [vmem:[#allocation201_spill] sm:$0xff] %v8252_v26  ;;  %v8276_v26 = vpack.c.bf16 %v11244_v8, %v11243_v39  ;;  %v5226_v44 = vunpack.c.0.s8 %v5225_v22  ;;  %v10565_v22 = vmov 0.0  }
 0x22b   : > { %11242 = vst [vmem:[#allocation204_spill] sm:$0xff] %v8270_v28  ;;  %vm8297_vm0 = vcmp.lt.s32.totalorder %v11253_v36, 256  ;;  %1556 = vmatprep.subr.mxu1 %v10565_v22  ;;  %1733 = vmatprep.subr.mxu0 %v10565_v22 }
 0x22c   : > { %11245 = vst [vmem:[#allocation205_spill] sm:$0xff] %v8276_v26  ;;  %v8288_v28 = vsub.s32 %v5226_v44, %v11251_v53  ;;  %v950_v25 = vpop.permute.xlu1 %949  ;;  %v11255_v49 = vsel %vm8297_vm0, 4294967295, %v11254_v49 }
 0x22d   : > { %v1027_v39 = vmax.f32 %v897_v50, %v950_v25  ;;  %11256 = vst [vmem:[#allocation77_spill] sm:$0xff] %v11255_v49  ;;  %v11260_v49 = vld [vmem:[#allocation23_spill] sm:$0xff] }
 0x22e   : > { %11252 = vst [vmem:[#allocation52_spill] sm:$0xff] %v8288_v28  ;;  %v5230_v8 = vrot.slane %v5223_v46, %v8288_v28 }
 0x22f   : > { %1045 = vperm.xlu1 %6246, %v1027_v39   ;;  %v11257_v39 = vld [vmem:[#allocation20_spill] sm:$0xff] }
 0x230   : > { %v5237_v14 = vrot.slane %v5230_v8, %v8288_v28  ;;  %v958_v27 = vpop.permute.xlu1 %957  ;;  %v900_v46 = vpop.xlane.xlu0 %899 }
 0x231   : > { %v1029_v7 = vmax.f32 %v903_v59, %v958_v27  ;;  %v11258_v59 = vld [vmem:[#allocation21_spill] sm:$0xff] }
 0x232   : > { %5243 = vst.msk [vmem:[%s8294_s16] ss:$4 sm:$0x3] %vm8297_vm0, %v5237_v14 }
 0x233   : > { %1055 = vperm.xlu1 %6246, %v1029_v7  }
 0x234   : > { %v954_v25 = vpop.permute.xlu0 %953 }
 0x235   : > { %v1028_v50 = vmax.f32 %v900_v46, %v954_v25  ;;  %v11259_v46 = vld [vmem:[#allocation22_spill] sm:$0xff] }
 0x237   : > { %1050 = vperm.xlu0 %6247, %v1028_v50  }
 0x253   : > { %v8307_v44 = vpop.permute.xlu1 %1065 }
 0x254   : > { %v1131_v8 = vsub.f32 %v11257_v39, %v8307_v44  ;;  %v1132_v36 = vsub.f32 %v11258_v59, %v8307_v44 }
 0x256   : > { %v1171_v27 = vmul.f32 1.442695, %v1131_v8  ;;  %v1173_v14 = vmul.f32 1.442695, %v1132_v36  ;;  %v11261_v8 = vld [vmem:[#allocation24_spill] sm:$0xff] }
 0x257   : > { %v8313_v7 = vpop.permute.xlu1 %1070 }
 0x258   : > { %6340 = vpow2.f32 %v1171_v27  ;;  %v1133_v25 = vsub.f32 %v11259_v46, %v8313_v7  ;;  %v1134_v22 = vsub.f32 %v11260_v49, %v8313_v7 }
 0x259   : > { %6342 = vpow2.f32 %v1173_v14 }
 0x25a   : > { %v1175_v50 = vmul.f32 1.442695, %v1133_v25  ;;  %v1177_v28 = vmul.f32 1.442695, %v1134_v22  ;;  %v11263_v22 = vld [vmem:[#allocation26_spill] sm:$0xff]  ;;  %v11264_v25 = vld [vmem:[#allocation27_spill] sm:$0xff] }
 0x25b   : > { %v962_v18 = vpop.permute.xlu1 %961  ;;  %v8319_v26 = vpop.permute.xlu0 %1075 }
 0x25c   : > { %6344 = vpow2.f32 %v1175_v50  ;;  %v1030_v54 = vmax.f32 %v906_v51, %v962_v18  ;;  %v1135_v36 = vsub.f32 %v11261_v8, %v8319_v26  ;;  %v1136_v27 = vsub.f32 %v11262_v10, %v8319_v26 }
 0x25d   : > { %6346 = vpow2.f32 %v1177_v28 }
 0x25e   : > { %v1179_v0 = vmul.f32 1.442695, %v1135_v36  ;;  %v1181_v17 = vmul.f32 1.442695, %v1136_v27  ;;  %1060 = vperm.xlu0 %6247, %v1030_v54   ;;  %v11268_v54 = vld [vmem:[#allocation12_spill] sm:$0xff] }
 0x25f   : > { %v8325_v38 = vpop.permute.xlu1 %1080 }
 0x260   : > { %6348 = vpow2.f32 %v1179_v0  ;;  %v1137_v14 = vsub.f32 %v11263_v22, %v8325_v38  ;;  %v1138_v50 = vsub.f32 %v11264_v25, %v8325_v38 }
 0x261   : > { %6350 = vpow2.f32 %v1181_v17 }
 0x262   : > { %v6341_v18 = vpop.eup %6340  ;;  %v1183_v51 = vmul.f32 1.442695, %v1137_v14  ;;  %v1185_v16 = vmul.f32 1.442695, %v1138_v50  ;;  %v11269_v14 = vld [vmem:[#allocation28_spill] sm:$0xff] }
 0x263   : > { %v6343_v48 = vpop.eup %6342  ;;  %v1227_v28 = vsel %vm11267_vm7, %v6341_v18, 0.0 }
 0x264   : > { %6352 = vpow2.f32 %v1183_v51  ;;  %v1228_v0 = vsel %vm668_vm6, %v6343_v48, 0.0  ;;  %v8337_v36 = vand.u32 4294901760, %v1227_v28  ;;  %v11273_v48 = vld [vmem:[#allocation10_spill] sm:$0xff]  ;;  %v2545_v13 = vmul.f32 %v1227_v28, %v11257_v39 }
 0x265   : > { %6354 = vpow2.f32 %v1185_v16  ;;  %v8339_v27 = vpop.permute.xlu0 %1090  ;;  %v8341_v45 = vand.u32 4294901760, %v1228_v0  ;;  %vm11274_vm6 = vcmp.ne.s32.totalorder %v11273_v48, %v11266_v1 }
 0x266   : > { %v6345_v17 = vpop.eup %6344  ;;  %v1141_v50 = vsub.f32 %v11269_v14, %v8339_v27  ;;  %v1142_v35 = vsub.f32 %v11270_v21, %v8339_v27  ;;  %v8348_v18 = vsub.f32 %v1227_v28, %v8337_v36 }
 0x267   : > { %v6347_v51 = vpop.eup %6346  ;;  %v8351_v61 = vsub.f32 %v1228_v0, %v8341_v45  ;;  %v1229_v16 = vsel %vm11274_vm6, %v6345_v17, 0.0  ;;  %vm2628_vm6 = vcmask 130112  }
 0x268   : > { %11271 = vst [vmem:[#allocation7_spill] sm:$0xff] %v8348_v18  ;;  %v1191_v33 = vmul.f32 1.442695, %v1141_v50  ;;  %v10614_v5 = vand.u32 4294901760, %v8348_v18  ;;  %v1230_v40 = vsel %vm670_vm4, %v6347_v51, 0.0  ;;  %v8363_v29 = vand.u32 4294901760, %v1229_v16 }
 0x269   : > { %11272 = vst [vmem:[#allocation20_spill] sm:$0xff] %v8351_v61  ;;  %v10617_v42 = vand.u32 4294901760, %v8351_v61  ;;  %v8361_v56 = vand.u32 4294901760, %v1230_v40  ;;  %v1193_v58 = vmul.f32 1.442695, %v1142_v35  ;;  %vm11278_vm4 = vcmp.ne.s32.totalorder %v11277_v20, %v11268_v54 }
 0x26a   : > { %v6349_v11 = vpop.eup %6348  ;;  %v1384_v62 = vsub.f32 %v8348_v18, %v10614_v5  ;;  %v8375_v51 = vsub.f32 %v1229_v16, %v8363_v29  ;;  %6356 = vpow2.f32 %v1191_v33 }
 0x26b   : > { %v6351_v17 = vpop.eup %6350  ;;  %v1378_v50 = vsub.f32 %v8351_v61, %v10617_v42  ;;  %v8372_v48 = vsub.f32 %v1230_v40, %v8361_v56  ;;  %v1231_v5 = vsel %vm671_vm10, %v6349_v11, 0.0  ;;  %6358 = vpow2.f32 %v1193_v58 }
 0x26c   : > { %11276 = vst [vmem:[#allocation22_spill] sm:$0xff] %v8375_v51  ;;  %v1385_v19 = vand.u32 4294901760, %v1384_v62  ;;  %v1232_v35 = vsel %vm11278_vm4, %v6351_v17, 0.0  ;;  %v10637_v12 = vand.u32 4294901760, %v8375_v51  ;;  %v11279_v62 = vld [vmem:[#allocation30_spill] sm:$0xff]  ;;  %v11280_v17 = vld [vmem:[#allocation32_spill] sm:$0xff] }
 0x26d   : > { %11275 = vst [vmem:[#allocation21_spill] sm:$0xff] %v8372_v48  ;;  %v8383_v30 = vpop.permute.xlu0 %1100  ;;  %v1379_v55 = vand.u32 4294901760, %v1378_v50  ;;  %v10632_v42 = vand.u32 4294901760, %v8372_v48  ;;  %v8387_v2 = vand.u32 4294901760, %v1232_v35  ;;  %v8393_v4 = vand.u32 4294901760, %v1231_v5 }
 0x26e   : > { %v6353_v31 = vpop.eup %6352  ;;  %v1145_v33 = vsub.f32 %v11279_v62, %v8383_v30  ;;  %v1146_v52 = vsub.f32 %v11280_v17, %v8383_v30  ;;  %v1399_v50 = vsub.f32 %v8375_v51, %v10637_v12  ;;  %vm2635_vm4 = vcmask 195712  }
 0x26f   : > { %11281 = vst [vmem:[#allocation23_spill] sm:$0xff] %v8393_v4  ;;  %v6355_v20 = vpop.eup %6354  ;;  %1380 = vmatprep.mubr.f32.mxu1 %v1379_v55  ;;  %v1393_v11 = vsub.f32 %v8372_v48, %v10632_v42  ;;  %v8402_v58 = vsub.f32 %v1232_v35, %v8387_v2  ;;  %v1233_v24 = vsel %vm673_vm5, %v6353_v31, 0.0  ;;  %v8408_v15 = vsub.f32 %v1231_v5, %v8393_v4 }
 0x270   : > { %1386 = vmatmul.mubr.f32.vlgmr.msra.gmra.mrb[0].mxu1 %v1385_v19  ;;  %v1234_v55 = vsel %vm674_vm15, %v6355_v20, 0.0  ;;  %v1400_v23 = vand.u32 4294901760, %v1399_v50  ;;  %v1199_v34 = vmul.f32 1.442695, %v1145_v33  ;;  %v8418_v31 = vand.u32 4294901760, %v1233_v24 }
 0x271   : > { %11282 = vst [vmem:[#allocation24_spill] sm:$0xff] %v8402_v58  ;;  %11284 = vst [vmem:[#allocation25_spill] sm:$0xff] %v8408_v15  ;;  %v1394_v42 = vand.u32 4294901760, %v1393_v11  ;;  %v10648_v9 = vand.u32 4294901760, %v8402_v58  ;;  %v8414_v12 = vand.u32 4294901760, %v1234_v55  ;;  %1557 = vmatpush1.msra.mxu1 %v11286_v43  ;;  %v10653_v41 = vand.u32 4294901760, %v8408_v15 }
 0x272   : > { %11287 = vst [vmem:[#allocation27_spill] sm:$0xff] %v8418_v31  ;;  %v11288_v19 = vmov 1.0|1.0   ;;  %v1201_v57 = vmul.f32 1.442695, %v1146_v52  ;;  %v2546_v11 = vmul.f32 %v1228_v0, %v11258_v59  ;;  %v8433_v50 = vsub.f32 %v1233_v24, %v8418_v31  ;;  %v11344_v31 = vld [vmem:[#allocation58_spill] sm:$0xff] }
 0x273   : > { %11285 = vst [vmem:[#allocation26_spill] sm:$0xff] %v8414_v12  ;;  %5742 = vmatprep.subr.bf16.mxu1 %v11288_v19  ;;  %1395 = vmatprep.mubr.f32.mxu1 %v1394_v42  ;;  %v1408_v63 = vsub.f32 %v8402_v58, %v10648_v9  ;;  %v8426_v20 = vsub.f32 %v1234_v55, %v8414_v12  ;;  %6360 = vpow2.f32 %v1199_v34 }
 0x274   : > { %1401 = vmatmul.mubr.f32.gmra.mrb[2].mxu1 %v1400_v23  ;;  %v1414_v33 = vsub.f32 %v8408_v15, %v10653_v41  ;;  %11290 = vst [vmem:[#allocation9_spill] sm:$0xff] %v8433_v50  ;;  %v2547_v52 = vmul.f32 %v1229_v16, %v11259_v46  ;;  %v2548_v42 = vmul.f32 %v1230_v40, %v11260_v49  ;;  %v6357_v59 = vpop.eup %6356  ;;  %v11292_v23 = vld [vmem:[#allocation39_spill] sm:$0xff]  ;;  %v11293_v41 = vld [vmem:[#allocation41_spill] sm:$0xff]  ;;  %v10657_v49 = vand.u32 4294901760, %v8433_v50 }
 0x275   : > { %11289 = vst [vmem:[#allocation33_spill] sm:$0xff] %v8426_v20  ;;  %v8437_v39 = vpop.permute.xlu0 %1110  ;;  %v1409_v28 = vand.u32 4294901760, %v1408_v63  ;;  %v10656_v9 = vand.u32 4294901760, %v8426_v20  ;;  %v8440_v37 = vadd.f32 %v2546_v11, %v2545_v13  ;;  %v6359_v46 = vpop.eup %6358  ;;  %6362 = vpow2.f32 %v1201_v57 }
 0x276   : > { %v1149_v0 = vsub.f32 %v11292_v23, %v8437_v39  ;;  %v1415_v47 = vand.u32 4294901760, %v1414_v33  ;;  %v1150_v3 = vsub.f32 %v11293_v41, %v8437_v39  ;;  %v8450_v13 = vadd.f32 %v2548_v42, %v2547_v52 }
 0x277   : > { %11291 = vst [vmem:[#allocation12_spill] sm:$0xff] %v8440_v37  ;;  %1410 = vmatprep.mubr.f32.mxu1 %v1409_v28  ;;  %v1423_v40 = vsub.f32 %v8426_v20, %v10656_v9  ;;  %v1429_v34 = vsub.f32 %v8433_v50, %v10657_v49  ;;  %v2549_v63 = vmul.f32 %v1231_v5, %v11261_v8  ;;  %v8462_v52 = vsel %vm678_vm2, %v6359_v46, 0.0 }
 0x278   : > { %1416 = vmatmul.mubr.f32.gmra.mrb[4].mxu1 %v1415_v47  ;;  %11294 = vst [vmem:[#allocation28_spill] sm:$0xff] %v8450_v13  ;;  %v1207_v11 = vmul.f32 1.442695, %v1149_v0  ;;  %v2550_v33 = vmul.f32 %v1232_v35, %v11262_v10  ;;  %v2551_v28 = vmul.f32 %v1233_v24, %v11263_v22  ;;  %v1209_v9 = vmul.f32 1.442695, %v1150_v3  ;;  %v11304_v47 = vld [vmem:[#allocation49_spill] sm:$0xff] }
 0x279   : > { %v1424_v16 = vand.u32 4294901760, %v1423_v40  ;;  %v1430_v37 = vand.u32 4294901760, %v1429_v34  ;;  %v2552_v57 = vmul.f32 %v1234_v55, %v11264_v25  ;;  %v1237_v42 = vsel %vm677_vm11, %v6357_v59, 0.0  ;;  %v11299_v55 = vld [vmem:[#allocation45_spill] sm:$0xff]  ;;  %v11301_v40 = vld [vmem:[#allocation83_spill] sm:$0xff] }
 0x27a   : > { %v8467_v5 = vadd.f32 %v2550_v33, %v2549_v63  ;;  %6364 = vpow2.f32 %v1207_v11  ;;  %v2555_v3 = vmul.f32 %v1237_v42, %v11269_v14  ;;  %v2556_v24 = vmul.f32 %v8462_v52, %v11270_v21 }
 0x27b   : > { %1425 = vmatprep.mubr.f32.mxu1 %v1424_v16  ;;  %v8469_v10 = vadd.f32 %v2552_v57, %v2551_v28  ;;  %6366 = vpow2.f32 %v1209_v9  ;;  %vm11302_vm2 = vcmp.ne.s32.totalorder %v11301_v40, %v11268_v54  ;;  %v11303_v28 = vld [vmem:[#allocation48_spill] sm:$0xff]  ;;  %v11308_v40 = vld [vmem:[#allocation50_spill] sm:$0xff]  ;;  %vm11321_vm5 = vcmp.ne.s32.totalorder %v11320_v60, %v11266_v1 }
 0x27c   : > { %11296 = vst [vmem:[#allocation29_spill] sm:$0xff] %v8467_v5  ;;  %1431 = vmatmul.mubr.f32.gmra.mrb[6].mxu1 %v1430_v37  ;;  %v8476_v25 = vadd.f32 %v2556_v24, %v2555_v3  ;;  %v11300_v37 = vld [vmem:[#allocation46_spill] sm:$0xff]  ;;  %v11315_v5 = vld [vmem:[#allocation55_spill] sm:$0xff] }
 0x27d   : > { %11297 = vst [vmem:[#allocation10_spill] sm:$0xff] %v8469_v10  ;;  %v6361_v8 = vpop.eup %6360 }
 0x27e   : > { %11298 = vst [vmem:[#allocation78_spill] sm:$0xff] %v8476_v25  ;;  %v8485_v9 = vsel %vm681_vm3, %v6361_v8, 0.0  ;;  %v8530_v25 = vand.u32 4294901760, %v1237_v42 }
 0x27f   : > { %v6363_v35 = vpop.eup %6362  ;;  %v2559_v16 = vmul.f32 %v8485_v9, %v11279_v62  ;;  %v8551_v6 = vand.u32 4294901760, %v8485_v9 }
 0x280   : > { %v8490_v21 = vsel %vm11302_vm2, %v6363_v35, 0.0  ;;  %11312 = vst [vmem:[#allocation32_spill] sm:$0xff] %v8530_v25  ;;  %vm2642_vm2 = vcmask 261312  }
 0x281   : > { %v2560_v11 = vmul.f32 %v8490_v21, %v11280_v17  ;;  %11319 = vst [vmem:[#allocation45_spill] sm:$0xff] %v8551_v6 }
 0x283   : > { %v8502_v24 = vadd.f32 %v2560_v11, %v2559_v16 }
 0x284   : > { %v8474_v22 = vpop.permute.xlu0 %1120  ;;  %v6365_v34 = vpop.eup %6364 }
 0x285   : > { %v1153_v59 = vsub.f32 %v11299_v55, %v8474_v22  ;;  %v1154_v0 = vsub.f32 %v11300_v37, %v8474_v22  ;;  %v6367_v33 = vpop.eup %6366  ;;  %11305 = vst [vmem:[#allocation30_spill] sm:$0xff] %v8502_v24  ;;  %v8514_v17 = vsel %vm685_vm9, %v6365_v34, 0.0  ;;  %v11310_v34 = vld [vmem:[#allocation53_spill] sm:$0xff] }
 0x287   : > { %v1215_v14 = vmul.f32 1.442695, %v1153_v59  ;;  %v1217_v46 = vmul.f32 1.442695, %v1154_v0  ;;  %v11306_v59 = vld [vmem:[#allocation14_spill] sm:$0xff] }
 0x288   : > { %vm11307_vm3 = vcmp.ne.s32.totalorder %v11306_v59, %v11268_v54  ;;  %v11311_v59 = vld [vmem:[#allocation54_spill] sm:$0xff] }
 0x289   : > { %6368 = vpow2.f32 %v1215_v14  ;;  %v8509_v0 = vsel %vm11307_vm3, %v6367_v33, 0.0  ;;  %vm2649_vm3 = vcmask 326912  }
 0x28a   : > { %6370 = vpow2.f32 %v1217_v46  ;;  %v11309_v46 = vld [vmem:[#allocation51_spill] sm:$0xff]  ;;  %v2564_v33 = vmul.f32 %v8509_v0, %v11293_v41 }
 0x28c   : > { %v8494_v63 = vpop.permute.xlu1 %1085 }
 0x28d   : > { %v1139_v57 = vsub.f32 %v11303_v28, %v8494_v63  ;;  %v1140_v3 = vsub.f32 %v11304_v47, %v8494_v63 }
 0x28f   : > { %v1187_v8 = vmul.f32 1.442695, %v1139_v57  ;;  %v1189_v35 = vmul.f32 1.442695, %v1140_v3  ;;  %v2563_v3 = vmul.f32 %v8514_v17, %v11292_v23  ;;  %v8535_v23 = vand.u32 4294901760, %v8462_v52 }
 0x290   : > { %v8504_v62 = vpop.permute.xlu1 %1095 }
 0x291   : > { %6372 = vpow2.f32 %v1187_v8  ;;  %v1143_v14 = vsub.f32 %v11308_v40, %v8504_v62  ;;  %v1144_v16 = vsub.f32 %v11309_v46, %v8504_v62  ;;  %11314 = vst [vmem:[#allocation39_spill] sm:$0xff] %v8535_v23 }
 0x292   : > { %6374 = vpow2.f32 %v1189_v35  ;;  %v8532_v35 = vadd.f32 %v2564_v33, %v2563_v3  ;;  %v8544_v3 = vsub.f32 %v1237_v42, %v8530_v25  ;;  %v11323_v42 = vld [vmem:[#allocation11_spill] sm:$0xff] }
 0x293   : > { %v1195_v11 = vmul.f32 1.442695, %v1143_v14  ;;  %v1197_v57 = vmul.f32 1.442695, %v1144_v16  ;;  %v6369_v41 = vpop.eup %6368  ;;  %vm11324_vm7 = vcmp.ne.s32.totalorder %v11323_v42, %v11266_v1  ;;  %v8597_v42 = vsub.f32 %v8485_v9, %v8551_v6 }
 0x294   : > { %v8524_v49 = vpop.permute.xlu1 %1105  ;;  %11313 = vst [vmem:[#allocation79_spill] sm:$0xff] %v8532_v35  ;;  %11317 = vst [vmem:[#allocation41_spill] sm:$0xff] %v8544_v3  ;;  %v8548_v35 = vsub.f32 %v8462_v52, %v8535_v23  ;;  %v8567_v52 = vsel %vm11324_vm7, %v6369_v41, 0.0  ;;  %vm2663_vm7 = vcmask 458112  }
 0x295   : > { %6376 = vpow2.f32 %v1195_v11  ;;  %v1147_v8 = vsub.f32 %v11310_v34, %v8524_v49  ;;  %v1148_v24 = vsub.f32 %v11311_v59, %v8524_v49  ;;  %v6371_v11 = vpop.eup %6370  ;;  %v2567_v41 = vmul.f32 %v8567_v52, %v11299_v55  ;;  %11331 = vst [vmem:[#allocation51_spill] sm:$0xff] %v8597_v42 }
 0x296   : > { %6378 = vpow2.f32 %v1197_v57  ;;  %11318 = vst [vmem:[#allocation34_spill] sm:$0xff] %v8548_v35  ;;  %v11335_v6 = vand.u32 4294901760, %v8548_v35 }
 0x297   : > { %v1203_v14 = vmul.f32 1.442695, %v1147_v8  ;;  %v1205_v16 = vmul.f32 1.442695, %v1148_v24 }
 0x298   : > { %v8537_v10 = vpop.permute.xlu1 %1115 }
 0x299   : > { %6380 = vpow2.f32 %v1203_v14  ;;  %v1151_v13 = vsub.f32 %v11315_v5, %v8537_v10  ;;  %v1152_v57 = vsub.f32 %v11316_v32, %v8537_v10 }
 0x29a   : > { %6382 = vpow2.f32 %v1205_v16  ;;  %v8557_v16 = vand.u32 4294901760, %v8490_v21 }
 0x29b   : > { %v6373_v33 = vpop.eup %6372  ;;  %v1211_v24 = vmul.f32 1.442695, %v1151_v13  ;;  %v1213_v8 = vmul.f32 1.442695, %v1152_v57  ;;  %v8562_v13 = vsel %vm690_vm1, %v6371_v11, 0.0 }
 0x29c   : > { %v6375_v14 = vpop.eup %6374  ;;  %v1235_v50 = vsel %vm11321_vm5, %v6373_v33, 0.0  ;;  %11322 = vst [vmem:[#allocation46_spill] sm:$0xff] %v8557_v16  ;;  %v2568_v60 = vmul.f32 %v8562_v13, %v11300_v37  ;;  %v8593_v51 = vsub.f32 %v8490_v21, %v8557_v16  ;;  %vm2656_vm5 = vcmask 392512  }
 0x29d   : > { %6384 = vpow2.f32 %v1211_v24  ;;  %v1236_v57 = vsel %vm676_vm12, %v6375_v14, 0.0  ;;  %v8572_v20 = vand.u32 4294901760, %v1235_v50 }
 0x29e   : > { %6386 = vpow2.f32 %v1213_v8  ;;  %v8574_v33 = vand.u32 4294901760, %v1236_v57  ;;  %11330 = vst [vmem:[#allocation50_spill] sm:$0xff] %v8593_v51  ;;  %v8607_v18 = vadd.f32 %v2568_v60, %v2567_v41  ;;  %v1453_v8 = vsub.f32 %v8548_v35, %v11335_v6 }
 0x29f   : > { %11325 = vst [vmem:[#allocation83_spill] sm:$0xff] %v8572_v20  ;;  %v6377_v58 = vpop.eup %6376  ;;  %v8578_v11 = vsub.f32 %v1235_v50, %v8572_v20 }
 0x2a0   : > { %11326 = vst [vmem:[#allocation48_spill] sm:$0xff] %v8574_v33  ;;  %v6379_v24 = vpop.eup %6378  ;;  %v8586_v14 = vsub.f32 %v1236_v57, %v8574_v33  ;;  %v1239_v15 = vsel %vm679_vm14, %v6377_v58, 0.0  ;;  %11333 = vst [vmem:[#allocation54_spill] sm:$0xff] %v8607_v18  ;;  %v1454_v20 = vand.u32 4294901760, %v1453_v8  ;;  %v11343_v8 = vld [vmem:[#allocation57_spill] sm:$0xff] }
 0x2a1   : > { %11327 = vst [vmem:[#allocation49_spill] sm:$0xff] %v8578_v11  ;;  %v10686_v55 = vand.u32 4294901760, %v8578_v11  ;;  %v8603_v37 = vsel %vm680_vm13, %v6379_v24, 0.0  ;;  %v8605_v48 = vand.u32 4294901760, %v1239_v15  ;;  %v11336_v24 = vand.u32 4294901760, %v8544_v3 }
 0x2a2   : > { %11328 = vst [vmem:[#allocation14_spill] sm:$0xff] %v8586_v14  ;;  %v10695_v58 = vand.u32 4294901760, %v8586_v14  ;;  %v8611_v21 = vand.u32 4294901760, %v8603_v37 }
 0x2a3   : > { %11332 = vst [vmem:[#allocation53_spill] sm:$0xff] %v8605_v48  ;;  %v6381_v16 = vpop.eup %6380  ;;  %v1444_v9 = vsub.f32 %v8578_v11, %v10686_v55  ;;  %v1459_v61 = vsub.f32 %v8544_v3, %v11336_v24  ;;  %v8623_v41 = vsub.f32 %v1239_v15, %v8605_v48  ;;  %v11339_v11 = vld [vmem:[#allocation13_spill] sm:$0xff]  ;;  %v8641_v48 = vand.u32 4294901760, %v8509_v0 }
 0x2a4   : > { %11334 = vst [vmem:[#allocation55_spill] sm:$0xff] %v8611_v21  ;;  %v6383_v60 = vpop.eup %6382  ;;  %v1438_v18 = vsub.f32 %v8586_v14, %v10695_v58  ;;  %v8630_v25 = vsub.f32 %v8603_v37, %v8611_v21  ;;  %v1243_v6 = vsel %vm683_vm8, %v6381_v16, 0.0  ;;  %vm11340_vm1 = vcmp.ne.s32.totalorder %v11339_v11, %v11268_v54 }
 0x2a5   : > { %11337 = vst [vmem:[#allocation56_spill] sm:$0xff] %v8623_v41  ;;  %v1445_v35 = vand.u32 4294901760, %v1444_v9  ;;  %v1244_v3 = vsel %vm11340_vm1, %v6383_v60, 0.0  ;;  %11341 = vst [vmem:[#allocation11_spill] sm:$0xff] %v8641_v48  ;;  %v1460_v16 = vand.u32 4294901760, %v1459_v61  ;;  %v8647_v9 = vand.u32 4294901760, %v1243_v6 }
 0x2a6   : > { %11338 = vst [vmem:[#allocation81_spill] sm:$0xff] %v8630_v25  ;;  %v1439_v58 = vand.u32 4294901760, %v1438_v18  ;;  %v10712_v14 = vand.u32 4294901760, %v8630_v25  ;;  %v8645_v55 = vand.u32 4294901760, %v1244_v3  ;;  %v2553_v60 = vmul.f32 %v1235_v50, %v11303_v28 }
 0x2a7   : > { %v6385_v23 = vpop.eup %6384  ;;  %v2554_v21 = vmul.f32 %v1236_v57, %v11304_v47  ;;  %v11348_v28 = vand.u32 4294901760, %v8597_v42  ;;  %v8677_v57 = vsub.f32 %v8509_v0, %v8641_v48  ;;  %vm2670_vm1 = vcmask 523712  }
 0x2a8   : > { %11342 = vst [vmem:[#allocation82_spill] sm:$0xff] %v8645_v55  ;;  %v6387_v24 = vpop.eup %6386  ;;  %1440 = vmatprep.mubr.f32.mxu1 %v1439_v58  ;;  %v1468_v11 = vsub.f32 %v8630_v25, %v10712_v14  ;;  %v8655_v18 = vsub.f32 %v1244_v3, %v8645_v55  ;;  %v11345_v58 = vand.u32 4294901760, %v8593_v51  ;;  %v8667_v14 = vand.u32 4294901760, %v8514_v17 }
 0x2a9   : > { %1446 = vmatmul.mubr.f32.gmra.mrb[8].mxu1 %v1445_v35  ;;  %v11347_v25 = vand.u32 4294901760, %v8623_v41  ;;  %v1489_v47 = vsub.f32 %v8597_v42, %v11348_v28  ;;  %v11349_v35 = vld [vmem:[#allocation16_spill] sm:$0xff]  ;;  %v8693_v48 = vadd.f32 %v2554_v21, %v2553_v60  ;;  %v8704_v42 = vand.u32 4294901760, %v8562_v13 }
 0x2aa   : > { %v1483_v4 = vsub.f32 %v8593_v51, %v11345_v58  ;;  %11346 = vst [vmem:[#allocation13_spill] sm:$0xff] %v8667_v14  ;;  %1455 = vmatprep.mubr.f32.mxu1 %v1454_v20  ;;  %vm11350_vm8 = vcmp.ne.s32.totalorder %v11349_v35, %v11268_v54  ;;  %v8683_v20 = vsub.f32 %v1243_v6, %v8647_v9  ;;  %v1469_v28 = vand.u32 4294901760, %v1468_v11 }
 0x2ab   : > { %v1474_v50 = vsub.f32 %v8623_v41, %v11347_v25  ;;  %v1248_v58 = vsel %vm11350_vm8, %v6387_v24, 0.0  ;;  %vm11351_vm9 = vcmp.ne.s32.totalorder %v11349_v35, %v11266_v1  ;;  %11353 = vst [vmem:[#allocation58_spill] sm:$0xff] %v8693_v48  ;;  %11355 = vst [vmem:[#allocation16_spill] sm:$0xff] %v8704_v42  ;;  %v2562_v60 = vmul.f32 %v1244_v3, %v11311_v59 }
 0x2ac   : > { %v1247_v25 = vsel %vm11351_vm9, %v6385_v23, 0.0  ;;  %v8691_v0 = vand.u32 4294901760, %v1248_v58  ;;  %v1484_v24 = vand.u32 4294901760, %v1483_v4  ;;  %v11354_v23 = vld [vmem:[#allocation60_spill] sm:$0xff]  ;;  %v11362_v59 = vand.u32 4294901760, %v8683_v20 }
 0x2ad   : > { %1461 = vmatmul.mubr.f32.gmra.mrb[10].mxu1 %v1460_v16  ;;  %v1475_v21 = vand.u32 4294901760, %v1474_v50  ;;  %v8707_v4 = vand.u32 4294901760, %v1247_v25  ;;  %v2561_v16 = vmul.f32 %v1243_v6, %v11310_v34  ;;  %v11358_v50 = vld [vmem:[#allocation59_spill] sm:$0xff]  ;;  %v2565_v48 = vmul.f32 %v1247_v25, %v11315_v5 }
 0x2ae   : > { %v8649_v33 = vpop.permute.xlu1 %1045  ;;  %11352 = vst [vmem:[#allocation57_spill] sm:$0xff] %v8691_v0  ;;  %1470 = vmatprep.mubr.f32.mxu1 %v1469_v28  ;;  %v1490_v34 = vand.u32 4294901760, %v1489_v47  ;;  %v1504_v3 = vsub.f32 %v8683_v20, %v11362_v59  ;;  %v8743_v5 = vsub.f32 %v8562_v13, %v8704_v42  ;;  %vm2677_vm9 = vcmask 589312  }
 0x2af   : > { %v1123_v61 = vsub.f32 %v11343_v8, %v8649_v33  ;;  %v1124_v12 = vsub.f32 %v11344_v31, %v8649_v33  ;;  %11356 = vst [vmem:[#allocation60_spill] sm:$0xff] %v8707_v4  ;;  %v8734_v6 = vsub.f32 %v1247_v25, %v8707_v4 }
 0x2b1   : > { %v1155_v51 = vmul.f32 1.442695, %v1123_v61  ;;  %v1157_v55 = vmul.f32 1.442695, %v1124_v12  ;;  %v8697_v12 = vsub.f32 %v8514_v17, %v8667_v14  ;;  %v2557_v61 = vmul.f32 %v1239_v15, %v11308_v40  ;;  %1476 = vmatmul.mubr.f32.gmra.mrb[12].mxu1 %v1475_v21 }
 0x2b2   : > { %v8688_v41 = vpop.permute.xlu1 %1055  ;;  %v2558_v17 = vmul.f32 %v8603_v37, %v11309_v46  ;;  %v11357_v15 = vand.u32 4294901760, %v8655_v18  ;;  %1485 = vmatprep.mubr.f32.mxu1 %v1484_v24  ;;  %v8725_v37 = vand.u32 4294901760, %v8567_v52  ;;  %v11363_v24 = vand.u32 4294901760, %v8677_v57 }
 0x2b3   : > { %6388 = vpow2.f32 %v1155_v51  ;;  %v1128_v35 = vsub.f32 %v11354_v23, %v8688_v41  ;;  %v1127_v28 = vsub.f32 %v11358_v50, %v8688_v41  ;;  %v10726_v11 = vand.u32 4294901760, %v8697_v12 }
 0x2b4   : > { %6390 = vpow2.f32 %v1157_v55  ;;  %v1498_v40 = vsub.f32 %v8655_v18, %v11357_v15  ;;  %v8715_v55 = vsub.f32 %v1248_v58, %v8691_v0  ;;  %v8722_v51 = vadd.f32 %v2558_v17, %v2557_v61  ;;  %11360 = vst [vmem:[#allocation207_spill] sm:$0xff] %v8725_v37 }
 0x2b5   : > { %v1165_v46 = vmul.f32 1.442695, %v1128_v35  ;;  %v8727_v15 = vadd.f32 %v2562_v60, %v2561_v16  ;;  %v2566_v61 = vmul.f32 %v1248_v58, %v11316_v32  ;;  %v1513_v35 = vsub.f32 %v8677_v57, %v11363_v24  ;;  %1491 = vmatmul.mubr.f32.gmra.mrb[14].mxu1 %v1490_v34 }
 0x2b6   : > { %11359 = vst [vmem:[#allocation59_spill] sm:$0xff] %v8722_v51  ;;  %v1499_v21 = vand.u32 4294901760, %v1498_v40  ;;  %v10725_v17 = vand.u32 4294901760, %v8715_v55  ;;  %v1163_v47 = vmul.f32 1.442695, %v1127_v28  ;;  %v1519_v32 = vsub.f32 %v8697_v12, %v10726_v11  ;;  %v11365_v28 = vld [vmem:[#allocation15_spill] sm:$0xff] }
 0x2b7   : > { %11361 = vst [vmem:[#allocation208_spill] sm:$0xff] %v8727_v15  ;;  %v8745_v16 = vadd.f32 %v2566_v61, %v2565_v48  ;;  %6392 = vpow2.f32 %v1165_v46  ;;  %v8752_v58 = vsub.f32 %v8567_v52, %v8725_v37  ;;  %v1505_v40 = vand.u32 4294901760, %v1504_v3 }
 0x2b8   : > { %1500 = vmatprep.mubr.f32.mxu1 %v1499_v21  ;;  %v10727_v60 = vand.u32 4294901760, %v8734_v6  ;;  %v1514_v59 = vand.u32 4294901760, %v1513_v35  ;;  %vm11366_vm10 = vcmp.ne.s32.totalorder %v11365_v28, %v11266_v1  ;;  %v1528_v46 = vsub.f32 %v8715_v55, %v10725_v17  ;;  %v8768_v21 = vpop.permute.xlu0 %1050 }
 0x2b9   : > { %11364 = vst [vmem:[#allocation209_spill] sm:$0xff] %v8745_v16  ;;  %v10728_v34 = vand.u32 4294901760, %v8743_v5  ;;  %6394 = vpow2.f32 %v1163_v47  ;;  %1506 = vmatmul.mubr.f32.gmra.mrb[16].mxu1 %v1505_v40  ;;  %vm11367_vm11 = vcmp.ne.s32.totalorder %v11365_v28, %v11268_v54  ;;  %v1520_v24 = vand.u32 4294901760, %v1519_v32  ;;  %v11368_v47 = vld [vmem:[#allocation75_spill] sm:$0xff]  ;;  %v11369_v28 = vld [vmem:[#allocation76_spill] sm:$0xff] }
 0x2ba   : > { %1515 = vmatprep.mubr.f32.mxu1 %v1514_v59  ;;  %v1125_v40 = vsub.f32 %v11368_v47, %v8768_v21  ;;  %v1534_v59 = vsub.f32 %v8734_v6, %v10727_v60 }
 0x2bb   : > { %v1543_v17 = vsub.f32 %v8743_v5, %v10728_v34 }
 0x2bc   : > { %v1159_v16 = vmul.f32 1.442695, %v1125_v40  ;;  %v1535_v60 = vand.u32 4294901760, %v1534_v59 }
 0x2bd   : > { %v6389_v25 = vpop.eup %6388  ;;  %1521 = vmatmul.mubr.f32.gmra.mrb[18].mxu1 %v1520_v24  ;;  %v1544_v40 = vand.u32 4294901760, %v1543_v17 }
 0x2be   : > { %v6391_v13 = vpop.eup %6390  ;;  %v1219_v48 = vsel %vm11366_vm10, %v6389_v25, 0.0  ;;  %6396 = vpow2.f32 %v1159_v16 }
 0x2bf   : > { %v1220_v52 = vsel %vm11367_vm11, %v6391_v13, 0.0  ;;  %v2537_v3 = vmul.f32 %v1219_v48, %v11343_v8  ;;  %v8766_v61 = vand.u32 4294901760, %v1219_v48  ;;  %v1126_v13 = vsub.f32 %v11369_v28, %v8768_v21 }
 0x2c0   : > { %v8770_v35 = vand.u32 4294901760, %v1220_v52  ;;  %v2538_v25 = vmul.f32 %v1220_v52, %v11344_v31  ;;  %v1529_v31 = vand.u32 4294901760, %v1528_v46  ;;  %v11370_v46 = vand.u32 4294901760, %v8752_v58 }
 0x2c1   : > { %v8779_v8 = vsub.f32 %v1219_v48, %v8766_v61  ;;  %v1161_v15 = vmul.f32 1.442695, %v1126_v13  ;;  %vm2684_vm11 = vcmask 654912  }
 0x2c2   : > { %v8785_v32 = vsub.f32 %v1220_v52, %v8770_v35  ;;  %v2569_v11 = vadd.f32 %v2538_v25, %v2537_v3  ;;  %1530 = vmatprep.mubr.f32.mxu1 %v1529_v31  ;;  %v1549_v3 = vsub.f32 %v8752_v58, %v11370_v46  ;;  %v6393_v25 = vpop.eup %6392  ;;  %v11371_v31 = vld [vmem:[#allocation18_spill] sm:$0xff] }
 0x2c3   : > { %v10729_v51 = vand.u32 4294901760, %v8779_v8  ;;  %6398 = vpow2.f32 %v1161_v15  ;;  %1536 = vmatmul.mubr.f32.gmra.mrb[20].mxu1 %v1535_v60  ;;  %v6395_v13 = vpop.eup %6394  ;;  %vm11372_vm12 = vcmp.ne.s32.totalorder %v11371_v31, %v11268_v54  ;;  %vm11374_vm13 = vcmp.ne.s32.totalorder %v11371_v31, %v11266_v1 }
 0x2c4   : > { %2570 = vadd.xlane.f32.xlu1 %v2569_v11  ;;  %v10730_v48 = vand.u32 4294901760, %v8785_v32  ;;  %1545 = vmatprep.mubr.f32.mxu1 %v1544_v40  ;;  %v1550_v59 = vand.u32 4294901760, %v1549_v3  ;;  %v1224_v34 = vsel %vm11372_vm12, %v6393_v25, 0.0  ;;  %v1223_v17 = vsel %vm11374_vm13, %v6395_v13, 0.0  ;;  %v11376_v3 = vld [vmem:[#allocation17_spill] sm:$0xff] }
 0x2c5   : > { %v1324_v52 = vsub.f32 %v8779_v8, %v10729_v51  ;;  %v8805_v15 = vand.u32 4294901760, %v1224_v34  ;;  %vm11377_vm14 = vcmp.ne.s32.totalorder %v11376_v3, %v11266_v1  ;;  %vm11378_vm15 = vcmp.ne.s32.totalorder %v11376_v3, %v11268_v54 }
 0x2c6   : > { %v1318_v11 = vsub.f32 %v8785_v32, %v10730_v48  ;;  %v2541_v31 = vmul.f32 %v1223_v17, %v11358_v50  ;;  %v2542_v3 = vmul.f32 %v1224_v34, %v11354_v23  ;;  %vm2691_vm12 = vcmask 720512  }
 0x2c7   : > { %v1325_v24 = vand.u32 4294901760, %v1324_v52  ;;  %1551 = vmatmul.mubr.f32.gmra.mrb[22].mxu1 %v1550_v59  ;;  %11373 = vst [vmem:[#allocation15_spill] sm:$0xff] %v8805_v15  ;;  %v8813_v52 = vand.u32 4294901760, %v1223_v17  ;;  %v8819_v40 = vsub.f32 %v1224_v34, %v8805_v15  ;;  %vm2698_vm13 = vcmask 786112  }
 0x2c8   : > { %v1319_v16 = vand.u32 4294901760, %v1318_v11  ;;  %1621 = vmatprep.mubr.f32.mxu1 %v8770_v35  ;;  %v6397_v60 = vpop.eup %6396 }
 0x2c9   : > { %11375 = vst [vmem:[#allocation75_spill] sm:$0xff] %v8813_v52  ;;  %v1221_v25 = vsel %vm11377_vm14, %v6397_v60, 0.0  ;;  %v8837_v51 = vsub.f32 %v1223_v17, %v8813_v52  ;;  %v10731_v48 = vand.u32 4294901760, %v8819_v40  ;;  %v2575_v17 = vadd.f32 %v2542_v3, %v2541_v31 }
 0x2ca   : > { %1320 = vmatprep.mubr.f32.mxu0 %v1319_v16  ;;  %v2539_v16 = vmul.f32 %v1221_v25, %v11368_v47  ;;  %vm2705_vm14 = vcmask 851712  }
 0x2cb   : > { %1326 = vmatmul.mubr.f32.vlgmr.msra.gmra.mrb[32].mxu0 %v1325_v24  ;;  %1623 = vmatmul.mubr.f32.vlgmr.msra.gmra.mrb[24].mxu1 %v8766_v61  ;;  %v8825_v24 = vand.u32 4294901760, %v1221_v25  ;;  %v10733_v34 = vand.u32 4294901760, %v8837_v51 }
 0x2cc   : > { %1734 = vmatpush1.msra.mxu0 %v11286_v43  ;;  %5743 = vmatpush3.bf16.msra.mxu1 %v11288_v19 }
 0x2cd   : > { %2183 = vmatprep.subr.mxu0 %v11286_v43  ;;  %v6399_v46 = vpop.eup %6398  ;;  %5744 = vmatprep.subr.bf16.mxu1 %v11288_v19  ;;  %v8834_v60 = vsub.f32 %v1221_v25, %v8825_v24  ;;  %v1354_v31 = vsub.f32 %v8837_v51, %v10733_v34 }
 0x2ce   : > { %v1222_v11 = vsel %vm11378_vm15, %v6399_v46, 0.0  ;;  %vm2712_vm15 = vcmask 917312  }
 0x2cf   : > { %v8829_v13 = vand.u32 4294901760, %v1222_v11  ;;  %v2540_v59 = vmul.f32 %v1222_v11, %v11369_v28  ;;  %v10732_v50 = vand.u32 4294901760, %v8834_v60 }
 0x2d0   : > { %5745 = vmatpush3.bf16.msra.mxu1 %v11288_v19 }
 0x2d1   : > { %1628 = vmatprep.mubr.f32.mxu1 %v8829_v13  ;;  %v2572_v46 = vadd.f32 %v2540_v59, %v2539_v16  ;;  %v8842_v47 = vsub.f32 %v1222_v11, %v8829_v13  ;;  %5746 = vmatprep.subr.bf16.mxu1 %v11288_v19  ;;  %v1339_v23 = vsub.f32 %v8834_v60, %v10732_v50  ;;  %v2623_v59 = vadd.s32 4294967288, %v11266_v1 }
 0x2d2   : > { %1630 = vmatmul.mubr.f32.gmra.mrb[26].mxu1 %v8825_v24  ;;  %v1348_v11 = vsub.f32 %v8819_v40, %v10731_v48  ;;  %v1355_v50 = vand.u32 4294901760, %v1354_v31 }
 0x2d3   : > { %2573 = vadd.xlane.f32.xlu0 %v2572_v46  ;;  %1635 = vmatprep.mubr.f32.mxu1 %v8805_v15  ;;  %v10734_v28 = vand.u32 4294901760, %v8842_v47  ;;  %v1340_v16 = vand.u32 4294901760, %v1339_v23  ;;  %v8871_v48 = vsub.s32 %v2623_v59, %v11251_v53  ;;  %v2630_v23 = vadd.s32 4294967280, %v11266_v1 }
 0x2d4   : > { %5747 = vmatpush3.bf16.msra.mxu1 %v11288_v19  ;;  %v1349_v3 = vand.u32 4294901760, %v1348_v11  ;;  %v2644_v11 = vadd.s32 4294967264, %v11266_v1 }
 0x2d5   : > { %v1333_v25 = vsub.f32 %v8842_v47, %v10734_v28  ;;  %5748 = vmatprep.subr.bf16.mxu1 %v11288_v19  ;;  %11379 = vst [vmem:[#allocation76_spill] sm:$0xff] %v8871_v48  ;;  %v2627_v59 = vrot.slane %v8768_v21, %v8871_v48  ;;  %v8887_v31 = vsub.s32 %v2630_v23, %v11251_v53  ;;  %v11387_v48 = vld [vmem:[#allocation62_spill] sm:$0xff] }
 0x2d6   : > { %1637 = vmatmul.mubr.f32.gmra.mrb[28].mxu1 %v8813_v52 }
 0x2d7   : > { %2576 = vadd.xlane.f32.xlu0 %v2575_v17  ;;  %v1334_v46 = vand.u32 4294901760, %v1333_v25  ;;  %v8876_v17 = vsub.s32 %v11266_v1, %v11251_v53  ;;  %v2637_v25 = vadd.s32 4294967272, %v11266_v1  ;;  %11381 = vst [vmem:[#allocation17_spill] sm:$0xff] %v8887_v31 }
 0x2d8   : > { %5749 = vmatpush3.bf16.msra.mxu1 %v11288_v19 }
 0x2d9   : > { %1335 = vmatprep.mubr.f32.mxu0 %v1334_v46  ;;  %5750 = vmatprep.subr.bf16.mxu1 %v11288_v19  ;;  %11380 = vst [vmem:[#allocation18_spill] sm:$0xff] %v8876_v17  ;;  %v2658_v46 = vadd.s32 4294967248, %v11266_v1  ;;  %v8892_v34 = vsub.s32 %v2637_v25, %v11251_v53 }
 0x2da   : > { %1341 = vmatmul.mubr.f32.gmra.mrb[34].mxu0 %v1340_v16  ;;  %v2651_v16 = vadd.s32 4294967256, %v11266_v1 }
 0x2db   : > { %1350 = vmatprep.mubr.f32.mxu0 %v1349_v3  ;;  %v2622_v3 = vrot.slane %v8649_v33, %v8876_v17  ;;  %11382 = vst [vmem:[#allocation210_spill] sm:$0xff] %v8892_v34  ;;  %v8904_v23 = vsub.s32 %v2658_v46, %v11251_v53  ;;  %v2634_v33 = vrot.slane %v8688_v41, %v8887_v31  ;;  %v11386_v17 = vld [vmem:[#allocation61_spill] sm:$0xff] }
 0x2dc   : > { %5751 = vmatpush3.bf16.msra.mxu1 %v11288_v19  ;;  %v8899_v28 = vsub.s32 %v2651_v16, %v11251_v53 }
 0x2dd   : > { %5752 = vmatprep.subr.bf16.mxu1 %v11288_v19  ;;  %v2629_v21 = vsel %vm2628_vm6, %v2627_v59, %v2622_v3  ;;  %11385 = vst [vmem:[#allocation213_spill] sm:$0xff] %v8904_v23  ;;  %v1061_v25 = vpop.permute.xlu0 %1060 }
 0x2de   : > { %1356 = vmatmul.mubr.f32.gmra.mrb[36].mxu0 %v1355_v50  ;;  %v8896_v50 = vsub.s32 %v2644_v11, %v11251_v53  ;;  %11384 = vst [vmem:[#allocation212_spill] sm:$0xff] %v8899_v28  ;;  %v1129_v11 = vsub.f32 %v11386_v17, %v1061_v25  ;;  %v1130_v52 = vsub.f32 %v11387_v48, %v1061_v25 }
 0x2df   : > { %v2641_v16 = vrot.slane %v1061_v25, %v8892_v34  ;;  %v2655_v46 = vrot.slane %v8313_v7, %v8899_v28  ;;  %v2636_v3 = vsel %vm2635_vm4, %v2634_v33, %v2629_v21  ;;  %v2662_v25 = vrot.slane %v8319_v26, %v8904_v23 }
 0x2e0   : > { %5753 = vmatpush3.bf16.msra.mxu1 %v11288_v19  ;;  %11383 = vst [vmem:[#allocation211_spill] sm:$0xff] %v8896_v50  ;;  %v2648_v59 = vrot.slane %v8307_v44, %v8896_v50  ;;  %v1167_v41 = vmul.f32 1.442695, %v1129_v11  ;;  %v1169_v31 = vmul.f32 1.442695, %v1130_v52  ;;  %v2665_v7 = vadd.s32 4294967240, %v11266_v1 }
 0x2e1   : > { %5754 = vmatprep.subr.bf16.mxu1 %v11288_v19  ;;  %v2643_v15 = vsel %vm2642_vm2, %v2641_v16, %v2636_v3  ;;  %v2679_v52 = vadd.s32 4294967224, %v11266_v1  ;;  %v2693_v33 = vadd.s32 4294967208, %v11266_v1  ;;  %v2672_v26 = vadd.s32 4294967232, %v11266_v1 }
 0x2e2   : > { %v2650_v34 = vsel %vm2649_vm3, %v2648_v59, %v2643_v15  ;;  %6400 = vpow2.f32 %v1167_v41  ;;  %v2686_v15 = vadd.s32 4294967216, %v11266_v1  ;;  %v2707_v11 = vadd.s32 4294967192, %v11266_v1 }
 0x2e3   : > { %v2657_v44 = vsel %vm2656_vm5, %v2655_v46, %v2650_v34  ;;  %6402 = vpow2.f32 %v1169_v31  ;;  %v8933_v34 = vsub.s32 %v2665_v7, %v11251_v53  ;;  %v2721_v16 = vadd.s32 4294967176, %v11266_v1 }
 0x2e4   : > { %5755 = vmatpush3.bf16.msra.mxu1 %v11288_v19  ;;  %v2664_v21 = vsel %vm2663_vm7, %v2662_v25, %v2657_v44  ;;  %v2700_v31 = vadd.s32 4294967200, %v11266_v1  ;;  %v2714_v59 = vadd.s32 4294967184, %v11266_v1  ;;  %v8939_v46 = vsub.s32 %v2679_v52, %v11251_v53 }
 0x2e5   : > { %5756 = vmatprep.subr.bf16.mxu1 %v11288_v19  ;;  %11388 = vst [vmem:[#allocation61_spill] sm:$0xff] %v8933_v34  ;;  %v8942_v3 = vsub.s32 %v2693_v33, %v11251_v53  ;;  %v8945_v41 = vsub.s32 %v2672_v26, %v11251_v53  ;;  %v8948_v25 = vsub.s32 %v2686_v15, %v11251_v53  ;;  %v11432_v50 = vand.u32 4294901760, %v8785_v32 }
 0x2e6   : > { %11389 = vst [vmem:[#allocation62_spill] sm:$0xff] %v8939_v46  ;;  %v8951_v44 = vsub.s32 %v2707_v11, %v11251_v53  ;;  %v2669_v7 = vrot.slane %v8325_v38, %v8933_v34  ;;  %v8956_v23 = vsub.s32 %v2721_v16, %v11251_v53  ;;  %v8959_v52 = vsub.s32 %v2700_v31, %v11251_v53  ;;  %v11397_v31 = vld [vmem:[#allocation19_spill] sm:$0xff]  ;;  %v11431_v34 = vld [vmem:[#allocation81_spill] sm:$0xff] }
 0x2e7   : > { %11390 = vst [vmem:[#allocation214_spill] sm:$0xff] %v8942_v3  ;;  %11391 = vst [vmem:[#allocation215_spill] sm:$0xff] %v8945_v41  ;;  %v8962_v33 = vsub.s32 %v2714_v59, %v11251_v53  ;;  %v2683_v15 = vrot.slane %v8339_v27, %v8939_v46  ;;  %v2697_v11 = vrot.slane %v8383_v30, %v8942_v3 }
 0x2e8   : > { %5757 = vmatpush3.bf16.msra.mxu1 %v11288_v19  ;;  %11392 = vst [vmem:[#allocation216_spill] sm:$0xff] %v8948_v25  ;;  %11393 = vst [vmem:[#allocation217_spill] sm:$0xff] %v8951_v44  ;;  %v2676_v28 = vrot.slane %v8494_v63, %v8945_v41  ;;  %v2690_v16 = vrot.slane %v8504_v62, %v8948_v25  ;;  %vm11398_vm8 = vcmp.ne.s32.totalorder %v11397_v31, %v11266_v1  ;;  %v11429_v25 = vld [vmem:[#allocation34_spill] sm:$0xff]  ;;  %v11430_v41 = vld [vmem:[#allocation41_spill] sm:$0xff] }
 0x2e9   : > { %5758 = vmatprep.subr.bf16.mxu1 %v11288_v19  ;;  %11394 = vst [vmem:[#allocation218_spill] sm:$0xff] %v8956_v23  ;;  %11395 = vst [vmem:[#allocation219_spill] sm:$0xff] %v8959_v52  ;;  %v2671_v59 = vsel %vm2670_vm1, %v2669_v7, %v2664_v21  ;;  %vm11399_vm10 = vcmp.ne.s32.totalorder %v11397_v31, %v11268_v54  ;;  %v2704_v1 = vrot.slane %v8524_v49, %v8959_v52  ;;  %v11428_v52 = vld [vmem:[#allocation49_spill] sm:$0xff] }
 0x2ea   : > { %11396 = vst [vmem:[#allocation220_spill] sm:$0xff] %v8962_v33  ;;  %v2678_v3 = vsel %vm2677_vm9, %v2676_v28, %v2671_v59  ;;  %v2711_v7 = vrot.slane %v8437_v39, %v8951_v44  ;;  %v2725_v39 = vrot.slane %v8474_v22, %v8956_v23  ;;  %v11425_v23 = vld [vmem:[#allocation33_spill] sm:$0xff]  ;;  %v11427_v44 = vld [vmem:[#allocation14_spill] sm:$0xff] }
 0x2eb   : > { %v2685_v54 = vsel %vm2684_vm11, %v2683_v15, %v2678_v3 }
 0x2ec   : > { %v6401_v26 = vpop.eup %6400 }
 0x2ed   : > { %v6403_v38 = vpop.eup %6402  ;;  %v1225_v53 = vsel %vm11398_vm8, %v6401_v26, 0.0  ;;  %v2718_v26 = vrot.slane %v8537_v10, %v8962_v33  ;;  %vm2719_vm8 = vcmask 982912   ;;  %v11426_v33 = vld [vmem:[#allocation9_spill] sm:$0xff] }
 0x2ee   : > { %v1226_v27 = vsel %vm11399_vm10, %v6403_v38, 0.0  ;;  %v8979_v30 = vand.u32 4294901760, %v1225_v53  ;;  %v2543_v63 = vmul.f32 %v1225_v53, %v11386_v17  ;;  %vm2726_vm10 = vcmask 1048512  }
 0x2ef   : > { %v8983_v46 = vand.u32 4294901760, %v1226_v27  ;;  %v2544_v62 = vmul.f32 %v1226_v27, %v11387_v48  ;;  %v2692_v48 = vsel %vm2691_vm12, %v2690_v16, %v2685_v54 }
 0x2f0   : > { %v8989_v21 = vsub.f32 %v1225_v53, %v8979_v30  ;;  %v2699_v3 = vsel %vm2698_vm13, %v2697_v11, %v2692_v48  ;;  %v11407_v48 = vld [vmem:[#allocation26_spill] sm:$0xff] }
 0x2f1   : > { %1642 = vmatprep.mubr.f32.mxu1 %v8983_v46  ;;  %v2578_v17 = vadd.f32 %v2544_v62, %v2543_v63  ;;  %v8994_v28 = vsub.f32 %v1226_v27, %v8983_v46  ;;  %v2706_v38 = vsel %vm2705_vm14, %v2704_v1, %v2699_v3  ;;  %v11401_v27 = vld [vmem:[#allocation23_spill] sm:$0xff]  ;;  %v11402_v63 = vld [vmem:[#allocation64_spill] sm:$0xff]  ;;  %v11404_v1 = vld [vmem:[#allocation65_spill] sm:$0xff] }
 0x2f2   : > { %1644 = vmatmul.mubr.f32.gmra.mrb[30].mxu1 %v8979_v30  ;;  %v10755_v49 = vand.u32 4294901760, %v8989_v21  ;;  %v2713_v16 = vsel %vm2712_vm15, %v2711_v7, %v2706_v38  ;;  %v11403_v62 = vand.u32 4294901760, %v11402_v63  ;;  %v11405_v54 = vand.u32 4294901760, %v11404_v1  ;;  %v11408_v7 = vld [vmem:[#allocation27_spill] sm:$0xff]  ;;  %v11409_v3 = vld [vmem:[#allocation48_spill] sm:$0xff]  ;;  %v11419_v63 = vld [vmem:[#allocation45_spill] sm:$0xff] }
 0x2f3   : > { %2579 = vadd.xlane.f32.xlu1 %v2578_v17  ;;  %1649 = vmatprep.mubr.f32.mxu1 %v8341_v45  ;;  %v10756_v15 = vand.u32 4294901760, %v8994_v28  ;;  %v2720_v31 = vsel %vm2719_vm8, %v2718_v26, %v2713_v16  ;;  %v11410_v26 = vld [vmem:[#allocation83_spill] sm:$0xff]  ;;  %v11414_v16 = vld [vmem:[#allocation20_spill] sm:$0xff]  ;;  %v11421_v1 = vld [vmem:[#allocation82_spill] sm:$0xff] }
 0x2f4   : > { %v1369_v11 = vsub.f32 %v8989_v21, %v10755_v49  ;;  %v9022_v22 = vsel %vm2726_vm10, %v2725_v39, %v2720_v31  ;;  %v9038_v17 = vpack.c.bf16 %v11405_v54, %v11403_v62  ;;  %v11411_v38 = vld [vmem:[#allocation39_spill] sm:$0xff]  ;;  %v11412_v39 = vld [vmem:[#allocation32_spill] sm:$0xff]  ;;  %v11420_v62 = vld [vmem:[#allocation22_spill] sm:$0xff] }
 0x2f5   : > { %v1363_v10 = vsub.f32 %v8994_v28, %v10756_v15  ;;  %11400 = vst [vmem:[#allocation19_spill] sm:$0xff] %v9022_v22  ;;  %2996 = vst [vmem:[%s9025_s19 + $0x1] sm:$0x1] %v9022_v22  ;;  %v11416_v31 = vld [vmem:[#allocation7_spill] sm:$0xff]  ;;  %v11422_v54 = vld [vmem:[#allocation24_spill] sm:$0xff] }
 0x2f6   : > { %1651 = vmatmul.mubr.f32.gmra.mrb[32].mxu1 %v8337_v36  ;;  %v1370_v53 = vand.u32 4294901760, %v1369_v11  ;;  %11406 = vst [vmem:[#allocation23_spill] sm:$0xff] %v9038_v17  ;;  %v11413_v11 = vld [vmem:[#allocation55_spill] sm:$0xff]  ;;  %v11423_v49 = vld [vmem:[#allocation25_spill] sm:$0xff]  ;;  %v11433_v22 = vld [vmem:[#allocation56_spill] sm:$0xff] }
 0x2f7   : > { %1656 = vmatprep.mubr.f32.mxu1 %v8361_v56  ;;  %v1364_v59 = vand.u32 4294901760, %v1363_v10  ;;  %v11415_v10 = vld [vmem:[#allocation53_spill] sm:$0xff]  ;;  %v11424_v15 = vld [vmem:[#allocation11_spill] sm:$0xff] }
 0x2f9   : > { %1365 = vmatprep.mubr.f32.mxu0 %v1364_v59  ;;  %v11418_v59 = vld [vmem:[#allocation21_spill] sm:$0xff] }
 0x2fa   : > { %1371 = vmatmul.mubr.f32.gmra.mrb[38].mxu0 %v1370_v53  ;;  %1658 = vmatmul.mubr.f32.gmra.mrb[34].mxu1 %v8363_v29  ;;  %v11417_v53 = vld [vmem:[#allocation46_spill] sm:$0xff] }
 0x2fb   : > { %1663 = vmatprep.mubr.f32.mxu1 %v8387_v2  ;;  %1799 = vmatprep.mubr.f32.mxu0 %v8785_v32  ;;  %v11442_v32 = vand.u32 4294901760, %v8989_v21 }
 0x2fe   : > { %1665 = vmatmul.mubr.f32.gmra.mrb[36].mxu1 %v11401_v27  ;;  %1802 = vmatmul.mubr.f32.vlgmr.msra.gmra.mrb[40].mxu0 %v8779_v8 }
 0x2ff   : > { %2184 = vmatpush1.msra.mxu0 %v11286_v43  ;;  %1670 = vmatprep.mubr.f32.mxu1 %v11407_v48  ;;  %v11435_v43 = vld [vmem:[#allocation50_spill] sm:$0xff] }
 0x300   : > { %1808 = vmatprep.mubr.f32.mxu0 %v8842_v47  ;;  %5775 = vmatprep.subr.bf16.mxu0 %v9038_v17  ;;  %v11434_v17 = vand.u32 4294901760, %v8779_v8  ;;  %v11439_v8 = vand.u32 4294901760, %v8819_v40 }
 0x302   : > { %1672 = vmatmul.mubr.f32.gmra.mrb[38].mxu1 %v11408_v7  ;;  %1811 = vmatmul.mubr.f32.gmra.mrb[42].mxu0 %v8834_v60 }
 0x303   : > { %1677 = vmatprep.mubr.f32.mxu1 %v11409_v3  ;;  %1817 = vmatprep.mubr.f32.mxu0 %v8819_v40  ;;  %v11444_v40 = vand.u32 4294901760, %v11416_v31 }
 0x306   : > { %1679 = vmatmul.mubr.f32.gmra.mrb[40].mxu1 %v11410_v26  ;;  %1820 = vmatmul.mubr.f32.gmra.mrb[44].mxu0 %v8837_v51 }
 0x307   : > { %1684 = vmatprep.mubr.f32.mxu1 %v11411_v38  ;;  %1826 = vmatprep.mubr.f32.mxu0 %v8994_v28 }
 0x30a   : > { %1686 = vmatmul.mubr.f32.gmra.mrb[42].mxu1 %v11412_v39  ;;  %1829 = vmatmul.mubr.f32.gmra.mrb[46].mxu0 %v8989_v21  ;;  %v11447_v21 = vld [vmem:[#allocation92_spill] sm:$0xff] }
 0x30b   : > { %1691 = vmatprep.mubr.f32.mxu1 %v11413_v11  ;;  %1835 = vmatprep.mubr.f32.mxu0 %v11414_v16 }
 0x30e   : > { %1693 = vmatmul.mubr.f32.gmra.mrb[44].mxu1 %v11415_v10  ;;  %1838 = vmatmul.mubr.f32.gmra.mrb[48].mxu0 %v11416_v31  ;;  %v11450_v31 = vld [vmem:[#allocation99_spill] sm:$0xff] }
 0x30f   : > { %1698 = vmatprep.mubr.f32.mxu1 %v11417_v53  ;;  %1844 = vmatprep.mubr.f32.mxu0 %v11418_v59 }
 0x312   : > { %1700 = vmatmul.mubr.f32.gmra.mrb[46].mxu1 %v11419_v63  ;;  %1847 = vmatmul.mubr.f32.gmra.mrb[50].mxu0 %v11420_v62 }
 0x313   : > { %1705 = vmatprep.mubr.f32.mxu1 %v11421_v1  ;;  %1853 = vmatprep.mubr.f32.mxu0 %v11422_v54 }
 0x316   : > { %1707 = vmatmul.mubr.f32.gmra.mrb[48].mxu1 %v8647_v9  ;;  %1856 = vmatmul.mubr.f32.gmra.mrb[52].mxu0 %v11423_v49 }
 0x317   : > { %1712 = vmatprep.mubr.f32.mxu1 %v11424_v15  ;;  %1862 = vmatprep.mubr.f32.mxu0 %v11425_v23 }
 0x31a   : > { %1714 = vmatmul.mubr.f32.gmra.mrb[50].mxu1 %v8667_v14  ;;  %1865 = vmatmul.mubr.f32.gmra.mrb[54].mxu0 %v11426_v33  ;;  %v11477_v14 = vld [vmem:[#allocation97_spill] sm:$0xff] }
 0x31b   : > { %1719 = vmatprep.mubr.f32.mxu1 %v8691_v0  ;;  %1871 = vmatprep.mubr.f32.mxu0 %v11427_v44 }
 0x31e   : > { %1721 = vmatmul.mubr.f32.gmra.mrb[52].mxu1 %v8707_v4  ;;  %1874 = vmatmul.mubr.f32.gmra.mrb[56].mxu0 %v11428_v52  ;;  %v11438_v4 = vand.u32 4294901760, %v8834_v60  ;;  %v11445_v60 = vand.u32 4294901760, %v11418_v59  ;;  %v11451_v59 = vld [vmem:[#allocation100_spill] sm:$0xff] }
 0x31f   : > { %1726 = vmatprep.mubr.f32.mxu1 %v8704_v42  ;;  %1880 = vmatprep.mubr.f32.mxu0 %v11429_v25  ;;  %v11436_v42 = vand.u32 4294901760, %v8842_v47  ;;  %v11446_v47 = vld [vmem:[#allocation89_spill] sm:$0xff] }
 0x322   : > { %1728 = vmatmul.mubr.f32.gmra.mrb[54].mxu1 %v8725_v37  ;;  %1883 = vmatmul.mubr.f32.gmra.mrb[58].mxu0 %v11430_v41  ;;  %v11437_v37 = vld [vmem:[#allocation51_spill] sm:$0xff] }
 0x323   : > { %1889 = vmatprep.mubr.f32.mxu0 %v11431_v34  ;;  %2009 = vmatprep.mubr.f32.mxu1 %v11432_v50  ;;  %v10785_v50 = vand.u32 4294901760, %v11446_v47 }
 0x326   : > { %1892 = vmatmul.mubr.f32.gmra.mrb[60].mxu0 %v11433_v22  ;;  %2013 = vmatmul.mubr.f32.vlgmr.msra.gmra.mrb[56].mxu1 %v11434_v17  ;;  %v11448_v17 = vand.u32 4294901760, %v11420_v62  ;;  %v11453_v62 = vld [vmem:[#allocation101_spill] sm:$0xff] }
 0x327   : > { %5759 = vmatpush3.bf16.msra.mxu1 %v11288_v19  ;;  %1898 = vmatprep.mubr.f32.mxu0 %v11435_v43 }
 0x328   : > { %2020 = vmatprep.mubr.f32.mxu1 %v11436_v42  ;;  %5760 = vmatprep.subr.bf16.mxu1 %v11288_v19  ;;  %v11440_v42 = vand.u32 4294901760, %v8837_v51  ;;  %v11443_v51 = vand.u32 4294901760, %v11414_v16  ;;  %v11449_v16 = vand.u32 4294901760, %v11422_v54  ;;  %v11455_v54 = vand.u32 4294901760, %v11423_v49 }
 0x32a   : > { %1901 = vmatmul.mubr.f32.gmra.mrb[62].mxu0 %v11437_v37  ;;  %2024 = vmatmul.mubr.f32.gmra.mrb[58].mxu1 %v11438_v4  ;;  %v11441_v4 = vand.u32 4294901760, %v8994_v28  ;;  %v10784_v28 = vand.u32 4294901760, %v11447_v21 }
 0x32b   : > { %5761 = vmatpush3.bf16.msra.mxu1 %v11288_v19  ;;  %1907 = vmatprep.mubr.f32.mxu0 %v8655_v18 }
 0x32c   : > { %2031 = vmatprep.mubr.f32.mxu1 %v11439_v8  ;;  %5762 = vmatprep.subr.bf16.mxu1 %v11288_v19  ;;  %v10787_v8 = vand.u32 4294901760, %v11450_v31 }
 0x32e   : > { %1910 = vmatmul.mubr.f32.gmra.mrb[64].mxu0 %v8683_v20  ;;  %2035 = vmatmul.mubr.f32.gmra.mrb[60].mxu1 %v11440_v42  ;;  %v10786_v42 = vand.u32 4294901760, %v11451_v59 }
 0x32f   : > { %5763 = vmatpush3.bf16.msra.mxu1 %v11288_v19  ;;  %1916 = vmatprep.mubr.f32.mxu0 %v8677_v57 }
 0x330   : > { %2042 = vmatprep.mubr.f32.mxu1 %v11441_v4  ;;  %5764 = vmatprep.subr.bf16.mxu1 %v11288_v19  ;;  %v9137_v4 = vpack.c.bf16 %v10784_v28, %v10785_v50  ;;  %v11458_v28 = vld [vmem:[#allocation105_spill] sm:$0xff] }
 0x331   : > { %v10797_v50 = vand.u32 4294901760, %v11458_v28  ;;  %v11478_v28 = vand.u32 4294901760, %v11477_v14 }
 0x332   : > { %1919 = vmatmul.mubr.f32.gmra.mrb[66].mxu0 %v8697_v12  ;;  %2046 = vmatmul.mubr.f32.gmra.mrb[62].mxu1 %v11442_v32  ;;  %11452 = vst [vmem:[#allocation64_spill] sm:$0xff] %v9137_v4  ;;  %v10788_v32 = vand.u32 4294901760, %v11453_v62 }
 0x333   : > { %5765 = vmatpush3.bf16.msra.mxu1 %v11288_v19  ;;  %1925 = vmatprep.mubr.f32.mxu0 %v8715_v55 }
 0x334   : > { %2053 = vmatprep.mubr.f32.mxu1 %v11443_v51  ;;  %5766 = vmatprep.subr.bf16.mxu1 %v11288_v19  ;;  %v11454_v51 = vld [vmem:[#allocation102_spill] sm:$0xff] }
 0x335   : > { %v11460_v49 = vand.u32 4294901760, %v11454_v51 }
 0x336   : > { %1928 = vmatmul.mubr.f32.gmra.mrb[68].mxu0 %v8734_v6  ;;  %2057 = vmatmul.mubr.f32.gmra.mrb[64].mxu1 %v11444_v40  ;;  %v11459_v40 = vand.u32 4294901760, %v11425_v23 }
 0x337   : > { %5767 = vmatpush3.bf16.msra.mxu1 %v11288_v19  ;;  %1934 = vmatprep.mubr.f32.mxu0 %v8743_v5 }
 0x338   : > { %2064 = vmatprep.mubr.f32.mxu1 %v11445_v60  ;;  %5768 = vmatprep.subr.bf16.mxu1 %v11288_v19  ;;  %v9150_v60 = vpack.c.bf16 %v10786_v42, %v10787_v8  ;;  %v11462_v42 = vand.u32 4294901760, %v11426_v33  ;;  %v11464_v8 = vand.u32 4294901760, %v11427_v44  ;;  %v11474_v44 = vld [vmem:[#allocation75_spill] sm:$0xff] }
 0x33a   : > { %1937 = vmatmul.mubr.f32.gmra.mrb[70].mxu0 %v8752_v58  ;;  %2068 = vmatmul.mubr.f32.gmra.mrb[66].mxu1 %v11448_v17  ;;  %11456 = vst [vmem:[#allocation65_spill] sm:$0xff] %v9150_v60  ;;  %v11457_v17 = vld [vmem:[#allocation103_spill] sm:$0xff] }
 0x33b   : > { %5769 = vmatpush3.bf16.msra.mxu1 %v11288_v19  ;;  %2075 = vmatprep.mubr.f32.mxu1 %v11449_v16  ;;  %v10798_v16 = vand.u32 4294901760, %v11457_v17 }
 0x33c   : > { %2248 = vmatprep.mubr.f32.mxu0 %v8770_v35  ;;  %5770 = vmatprep.subr.bf16.mxu1 %v11288_v19 }
 0x33e   : > { %2079 = vmatmul.mubr.f32.gmra.mrb[68].mxu1 %v11455_v54  ;;  %2250 = vmatmul.mubr.f32.vlgmr.msra.gmra.mrb[72].mxu0 %v8766_v61  ;;  %v9163_v54 = vpack.c.bf16 %v11460_v49, %v10788_v32  ;;  %v11465_v49 = vld [vmem:[#allocation15_spill] sm:$0xff]  ;;  %v11468_v32 = vld [vmem:[#allocation94_spill] sm:$0xff] }
 0x33f   : > { %5771 = vmatpush3.bf16.msra.mxu1 %v11288_v19  ;;  %5777 = vmatpush1.bf16.msra.mxu0 %v9137_v4 }
 0x340   : > { %2086 = vmatprep.mubr.f32.mxu1 %v11459_v40  ;;  %2255 = vmatprep.mubr.f32.mxu0 %v8829_v13  ;;  %11461 = vst [vmem:[#allocation26_spill] sm:$0xff] %v9163_v54  ;;  %v9174_v40 = vpack.c.bf16 %v10797_v50, %v10798_v16  ;;  %v11473_v50 = vand.u32 4294901760, %v11428_v52 }
 0x341   : > { %5779 = vmatprep.subr.bf16.mxu0 %v9150_v60  ;;  %5772 = vmatprep.subr.bf16.mxu1 %v11288_v19  ;;  %v11470_v60 = vld [vmem:[#allocation95_spill] sm:$0xff] }
 0x342   : > { %2090 = vmatmul.mubr.f32.gmra.mrb[70].mxu1 %v11462_v42  ;;  %2257 = vmatmul.mubr.f32.gmra.mrb[74].mxu0 %v8825_v24  ;;  %11463 = vst [vmem:[#allocation27_spill] sm:$0xff] %v9174_v40  ;;  %v11466_v42 = vld [vmem:[#allocation73_spill] sm:$0xff]  ;;  %v11471_v4 = vand.u32 4294901760, %v11470_v60 }
 0x343   : > { %5773 = vmatpush3.bf16.msra.mxu1 %v11288_v19  ;;  %5781 = vmatpush1.bf16.msra.mxu0 %v9163_v54  ;;  %v5530_v23 = vpop.f32.mrb[0].mxu1  ;;  %v11469_v54 = vand.u32 4294901760, %v11468_v32  ;;  %v11480_v32 = vand.u32 4294901760, %v11429_v25  ;;  %v11488_v25 = vld [vmem:[#allocation114_spill] sm:$0xff] }
 0x344   : > { %2097 = vmatprep.mubr.f32.mxu1 %v11464_v8  ;;  %2262 = vmatprep.mubr.f32.mxu0 %v11465_v49  ;;  %v5531_v33 = vpop.f32.mrb[1].mxu1  ;;  %v11475_v8 = vld [vmem:[#allocation96_spill] sm:$0xff] }
 0x345   : > { %5783 = vmatprep.subr.bf16.mxu0 %v9174_v40  ;;  %5967 = vmatprep.subr.bf16.mxu1 %v11466_v42  ;;  %v9181_v19 = vadd.f32 %v5531_v33, %v5530_v23  ;;  %v9187_v0 = vpack.c.bf16 %v11471_v4, %v11469_v54  ;;  %v11476_v16 = vand.u32 4294901760, %v11475_v8  ;;  %v11482_v4 = vld [vmem:[#allocation112_spill] sm:$0xff]  ;;  %v11484_v54 = vld [vmem:[#allocation113_spill] sm:$0xff]  ;;  %v11490_v8 = vld [vmem:[#allocation115_spill] sm:$0xff] }
 0x346   : > { %2101 = vmatmul.mubr.f32.gmra.mrb[72].mxu1 %v11473_v50  ;;  %2264 = vmatmul.mubr.f32.gmra.mrb[76].mxu0 %v11474_v44  ;;  %v11483_v60 = vand.u32 4294901760, %v11482_v4  ;;  %v11485_v33 = vand.u32 4294901760, %v11484_v54 }
 0x347   : > { %11467 = vst [vmem:[#allocation48_spill] sm:$0xff] %v9181_v19  ;;  %11472 = vst [vmem:[#allocation83_spill] sm:$0xff] %v9187_v0  ;;  %v9196_v40 = vpack.c.bf16 %v11478_v28, %v11476_v16  ;;  %5785 = vmatpush1.bf16.msra.mxu0 %v9187_v0  ;;  %v5533_v23 = vpop.f32.mrb[2].mxu1  ;;  %2108 = vmatprep.mubr.f32.mxu1 %v11480_v32  ;;  %v11487_v28 = vand.u32 4294901760, %v11430_v41  ;;  %v11489_v16 = vand.u32 4294901760, %v11488_v25  ;;  %v11491_v32 = vand.u32 4294901760, %v11490_v8 }
 0x348   : > { %2269 = vmatprep.mubr.f32.mxu0 %v8983_v46  ;;  %v5534_v52 = vpop.f32.mrb[3].mxu1  ;;  %v9209_v14 = vpack.c.bf16 %v11485_v33, %v11483_v60  ;;  %v11495_v60 = vld [vmem:[#allocation116_spill] sm:$0xff]  ;;  %v11497_v33 = vld [vmem:[#allocation118_spill] sm:$0xff] }
 0x349   : > { %11479 = vst [vmem:[#allocation39_spill] sm:$0xff] %v9196_v40  ;;  %5787 = vmatprep.subr.bf16.mxu0 %v9196_v40  ;;  %v9203_v50 = vadd.f32 %v5534_v52, %v5533_v23  ;;  %v9218_v42 = vpack.c.bf16 %v11491_v32, %v11489_v16  ;;  %v11493_v52 = vand.u32 4294901760, %v11431_v34  ;;  %v11496_v54 = vand.u32 4294901760, %v11495_v60  ;;  %v11500_v16 = vld [vmem:[#allocation68_spill] sm:$0xff]  ;;  %v11502_v34 = vld [vmem:[#allocation119_spill] sm:$0xff]  ;;  %v11674_v40 = vld [vmem:[#allocation138_spill] sm:$0xff] }
 0x34a   : > { %11486 = vst [vmem:[#allocation55_spill] sm:$0xff] %v9209_v14  ;;  %2112 = vmatmul.mubr.f32.gmra.mrb[74].mxu1 %v11487_v28  ;;  %2271 = vmatmul.mubr.f32.gmra.mrb[78].mxu0 %v8979_v30  ;;  %v11498_v28 = vand.u32 4294901760, %v11497_v33  ;;  %v10810_v8 = vand.u32 4294901760, %v11500_v16  ;;  %v11501_v32 = vand.u32 4294901760, %v11433_v22  ;;  %v11508_v60 = vand.u32 4294901760, %v11435_v43  ;;  %v11509_v33 = vld [vmem:[#allocation122_spill] sm:$0xff] }
 0x34b   : > { %11481 = vst [vmem:[#allocation32_spill] sm:$0xff] %v9203_v50  ;;  %11492 = vst [vmem:[#allocation20_spill] sm:$0xff] %v9218_v42  ;;  %5789 = vmatpush1.bf16.msra.mxu0 %v9209_v14  ;;  %v5536_v23 = vpop.f32.mrb[4].mxu1  ;;  %2119 = vmatprep.mubr.f32.mxu1 %v11493_v52  ;;  %v11503_v52 = vand.u32 4294901760, %v11502_v34  ;;  %v11504_v50 = vld [vmem:[#allocation120_spill] sm:$0xff]  ;;  %v11515_v43 = vand.u32 4294901760, %v11437_v37 }
 0x34c   : > { %2276 = vmatprep.mubr.f32.mxu0 %v8341_v45  ;;  %5791 = vmatprep.subr.bf16.mxu0 %v9218_v42  ;;  %v5537_v41 = vpop.f32.mrb[5].mxu1  ;;  %v9231_v25 = vpack.c.bf16 %v11498_v28, %v11496_v54  ;;  %v11505_v42 = vand.u32 4294901760, %v11504_v50  ;;  %v11510_v28 = vand.u32 4294901760, %v11509_v33  ;;  %v11523_v37 = vld [vmem:[#allocation140_spill] sm:$0xff] }
 0x34d   : > { %v9225_v4 = vadd.f32 %v5537_v41, %v5536_v23  ;;  %v11507_v23 = vld [vmem:[#allocation69_spill] sm:$0xff] }
 0x34e   : > { %11499 = vst [vmem:[#allocation7_spill] sm:$0xff] %v9231_v25  ;;  %2123 = vmatmul.mubr.f32.gmra.mrb[76].mxu1 %v11501_v32  ;;  %2278 = vmatmul.mubr.f32.gmra.mrb[80].mxu0 %v8337_v36  ;;  %v9241_v14 = vpack.c.bf16 %v11505_v42, %v11503_v52  ;;  %v11511_v32 = vld [vmem:[#allocation123_spill] sm:$0xff]  ;;  %v3611_v42 = vsub.f32 %v11500_v16, %v10810_v8 }
 0x34f   : > { %11494 = vst [vmem:[#allocation53_spill] sm:$0xff] %v9225_v4  ;;  %5793 = vmatpush1.bf16.msra.mxu0 %v9231_v25  ;;  %2130 = vmatprep.mubr.f32.mxu1 %v11508_v60  ;;  %v5539_v54 = vpop.f32.mrb[6].mxu1  ;;  %v11512_v34 = vand.u32 4294901760, %v11511_v32  ;;  %v11516_v60 = vld [vmem:[#allocation128_spill] sm:$0xff]  ;;  %v11672_v25 = vld [vmem:[#allocation137_spill] sm:$0xff] }
 0x350   : > { %11506 = vst [vmem:[#allocation46_spill] sm:$0xff] %v9241_v14  ;;  %2283 = vmatprep.mubr.f32.mxu0 %v8361_v56  ;;  %5795 = vmatprep.subr.bf16.mxu0 %v9241_v14  ;;  %v5540_v22 = vpop.f32.mrb[7].mxu1  ;;  %v11517_v41 = vand.u32 4294901760, %v11516_v60  ;;  %v11518_v4 = vld [vmem:[#allocation132_spill] sm:$0xff]  ;;  %v3612_v8 = vand.u32 4294901760, %v3611_v42 }
 0x351   : > { %v9253_v50 = vpack.c.bf16 %v11512_v34, %v11510_v28  ;;  %v9258_v52 = vadd.f32 %v5540_v22, %v5539_v54  ;;  %v11519_v14 = vand.u32 4294901760, %v11518_v4  ;;  %v11521_v28 = vand.u32 4294901760, %v11507_v23  ;;  %v11525_v34 = vld [vmem:[#allocation141_spill] sm:$0xff] }
 0x352   : > { %2134 = vmatmul.mubr.f32.gmra.mrb[78].mxu1 %v11515_v43  ;;  %2285 = vmatmul.mubr.f32.gmra.mrb[82].mxu0 %v8363_v29  ;;  %v11522_v54 = vand.u32 4294901760, %v8655_v18  ;;  %v11524_v22 = vand.u32 4294901760, %v11523_v37  ;;  %v11526_v43 = vand.u32 4294901760, %v11525_v34  ;;  %v11534_v37 = vand.u32 4294901760, %v8677_v57  ;;  %v11537_v34 = vld [vmem:[#allocation88_spill] sm:$0xff] }
 0x353   : > { %11513 = vst [vmem:[#allocation21_spill] sm:$0xff] %v9253_v50  ;;  %11514 = vst [vmem:[#allocation45_spill] sm:$0xff] %v9258_v52  ;;  %v9267_v33 = vpack.c.bf16 %v11519_v14, %v11517_v41  ;;  %v3623_v32 = vsub.f32 %v11507_v23, %v11521_v28  ;;  %5797 = vmatpush1.bf16.msra.mxu0 %v9253_v50  ;;  %2290 = vmatprep.mubr.f32.mxu0 %v8387_v2  ;;  %v11528_v14 = vand.u32 4294901760, %v8683_v20  ;;  %v11529_v41 = vld [vmem:[#allocation143_spill] sm:$0xff]  ;;  %v11531_v28 = vld [vmem:[#allocation98_spill] sm:$0xff] }
 0x354   : > { %2141 = vmatprep.mubr.f32.mxu1 %v11522_v54  ;;  %v9281_v4 = vpack.c.bf16 %v11526_v43, %v11524_v22  ;;  %v11530_v60 = vand.u32 4294901760, %v11529_v41  ;;  %v11532_v18 = vand.u32 4294901760, %v11531_v28  ;;  %v11535_v20 = vld [vmem:[#allocation146_spill] sm:$0xff]  ;;  %v11538_v43 = vand.u32 4294901760, %v11537_v34  ;;  %v11557_v34 = vld [vmem:[#allocation144_spill] sm:$0xff] }
 0x355   : > { %11520 = vst [vmem:[#allocation22_spill] sm:$0xff] %v9267_v33  ;;  %5799 = vmatprep.subr.bf16.mxu0 %v9267_v33  ;;  %v3624_v52 = vand.u32 4294901760, %v3623_v32  ;;  %v11536_v22 = vand.u32 4294901760, %v11535_v20  ;;  %v11540_v41 = vand.u32 4294901760, %v8697_v12  ;;  %v11541_v57 = vand.u32 4294901760, %v8715_v55  ;;  %v11545_v55 = vld [vmem:[#allocation91_spill] sm:$0xff] }
 0x356   : > { %11527 = vst [vmem:[#allocation82_spill] sm:$0xff] %v9281_v4  ;;  %2145 = vmatmul.mubr.f32.gmra.mrb[80].mxu1 %v11528_v14  ;;  %2292 = vmatmul.mubr.f32.gmra.mrb[84].mxu0 %v11401_v27  ;;  %v9290_v54 = vpack.c.bf16 %v11532_v18, %v11530_v60  ;;  %v11542_v32 = vand.u32 4294901760, %v8734_v6  ;;  %v11543_v60 = vand.u32 4294901760, %v8743_v5  ;;  %v11544_v12 = vand.u32 4294901760, %v8752_v58  ;;  %v11547_v6 = vld [vmem:[#allocation104_spill] sm:$0xff]  ;;  %v11550_v5 = vld [vmem:[#allocation117_spill] sm:$0xff] }
 0x357   : > { %5801 = vmatpush1.bf16.msra.mxu0 %v9281_v4  ;;  %2152 = vmatprep.mubr.f32.mxu1 %v11534_v37  ;;  %v9301_v14 = vpack.c.bf16 %v11538_v43, %v11536_v22  ;;  %v5806_v42 = vpack.c.bf16 %v3624_v52, %v3612_v8  ;;  %v11546_v8 = vand.u32 4294901760, %v11545_v55  ;;  %v11548_v52 = vand.u32 4294901760, %v11547_v6  ;;  %v11552_v58 = vld [vmem:[#allocation121_spill] sm:$0xff] }
 0x358   : > { %11533 = vst [vmem:[#allocation24_spill] sm:$0xff] %v9290_v54  ;;  %2297 = vmatprep.mubr.f32.mxu0 %v11407_v48  ;;  %5803 = vmatprep.subr.bf16.mxu0 %v9290_v54  ;;  %v11551_v18 = vand.u32 4294901760, %v11550_v5  ;;  %v11553_v37 = vand.u32 4294901760, %v11552_v58  ;;  %v11558_v43 = vand.u32 4294901760, %v11557_v34  ;;  %v11566_v55 = vand.u32 4294901760, %v11447_v21 }
 0x359   : > { %11539 = vst [vmem:[#allocation25_spill] sm:$0xff] %v9301_v14  ;;  %v9325_v28 = vpack.c.bf16 %v11548_v52, %v11546_v8  ;;  %v11569_v52 = vld [vmem:[#allocation63_spill] sm:$0xff] }
 0x35a   : > { %2156 = vmatmul.mubr.f32.gmra.mrb[82].mxu1 %v11540_v41  ;;  %2299 = vmatmul.mubr.f32.gmra.mrb[86].mxu0 %v11408_v7  ;;  %v9333_v20 = vpack.c.bf16 %v11553_v37, %v11551_v18  ;;  %v9361_v8 = vsub.f32 %v11447_v21, %v11566_v55  ;;  %v11570_v5 = vand.u32 4294901760, %v11569_v52  ;;  %v11573_v21 = vand.u32 4294901760, %v11451_v59  ;;  %v11585_v55 = vld [vmem:[#allocation105_spill] sm:$0xff] }
 0x35b   : > { %5805 = vmatpush1.bf16.msra.mxu0 %v9301_v14  ;;  %2163 = vmatprep.mubr.f32.mxu1 %v11541_v57  ;;  %11549 = vst [vmem:[#allocation11_spill] sm:$0xff] %v9325_v28  ;;  %v11562_v57 = vld [vmem:[#allocation35_spill] sm:$0xff]  ;;  %v11638_v14 = vld [vmem:[#allocation108_spill] sm:$0xff] }
 0x35c   : > { %2304 = vmatprep.mubr.f32.mxu0 %v11409_v3  ;;  %5807 = vmatprep.subr.bf16.mxu0 %v5806_v42  ;;  %11554 = vst [vmem:[#allocation33_spill] sm:$0xff] %v9333_v20  ;;  %v9381_v37 = vsub.f32 %v11451_v59, %v11573_v21  ;;  %v11579_v59 = vand.u32 4294901760, %v11453_v62  ;;  %v11593_v21 = vld [vmem:[#allocation13_spill] sm:$0xff] }
 0x35e   : > { %2167 = vmatmul.mubr.f32.gmra.mrb[84].mxu1 %v11542_v32  ;;  %2306 = vmatmul.mubr.f32.gmra.mrb[88].mxu0 %v11410_v26  ;;  %v11563_v32 = vand.u32 4294901760, %v11562_v57 }
 0x35f   : > { %2174 = vmatprep.mubr.f32.mxu1 %v11543_v60  ;;  %2311 = vmatprep.mubr.f32.mxu0 %v11411_v38 }
 0x362   : > { %2178 = vmatmul.mubr.f32.gmra.mrb[86].mxu1 %v11544_v12  ;;  %2313 = vmatmul.mubr.f32.gmra.mrb[90].mxu0 %v11412_v39 }
 0x363   : > { %2318 = vmatprep.mubr.f32.mxu0 %v11413_v11  ;;  %2425 = vmatprep.mubr.f32.mxu1 %v8770_v35  ;;  %v11555_v35 = vld [vmem:[#allocation142_spill] sm:$0xff] }
 0x364   : > { %v11556_v22 = vand.u32 4294901760, %v11555_v35 }
 0x366   : > { %2320 = vmatmul.mubr.f32.gmra.mrb[92].mxu0 %v11415_v10  ;;  %2427 = vmatmul.mubr.f32.vlgmr.msra.gmra.mrb[88].mxu1 %v8766_v61  ;;  %v9343_v41 = vpack.c.bf16 %v11558_v43, %v11556_v22  ;;  %v11560_v61 = vld [vmem:[#allocation145_spill] sm:$0xff] }
 0x367   : > { %5969 = vmatpush1.bf16.msra.mxu1 %v9325_v28  ;;  %2325 = vmatprep.mubr.f32.mxu0 %v11417_v53  ;;  %v11561_v42 = vand.u32 4294901760, %v11560_v61  ;;  %v11576_v22 = vld [vmem:[#allocation37_spill] sm:$0xff]  ;;  %v10811_v61 = vand.u32 4294901760, %v9361_v8 }
 0x368   : > { %2432 = vmatprep.mubr.f32.mxu1 %v8829_v13  ;;  %5971 = vmatprep.subr.bf16.mxu1 %v9333_v20  ;;  %11559 = vst [vmem:[#allocation9_spill] sm:$0xff] %v9343_v41  ;;  %v11565_v13 = vand.u32 4294901760, %v11446_v47  ;;  %v11577_v34 = vand.u32 4294901760, %v11576_v22 }
 0x369   : > { %v9351_v60 = vpack.c.bf16 %v11563_v32, %v11561_v42  ;;  %v9398_v42 = vsub.f32 %v11453_v62, %v11579_v59  ;;  %v11583_v32 = vand.u32 4294901760, %v11457_v17  ;;  %v11588_v62 = vld [vmem:[#allocation148_spill] sm:$0xff] }
 0x36a   : > { %2327 = vmatmul.mubr.f32.gmra.mrb[94].mxu0 %v11419_v63  ;;  %2434 = vmatmul.mubr.f32.gmra.mrb[90].mxu1 %v8825_v24  ;;  %v9356_v12 = vsub.f32 %v11446_v47, %v11565_v13  ;;  %v11567_v24 = vld [vmem:[#allocation66_spill] sm:$0xff]  ;;  %v11572_v47 = vand.u32 4294901760, %v11450_v31  ;;  %v11589_v52 = vand.u32 4294901760, %v11588_v62  ;;  %v11600_v62 = vld [vmem:[#allocation71_spill] sm:$0xff] }
 0x36b   : > { %11564 = vst [vmem:[#allocation14_spill] sm:$0xff] %v9351_v60  ;;  %5973 = vmatpush1.bf16.msra.mxu1 %v9343_v41  ;;  %2332 = vmatprep.mubr.f32.mxu0 %v11421_v1  ;;  %v11568_v6 = vand.u32 4294901760, %v11567_v24  ;;  %11580 = vst [vmem:[#allocation41_spill] sm:$0xff] %v9398_v42  ;;  %v9410_v13 = vsub.f32 %v11457_v17, %v11583_v32  ;;  %v11586_v24 = vand.u32 4294901760, %v11585_v55  ;;  %v11629_v41 = vld [vmem:[#allocation106_spill] sm:$0xff] }
 0x36c   : > { %2439 = vmatprep.mubr.f32.mxu1 %v11465_v49  ;;  %5975 = vmatprep.subr.bf16.mxu1 %v9351_v60  ;;  %v9376_v58 = vsub.f32 %v11450_v31, %v11572_v47  ;;  %v11574_v49 = vld [vmem:[#allocation36_spill] sm:$0xff]  ;;  %v10812_v31 = vand.u32 4294901760, %v9356_v12 }
 0x36d   : > { %v9371_v18 = vpack.c.bf16 %v11570_v5, %v11568_v6  ;;  %v11575_v35 = vand.u32 4294901760, %v11574_v49  ;;  %11584 = vst [vmem:[#allocation56_spill] sm:$0xff] %v9410_v13  ;;  %v9415_v6 = vsub.f32 %v11585_v55, %v11586_v24  ;;  %v11590_v5 = vld [vmem:[#allocation67_spill] sm:$0xff] }
 0x36e   : > { %2334 = vmatmul.mubr.f32.gmra.mrb[96].mxu0 %v8647_v9  ;;  %2441 = vmatmul.mubr.f32.gmra.mrb[92].mxu1 %v11474_v44  ;;  %v11581_v44 = vand.u32 4294901760, %v11454_v51  ;;  %v11591_v47 = vand.u32 4294901760, %v11590_v5  ;;  %v3617_v32 = vsub.f32 %v9356_v12, %v10812_v31  ;;  %v11602_v5 = vld [vmem:[#allocation70_spill] sm:$0xff]  ;;  %v11608_v31 = vld [vmem:[#allocation43_spill] sm:$0xff] }
 0x36f   : > { %11571 = vst [vmem:[#allocation49_spill] sm:$0xff] %v9371_v18  ;;  %v9389_v43 = vpack.c.bf16 %v11577_v34, %v11575_v35  ;;  %5977 = vmatpush1.bf16.msra.mxu1 %v9371_v18  ;;  %2339 = vmatprep.mubr.f32.mxu0 %v11424_v15  ;;  %11587 = vst [vmem:[#allocation50_spill] sm:$0xff] %v9415_v6  ;;  %v11596_v35 = vld [vmem:[#allocation40_spill] sm:$0xff]  ;;  %v10813_v34 = vand.u32 4294901760, %v9376_v58  ;;  %v11609_v55 = vand.u32 4294901760, %v11608_v31  ;;  %v11625_v18 = vld [vmem:[#allocation163_spill] sm:$0xff] }
 0x370   : > { %v9403_v57 = vsub.f32 %v11454_v51, %v11581_v44  ;;  %2446 = vmatprep.mubr.f32.mxu1 %v8983_v46  ;;  %v9421_v51 = vpack.c.bf16 %v11591_v47, %v11589_v52  ;;  %v11594_v46 = vld [vmem:[#allocation38_spill] sm:$0xff]  ;;  %v11597_v17 = vand.u32 4294901760, %v11596_v35  ;;  %v11599_v44 = vld [vmem:[#allocation57_spill] sm:$0xff]  ;;  %v11601_v52 = vand.u32 4294901760, %v11600_v62 }
 0x371   : > { %11578 = vst [vmem:[#allocation34_spill] sm:$0xff] %v9389_v43  ;;  %5979 = vmatprep.subr.bf16.mxu1 %v9389_v43  ;;  %v11595_v49 = vand.u32 4294901760, %v11594_v46  ;;  %v11603_v47 = vand.u32 4294901760, %v11602_v5  ;;  %v3635_v62 = vsub.f32 %v9376_v58, %v10813_v34  ;;  %v3618_v35 = vand.u32 4294901760, %v3617_v32  ;;  %v11614_v34 = vld [vmem:[#allocation74_spill] sm:$0xff]  ;;  %v11622_v43 = vld [vmem:[#allocation207_spill] sm:$0xff] }
 0x372   : > { %11582 = vst [vmem:[#allocation81_spill] sm:$0xff] %v9403_v57  ;;  %11592 = vst [vmem:[#allocation51_spill] sm:$0xff] %v9421_v51  ;;  %2341 = vmatmul.mubr.f32.gmra.mrb[98].mxu0 %v11593_v21  ;;  %2448 = vmatmul.mubr.f32.gmra.mrb[94].mxu1 %v8979_v30  ;;  %v3629_v30 = vsub.f32 %v9361_v8, %v10811_v61  ;;  %v10824_v24 = vand.u32 4294901760, %v9403_v57 }
 0x373   : > { %v9429_v22 = vpack.c.bf16 %v11597_v17, %v11595_v49  ;;  %5981 = vmatpush1.bf16.msra.mxu1 %v9421_v51  ;;  %2346 = vmatprep.mubr.f32.mxu0 %v11599_v44  ;;  %v9449_v46 = vpack.c.bf16 %v11603_v47, %v11601_v52  ;;  %v11605_v17 = vld [vmem:[#allocation60_spill] sm:$0xff]  ;;  %v11611_v52 = vand.u32 4294901760, %v9381_v37  ;;  %v11615_v49 = vand.u32 4294901760, %v11614_v34 }
 0x374   : > { %2453 = vmatprep.mubr.f32.mxu1 %v8341_v45  ;;  %v11606_v45 = vld [vmem:[#allocation42_spill] sm:$0xff]  ;;  %v11612_v47 = vld [vmem:[#allocation16_spill] sm:$0xff] }
 0x375   : > { %11598 = vst [vmem:[#allocation89_spill] sm:$0xff] %v9429_v22  ;;  %5983 = vmatprep.subr.bf16.mxu1 %v9429_v22  ;;  %11604 = vst [vmem:[#allocation92_spill] sm:$0xff] %v9449_v46  ;;  %v11607_v61 = vand.u32 4294901760, %v11606_v45  ;;  %v3647_v5 = vsub.f32 %v9381_v37, %v11611_v52  ;;  %v3653_v45 = vsub.f32 %v9403_v57, %v10824_v24  ;;  %v11623_v24 = vld [vmem:[#allocation44_spill] sm:$0xff] }
 0x376   : > { %2348 = vmatmul.mubr.f32.gmra.mrb[100].mxu0 %v11605_v17  ;;  %2455 = vmatmul.mubr.f32.gmra.mrb[96].mxu1 %v8337_v36  ;;  %v3630_v36 = vand.u32 4294901760, %v3629_v30  ;;  %v11624_v34 = vand.u32 4294901760, %v11623_v24  ;;  %v11630_v24 = vand.u32 4294901760, %v11629_v41 }
 0x377   : > { %v9459_v59 = vpack.c.bf16 %v11609_v55, %v11607_v61  ;;  %5985 = vmatpush1.bf16.msra.mxu1 %v9449_v46  ;;  %2353 = vmatprep.mubr.f32.mxu0 %v11612_v47  ;;  %v11613_v61 = vand.u32 4294901760, %v9398_v42  ;;  %v11616_v46 = vld [vmem:[#allocation72_spill] sm:$0xff]  ;;  %v3648_v60 = vand.u32 4294901760, %v3647_v5 }
 0x378   : > { %2460 = vmatprep.mubr.f32.mxu1 %v8361_v56  ;;  %v11617_v22 = vand.u32 4294901760, %v11616_v46  ;;  %v11619_v56 = vand.u32 4294901760, %v9410_v13  ;;  %v11626_v46 = vand.u32 4294901760, %v11625_v18  ;;  %v3665_v18 = vsub.f32 %v11629_v41, %v11630_v24 }
 0x379   : > { %11610 = vst [vmem:[#allocation99_spill] sm:$0xff] %v9459_v59  ;;  %5987 = vmatprep.subr.bf16.mxu1 %v9459_v59  ;;  %v3641_v55 = vsub.f32 %v9398_v42, %v11613_v61  ;;  %v11620_v59 = vand.u32 4294901760, %v9415_v6 }
 0x37a   : > { %v9481_v32 = vpack.c.bf16 %v11617_v22, %v11615_v49  ;;  %v3659_v30 = vsub.f32 %v9410_v13, %v11619_v56  ;;  %2355 = vmatmul.mubr.f32.gmra.mrb[102].mxu0 %v11622_v43  ;;  %2462 = vmatmul.mubr.f32.gmra.mrb[98].mxu1 %v8363_v29  ;;  %v9497_v22 = vpack.c.bf16 %v11626_v46, %v11624_v34  ;;  %v3636_v49 = vand.u32 4294901760, %v3635_v62  ;;  %v11631_v34 = vld [vmem:[#allocation107_spill] sm:$0xff] }
 0x37b   : > { %v3671_v51 = vsub.f32 %v9415_v6, %v11620_v59  ;;  %2467 = vmatprep.mubr.f32.mxu1 %v8387_v2  ;;  %v5808_v56 = vpack.c.bf16 %v3630_v36, %v3618_v35  ;;  %v3654_v29 = vand.u32 4294901760, %v3653_v45  ;;  %v11632_v46 = vand.u32 4294901760, %v11631_v34  ;;  %v11635_v2 = vld [vmem:[#allocation165_spill] sm:$0xff] }
 0x37c   : > { %v5542_v31 = vpop.f32.mrb[8].mxu1  ;;  %11618 = vst [vmem:[#allocation100_spill] sm:$0xff] %v9481_v32  ;;  %11627 = vst [vmem:[#allocation102_spill] sm:$0xff] %v9497_v22  ;;  %5989 = vmatpush1.bf16.msra.mxu1 %v9481_v32  ;;  %v11633_v32 = vld [vmem:[#allocation164_spill] sm:$0xff]  ;;  %v11636_v35 = vand.u32 4294901760, %v11635_v2  ;;  %v5810_v24 = vpack.c.bf16 %v3648_v60, %v3636_v49  ;;  %v11650_v49 = vld [vmem:[#allocation90_spill] sm:$0xff] }
 0x37d   : > { %v5543_v52 = vpop.f32.mrb[9].mxu1  ;;  %5991 = vmatprep.subr.bf16.mxu1 %v9497_v22  ;;  %v3677_v62 = vsub.f32 %v11631_v34, %v11632_v46  ;;  %v11634_v20 = vand.u32 4294901760, %v11633_v32  ;;  %v3660_v22 = vand.u32 4294901760, %v3659_v30  ;;  %v3672_v28 = vand.u32 4294901760, %v3671_v51  ;;  %v11641_v46 = vld [vmem:[#allocation109_spill] sm:$0xff]  ;;  %v11645_v30 = vld [vmem:[#allocation47_spill] sm:$0xff] }
 0x37e   : > { %v9489_v61 = vadd.f32 %v5543_v52, %v5542_v31  ;;  %v11628_v31 = vmov 0.0   ;;  %v3642_v52 = vand.u32 4294901760, %v3641_v55  ;;  %v11639_v55 = vand.u32 4294901760, %v11638_v14  ;;  %2469 = vmatmul.mubr.f32.gmra.mrb[100].mxu1 %v11401_v27 }
 0x37f   : > { %3601 = vmatprep.mubr.f32.mxu0 %v11628_v31  ;;  %v9513_v36 = vpack.c.bf16 %v11636_v35, %v11634_v20  ;;  %v11642_v54 = vand.u32 4294901760, %v11641_v46  ;;  %v11643_v20 = vld [vmem:[#allocation166_spill] sm:$0xff]  ;;  %v11646_v2 = vand.u32 4294901760, %v11645_v30  ;;  %2474 = vmatprep.mubr.f32.mxu1 %v11407_v48 }
 0x380   : > { %11621 = vst [vmem:[#allocation101_spill] sm:$0xff] %v9489_v61  ;;  %v5545_v59 = vpop.f32.mrb[10].mxu1  ;;  %v3683_v45 = vsub.f32 %v11638_v14, %v11639_v55  ;;  %3602 = vmatmul.mubr.f32.vlgmr.msra.gmra.mrb[104].mxu0 %v11628_v31  ;;  %v11644_v51 = vand.u32 4294901760, %v11643_v20  ;;  %v11651_v55 = vand.u32 4294901760, %v11650_v49  ;;  %v11662_v49 = vld [vmem:[#allocation131_spill] sm:$0xff] }
 0x381   : > { %v5546_v5 = vpop.f32.mrb[11].mxu1  ;;  %11637 = vst [vmem:[#allocation103_spill] sm:$0xff] %v9513_v36  ;;  %v3695_v32 = vsub.f32 %v11641_v46, %v11642_v54  ;;  %5809 = vmatpush1.bf16.msra.mxu0 %v5808_v56  ;;  %5993 = vmatpush1.bf16.msra.mxu1 %v9513_v36  ;;  %v3666_v54 = vand.u32 4294901760, %v3665_v18  ;;  %v3678_v56 = vand.u32 4294901760, %v3677_v62  ;;  %v5814_v36 = vpack.c.bf16 %v3672_v28, %v3660_v22  ;;  %v11658_v62 = vld [vmem:[#allocation129_spill] sm:$0xff]  ;;  %v11660_v22 = vld [vmem:[#allocation130_spill] sm:$0xff] }
 0x382   : > { %v9518_v61 = vadd.f32 %v5546_v5, %v5545_v59  ;;  %v9530_v35 = vpack.c.bf16 %v11646_v2, %v11644_v51  ;;  %5811 = vmatprep.subr.bf16.mxu0 %v5810_v24  ;;  %v5812_v59 = vpack.c.bf16 %v3654_v29, %v3642_v52  ;;  %v11648_v5 = vld [vmem:[#allocation168_spill] sm:$0xff]  ;;  %v3684_v30 = vand.u32 4294901760, %v3683_v45  ;;  %v11653_v51 = vld [vmem:[#allocation126_spill] sm:$0xff]  ;;  %v11655_v24 = vld [vmem:[#allocation127_spill] sm:$0xff]  ;;  %3832 = vmatprep.mubr.f32.mxu0 %v11628_v31 }
 0x383   : > { %v11649_v60 = vand.u32 4294901760, %v11648_v5  ;;  %v11654_v2 = vand.u32 4294901760, %v11653_v51  ;;  %v11656_v4 = vand.u32 4294901760, %v11655_v24  ;;  %2476 = vmatmul.mubr.f32.gmra.mrb[102].mxu1 %v11408_v7  ;;  %v3696_v18 = vand.u32 4294901760, %v3695_v32  ;;  %v11664_v32 = vld [vmem:[#allocation133_spill] sm:$0xff] }
 0x384   : > { %11640 = vst [vmem:[#allocation15_spill] sm:$0xff] %v9518_v61  ;;  %11647 = vst [vmem:[#allocation94_spill] sm:$0xff] %v9530_v35  ;;  %v5548_v27 = vpop.f32.mrb[12].mxu1  ;;  %5995 = vmatprep.subr.bf16.mxu1 %v9530_v35  ;;  %v11659_v5 = vand.u32 4294901760, %v11658_v62  ;;  %v11661_v45 = vand.u32 4294901760, %v11660_v22  ;;  %2481 = vmatprep.mubr.f32.mxu1 %v11409_v3 }
 0x385   : > { %v9537_v61 = vpack.c.bf16 %v11651_v55, %v11649_v60  ;;  %v5549_v20 = vpop.f32.mrb[13].mxu1  ;;  %v3689_v48 = vsub.f32 %v11653_v51, %v11654_v2  ;;  %v3701_v52 = vsub.f32 %v11655_v24, %v11656_v4  ;;  %5813 = vmatpush1.bf16.msra.mxu0 %v5812_v59  ;;  %v11663_v55 = vand.u32 4294901760, %v11662_v49 }
 0x386   : > { %v9547_v29 = vadd.f32 %v5549_v20, %v5548_v27  ;;  %v3707_v28 = vsub.f32 %v11658_v62, %v11659_v5  ;;  %v3719_v60 = vsub.f32 %v11660_v22, %v11661_v45  ;;  %5815 = vmatprep.subr.bf16.mxu0 %v5814_v36  ;;  %v5816_v27 = vpack.c.bf16 %v3678_v56, %v3666_v54  ;;  %v11666_v5 = vld [vmem:[#allocation93_spill] sm:$0xff]  ;;  %v11669_v36 = vld [vmem:[#allocation135_spill] sm:$0xff] }
 0x387   : > { %11652 = vst [vmem:[#allocation95_spill] sm:$0xff] %v9537_v61  ;;  %5997 = vmatpush1.bf16.msra.mxu1 %v9537_v61  ;;  %v3713_v7 = vsub.f32 %v11662_v49, %v11663_v55  ;;  %v11665_v20 = vand.u32 4294901760, %v11664_v32  ;;  %v3690_v45 = vand.u32 4294901760, %v3689_v48  ;;  %v3702_v59 = vand.u32 4294901760, %v3701_v52 }
 0x388   : > { %11657 = vst [vmem:[#allocation75_spill] sm:$0xff] %v9547_v29  ;;  %v5551_v4 = vpop.f32.mrb[14].mxu1  ;;  %5999 = vmatprep.subr.bf16.mxu1 %v11666_v5  ;;  %v11667_v29 = vld [vmem:[#allocation134_spill] sm:$0xff]  ;;  %v11670_v33 = vand.u32 4294901760, %v11669_v36  ;;  %2483 = vmatmul.mubr.f32.gmra.mrb[104].mxu1 %v11410_v26  ;;  %v5818_v55 = vpack.c.bf16 %v3696_v18, %v3684_v30  ;;  %v3708_v50 = vand.u32 4294901760, %v3707_v28  ;;  %v11676_v28 = vld [vmem:[#allocation147_spill] sm:$0xff] }
 0x389   : > { %v3725_v2 = vsub.f32 %v11664_v32, %v11665_v20  ;;  %v5552_v35 = vpop.f32.mrb[15].mxu1  ;;  %v11668_v61 = vand.u32 4294901760, %v11667_v29  ;;  %v3720_v20 = vand.u32 4294901760, %v3719_v60  ;;  %5817 = vmatpush1.bf16.msra.mxu0 %v5816_v27  ;;  %2488 = vmatprep.mubr.f32.mxu1 %v11411_v38  ;;  %v3714_v52 = vand.u32 4294901760, %v3713_v7 }
 0x38a   : > { %v3743_v54 = vsub.f32 %v11669_v36, %v11670_v33  ;;  %v9571_v56 = vadd.f32 %v5552_v35, %v5551_v4  ;;  %5819 = vmatprep.subr.bf16.mxu0 %v5818_v55  ;;  %v11675_v33 = vand.u32 4294901760, %v11674_v40  ;;  %v5820_v26 = vpack.c.bf16 %v3702_v59, %v3690_v45 }
 0x38b   : > { %v3731_v3 = vsub.f32 %v11667_v29, %v11668_v61  ;;  %v3726_v5 = vand.u32 4294901760, %v3725_v2  ;;  %v11673_v61 = vand.u32 4294901760, %v11672_v25  ;;  %v11677_v60 = vand.u32 4294901760, %v11676_v28  ;;  %v11679_v2 = vld [vmem:[#allocation149_spill] sm:$0xff] }
 0x38c   : > { %11671 = vst [vmem:[#allocation96_spill] sm:$0xff] %v9571_v56  ;;  %v5554_v48 = vpop.f32.mrb[16].mxu1  ;;  %v3749_v35 = vsub.f32 %v11674_v40, %v11675_v33  ;;  %v3744_v18 = vand.u32 4294901760, %v3743_v54  ;;  %2490 = vmatmul.mubr.f32.gmra.mrb[106].mxu1 %v11412_v39  ;;  %v5822_v7 = vpack.c.bf16 %v3720_v20, %v3708_v50  ;;  %v11680_v55 = vand.u32 4294901760, %v11679_v2  ;;  %v11683_v50 = vld [vmem:[#allocation151_spill] sm:$0xff] }
 0x38d   : > { %v3737_v19 = vsub.f32 %v11672_v25, %v11673_v61  ;;  %v5555_v4 = vpop.f32.mrb[17].mxu1  ;;  %v3732_v30 = vand.u32 4294901760, %v3731_v3  ;;  %v3755_v38 = vsub.f32 %v11676_v28, %v11677_v60  ;;  %5821 = vmatpush1.bf16.msra.mxu0 %v5820_v26  ;;  %2495 = vmatprep.mubr.f32.mxu1 %v11413_v11  ;;  %v5824_v59 = vpack.c.bf16 %v3726_v5, %v3714_v52  ;;  %v11686_v26 = vld [vmem:[#allocation152_spill] sm:$0xff]  ;;  %v11688_v5 = vld [vmem:[#allocation110_spill] sm:$0xff] }
 0x38e   : > { %v9584_v27 = vadd.f32 %v5555_v4, %v5554_v48  ;;  %v3767_v61 = vsub.f32 %v11679_v2, %v11680_v55  ;;  %5823 = vmatprep.subr.bf16.mxu0 %v5822_v7  ;;  %v3750_v54 = vand.u32 4294901760, %v3749_v35  ;;  %v11681_v48 = vld [vmem:[#allocation150_spill] sm:$0xff]  ;;  %v11684_v20 = vand.u32 4294901760, %v11683_v50 }
 0x38f   : > { %v3738_v3 = vand.u32 4294901760, %v3737_v19  ;;  %v5826_v56 = vpack.c.bf16 %v3744_v18, %v3732_v30  ;;  %v3756_v60 = vand.u32 4294901760, %v3755_v38  ;;  %v11682_v4 = vand.u32 4294901760, %v11681_v48 }
 0x390   : > { %11678 = vst [vmem:[#allocation97_spill] sm:$0xff] %v9584_v27  ;;  %v5557_v45 = vpop.f32.mrb[18].mxu1  ;;  %v3773_v27 = vsub.f32 %v11683_v50, %v11684_v20  ;;  %2497 = vmatmul.mubr.f32.gmra.mrb[108].mxu1 %v11415_v10  ;;  %v3768_v11 = vand.u32 4294901760, %v3767_v61  ;;  %v11687_v52 = vand.u32 4294901760, %v11686_v26  ;;  %v11689_v35 = vand.u32 4294901760, %v11688_v5  ;;  %v11692_v20 = vld [vmem:[#allocation111_spill] sm:$0xff] }
 0x391   : > { %v5558_v33 = vpop.f32.mrb[19].mxu1  ;;  %v3761_v39 = vsub.f32 %v11681_v48, %v11682_v4  ;;  %5825 = vmatpush1.bf16.msra.mxu0 %v5824_v59  ;;  %2502 = vmatprep.mubr.f32.mxu1 %v11417_v53  ;;  %v5828_v38 = vpack.c.bf16 %v3750_v54, %v3738_v3  ;;  %v11690_v4 = vld [vmem:[#allocation154_spill] sm:$0xff] }
 0x392   : > { %v9597_v55 = vadd.f32 %v5558_v33, %v5557_v45  ;;  %v3779_v19 = vsub.f32 %v11686_v26, %v11687_v52  ;;  %v3791_v30 = vsub.f32 %v11688_v5, %v11689_v35  ;;  %5827 = vmatprep.subr.bf16.mxu0 %v5826_v56  ;;  %v3774_v33 = vand.u32 4294901760, %v3773_v27 }
 0x393   : > { %v3762_v45 = vand.u32 4294901760, %v3761_v39  ;;  %v11691_v10 = vand.u32 4294901760, %v11690_v4  ;;  %v5830_v59 = vpack.c.bf16 %v3768_v11, %v3756_v60 }
 0x394   : > { %11685 = vst [vmem:[#allocation112_spill] sm:$0xff] %v9597_v55  ;;  %v11693_v55 = vand.u32 4294901760, %v11692_v20  ;;  %2504 = vmatmul.mubr.f32.gmra.mrb[110].mxu1 %v11419_v63  ;;  %v3780_v53 = vand.u32 4294901760, %v3779_v19  ;;  %v3792_v56 = vand.u32 4294901760, %v3791_v30  ;;  %v5838_v30 = vpack.c.bf16 %v11507_v23, %v11500_v16 }
 0x395   : > { %v3785_v61 = vsub.f32 %v11690_v4, %v11691_v10  ;;  %5829 = vmatpush1.bf16.msra.mxu0 %v5828_v38  ;;  %2509 = vmatprep.mubr.f32.mxu1 %v11421_v1  ;;  %v5832_v35 = vpack.c.bf16 %v3774_v33, %v3762_v45 }
 0x396   : > { %v5560_v18 = vpop.f32.mrb[20].mxu1  ;;  %v3797_v52 = vsub.f32 %v11692_v20, %v11693_v55  ;;  %5831 = vmatprep.subr.bf16.mxu0 %v5830_v59  ;;  %v5834_v63 = vpack.c.bf16 %v3792_v56, %v3780_v53  ;;  %v11702_v59 = vld [vmem:[#allocation139_spill] sm:$0xff] }
 0x397   : > { %v5561_v7 = vpop.f32.mrb[21].mxu1  ;;  %v3786_v10 = vand.u32 4294901760, %v3785_v61  ;;  %v11703_v53 = vand.u32 4294901760, %v11702_v59 }
 0x398   : > { %v9613_v0 = vadd.f32 %v5561_v7, %v5560_v18  ;;  %v3798_v4 = vand.u32 4294901760, %v3797_v52  ;;  %2511 = vmatmul.mubr.f32.gmra.mrb[112].mxu1 %v8647_v9  ;;  %v5840_v9 = vpack.c.bf16 %v9361_v8, %v9356_v12  ;;  %v11696_v18 = vld [vmem:[#allocation124_spill] sm:$0xff] }
 0x399   : > { %5833 = vmatpush1.bf16.msra.mxu0 %v5832_v35  ;;  %2516 = vmatprep.mubr.f32.mxu1 %v11424_v15  ;;  %v11697_v15 = vand.u32 4294901760, %v11696_v18  ;;  %v4521_v56 = vsub.f32 %v11702_v59, %v11703_v53  ;;  %v11706_v35 = vld [vmem:[#allocation155_spill] sm:$0xff] }
 0x39a   : > { %11694 = vst [vmem:[#allocation113_spill] sm:$0xff] %v9613_v0  ;;  %v5563_v3 = vpop.f32.mrb[22].mxu1  ;;  %5835 = vmatprep.subr.bf16.mxu0 %v5834_v63  ;;  %v5836_v19 = vpack.c.bf16 %v3798_v4, %v3786_v10  ;;  %v11700_v4 = vld [vmem:[#allocation136_spill] sm:$0xff]  ;;  %v11707_v10 = vand.u32 4294901760, %v11706_v35 }
 0x39b   : > { %v5564_v39 = vpop.f32.mrb[23].mxu1  ;;  %v4491_v38 = vsub.f32 %v11696_v18, %v11697_v15  ;;  %v11701_v61 = vand.u32 4294901760, %v11700_v4 }
 0x39c   : > { %v9617_v55 = vadd.f32 %v5564_v39, %v5563_v3  ;;  %2518 = vmatmul.mubr.f32.gmra.mrb[114].mxu1 %v11593_v21  ;;  %v10863_v21 = vmov 1.0   ;;  %v11704_v3 = vld [vmem:[#allocation153_spill] sm:$0xff]  ;;  %v4527_v63 = vsub.f32 %v11706_v35, %v11707_v10 }
 0x39d   : > { %5837 = vmatpush1.bf16.msra.mxu0 %v5836_v19  ;;  %2523 = vmatprep.mubr.f32.mxu1 %v11599_v44  ;;  %v5842_v44 = vpack.c.bf16 %v9381_v37, %v9376_v58  ;;  %v4509_v52 = vsub.f32 %v11700_v4, %v11701_v61  ;;  %v11708_v19 = vld [vmem:[#allocation156_spill] sm:$0xff]  ;;  %v5846_v61 = vpack.c.bf16 %v9415_v6, %v9410_v13 }
 0x39e   : > { %v5518_v27 = vpop.f32.mrb[32].mxu0  ;;  %11695 = vst [vmem:[#allocation114_spill] sm:$0xff] %v9617_v55  ;;  %v1624_v60 = vpop.f32.mrb[24].mxu1  ;;  %5839 = vmatprep.subr.bf16.mxu0 %v5838_v30  ;;  %v11709_v30 = vand.u32 4294901760, %v11708_v19 }
 0x39f   : > { %v5519_v54 = vpop.f32.mrb[33].mxu0  ;;  %v1626_v11 = vpop.f32.mrb[25].mxu1  ;;  %v4510_v53 = vand.u32 4294901760, %v4509_v52 }
 0x3a0   : > { %v5520_v5 = vadd.f32 %v5519_v54, %v5518_v27  ;;  %2525 = vmatmul.mubr.f32.gmra.mrb[116].mxu1 %v11605_v17  ;;  %3833 = vmatmul.mubr.f32.vlgmr.msra.gmra.mrb[104].mxu0 %v10863_v21  ;;  %v5844_v17 = vpack.c.bf16 %v9403_v57, %v9398_v42  ;;  %v11705_v54 = vand.u32 4294901760, %v11704_v3  ;;  %v4528_v21 = vand.u32 4294901760, %v4527_v63 }
 0x3a1   : > { %5841 = vmatpush1.bf16.msra.mxu0 %v5840_v9  ;;  %2530 = vmatprep.mubr.f32.mxu1 %v11612_v47  ;;  %v4533_v47 = vsub.f32 %v11708_v19, %v11709_v30  ;;  %v11710_v9 = vld [vmem:[#allocation157_spill] sm:$0xff]  ;;  %v5848_v30 = vpack.c.bf16 %v11631_v34, %v11629_v41 }
 0x3a2   : > { %v9621_v1 = vadd.f32 %v5520_v5, %v1624_v60  ;;  %v11698_v5 = vld [vmem:[#allocation125_spill] sm:$0xff]  ;;  %5843 = vmatprep.subr.bf16.mxu0 %v5842_v44  ;;  %v4515_v39 = vsub.f32 %v11704_v3, %v11705_v54  ;;  %3967 = vmatprep.mubr.f32.mxu0 %v11628_v31  ;;  %v4492_v60 = vand.u32 4294901760, %v4491_v38  ;;  %v11711_v15 = vand.u32 4294901760, %v11710_v9  ;;  %v11712_v38 = vld [vmem:[#allocation158_spill] sm:$0xff] }
 0x3a3   : > { %v11699_v7 = vand.u32 4294901760, %v11698_v5  ;;  %v11718_v34 = vld [vmem:[#allocation161_spill] sm:$0xff] }
 0x3a4   : > { %2532 = vmatmul.mubr.f32.gmra.mrb[118].mxu1 %v11622_v43  ;;  %v11714_v43 = vld [vmem:[#allocation159_spill] sm:$0xff] }
 0x3a5   : > { %v4503_v45 = vsub.f32 %v11698_v5, %v11699_v7  ;;  %v1631_v33 = vpop.f32.mrb[26].mxu1  ;;  %v4545_v7 = vsub.f32 %v11710_v9, %v11711_v15  ;;  %5845 = vmatpush1.bf16.msra.mxu0 %v5844_v17  ;;  %4475 = vmatprep.mubr.f32.mxu1 %v11628_v31  ;;  %v4516_v15 = vand.u32 4294901760, %v4515_v39  ;;  %v11715_v55 = vand.u32 4294901760, %v11714_v43 }
 0x3a6   : > { %v1633_v27 = vpop.f32.mrb[27].mxu1  ;;  %5847 = vmatprep.subr.bf16.mxu0 %v5846_v61  ;;  %v5850_v61 = vpack.c.bf16 %v11641_v46, %v11638_v14  ;;  %v11719_v39 = vand.u32 4294901760, %v11718_v34  ;;  %v11722_v46 = vld [vmem:[#allocation167_spill] sm:$0xff] }
 0x3a7   : > { %v4504_v11 = vand.u32 4294901760, %v4503_v45  ;;  %v4522_v27 = vand.u32 4294901760, %v4521_v56  ;;  %v11713_v45 = vand.u32 4294901760, %v11712_v38  ;;  %v4551_v0 = vsub.f32 %v11714_v43, %v11715_v55 }
 0x3a8   : > { %v4534_v56 = vand.u32 4294901760, %v4533_v47  ;;  %v4546_v17 = vand.u32 4294901760, %v4545_v7  ;;  %4476 = vmatmul.mubr.f32.vlgmr.msra.gmra.mrb[120].mxu1 %v11628_v31  ;;  %v4569_v63 = vsub.f32 %v11718_v34, %v11719_v39  ;;  %v11720_v7 = vld [vmem:[#allocation162_spill] sm:$0xff]  ;;  %v6004_v39 = vpack.c.bf16 %v4528_v21, %v4516_v15 }
 0x3a9   : > { %v1638_v44 = vpop.f32.mrb[28].mxu1  ;;  %v4539_v10 = vsub.f32 %v11712_v38, %v11713_v45  ;;  %v6000_v52 = vpack.c.bf16 %v4504_v11, %v4492_v60  ;;  %v6002_v41 = vpack.c.bf16 %v4522_v27, %v4510_v53  ;;  %5849 = vmatpush1.bf16.msra.mxu0 %v5848_v30  ;;  %v5852_v60 = vpack.c.bf16 %v11655_v24, %v11653_v51  ;;  %v11724_v24 = vld [vmem:[#allocation169_spill] sm:$0xff] }
 0x3aa   : > { %v1640_v54 = vpop.f32.mrb[29].mxu1  ;;  %5851 = vmatprep.subr.bf16.mxu0 %v5850_v61  ;;  %v11721_v45 = vand.u32 4294901760, %v11720_v7  ;;  %v11723_v53 = vand.u32 4294901760, %v11722_v46  ;;  %v5854_v30 = vpack.c.bf16 %v11660_v22, %v11658_v62  ;;  %4706 = vmatprep.mubr.f32.mxu1 %v11628_v31  ;;  %v4570_v51 = vand.u32 4294901760, %v4569_v63  ;;  %v11726_v61 = vld [vmem:[#allocation170_spill] sm:$0xff]  ;;  %v11728_v63 = vld [vmem:[#allocation171_spill] sm:$0xff] }
 0x3ab   : > { %v11716_v54 = vld [vmem:[#allocation160_spill] sm:$0xff]  ;;  %6001 = vmatpush1.bf16.msra.mxu1 %v6000_v52  ;;  %v4540_v11 = vand.u32 4294901760, %v4539_v10  ;;  %v6006_v52 = vpack.c.bf16 %v4546_v17, %v4534_v56  ;;  %v5858_v62 = vpack.c.bf16 %v11669_v36, %v11667_v29 }
 0x3ac   : > { %v11717_v6 = vand.u32 4294901760, %v11716_v54  ;;  %6003 = vmatprep.subr.bf16.mxu1 %v6002_v41  ;;  %v4563_v14 = vsub.f32 %v11720_v7, %v11721_v45  ;;  %v4575_v27 = vsub.f32 %v11722_v46, %v11723_v53  ;;  %v11727_v41 = vand.u32 4294901760, %v11726_v61 }
 0x3ad   : > { %v5521_v57 = vpop.f32.mrb[34].mxu0  ;;  %5853 = vmatpush1.bf16.msra.mxu0 %v5852_v60  ;;  %v11729_v53 = vand.u32 4294901760, %v11728_v63 }
 0x3ae   : > { %v4557_v13 = vsub.f32 %v11716_v54, %v11717_v6  ;;  %v5522_v55 = vpop.f32.mrb[35].mxu0  ;;  %v4552_v6 = vand.u32 4294901760, %v4551_v0  ;;  %v11725_v0 = vand.u32 4294901760, %v11724_v24  ;;  %5855 = vmatprep.subr.bf16.mxu0 %v5854_v30  ;;  %v4564_v56 = vand.u32 4294901760, %v4563_v14 }
 0x3af   : > { %v5523_v47 = vadd.f32 %v5522_v55, %v5521_v57  ;;  %v4593_v55 = vsub.f32 %v11726_v61, %v11727_v41  ;;  %6005 = vmatpush1.bf16.msra.mxu1 %v6004_v39  ;;  %v4576_v17 = vand.u32 4294901760, %v4575_v27  ;;  %v5860_v27 = vpack.c.bf16 %v11674_v40, %v11672_v25  ;;  %v11740_v40 = vld [vmem:[#allocation177_spill] sm:$0xff] }
 0x3b0   : > { %v4558_v42 = vand.u32 4294901760, %v4557_v13  ;;  %v4581_v10 = vsub.f32 %v11724_v24, %v11725_v0  ;;  %v5856_v13 = vpack.c.bf16 %v11664_v32, %v11662_v49  ;;  %6007 = vmatprep.subr.bf16.mxu1 %v6006_v52  ;;  %v6008_v15 = vpack.c.bf16 %v4552_v6, %v4540_v11  ;;  %v11732_v0 = vld [vmem:[#allocation173_spill] sm:$0xff]  ;;  %v11734_v32 = vld [vmem:[#allocation174_spill] sm:$0xff] }
 0x3b1   : > { %v5524_v57 = vpop.f32.mrb[36].mxu0  ;;  %v9699_v45 = vadd.f32 %v5523_v47, %v1631_v33  ;;  %v4587_v33 = vsub.f32 %v11728_v63, %v11729_v53  ;;  %v11730_v47 = vld [vmem:[#allocation172_spill] sm:$0xff]  ;;  %v11733_v41 = vand.u32 4294901760, %v11732_v0  ;;  %v11735_v29 = vand.u32 4294901760, %v11734_v32 }
 0x3b2   : > { %v5525_v21 = vpop.f32.mrb[37].mxu0  ;;  %v11731_v60 = vand.u32 4294901760, %v11730_v47  ;;  %v6010_v30 = vpack.c.bf16 %v4570_v51, %v4558_v42  ;;  %v4582_v11 = vand.u32 4294901760, %v4581_v10  ;;  %v4594_v6 = vand.u32 4294901760, %v4593_v55  ;;  %5857 = vmatpush1.bf16.msra.mxu0 %v5856_v13 }
 0x3b3   : > { %v5526_v22 = vadd.f32 %v5525_v21, %v5524_v57  ;;  %v4605_v49 = vsub.f32 %v11732_v0, %v11733_v41  ;;  %v4617_v36 = vsub.f32 %v11734_v32, %v11735_v29  ;;  %6009 = vmatpush1.bf16.msra.mxu1 %v6008_v15  ;;  %5859 = vmatprep.subr.bf16.mxu0 %v5858_v62  ;;  %v11736_v57 = vld [vmem:[#allocation175_spill] sm:$0xff]  ;;  %v4588_v51 = vand.u32 4294901760, %v4587_v33  ;;  %v11742_v15 = vld [vmem:[#allocation178_spill] sm:$0xff] }
 0x3b4   : > { %v4599_v39 = vsub.f32 %v11730_v47, %v11731_v60  ;;  %6011 = vmatprep.subr.bf16.mxu1 %v6010_v30  ;;  %v6012_v52 = vpack.c.bf16 %v4576_v17, %v4564_v56  ;;  %v11737_v21 = vand.u32 4294901760, %v11736_v57  ;;  %v11738_v60 = vld [vmem:[#allocation176_spill] sm:$0xff]  ;;  %v5862_v13 = vpack.c.bf16 %v11679_v2, %v11676_v28  ;;  %v11745_v30 = vld [vmem:[#allocation179_spill] sm:$0xff] }
 0x3b5   : > { %v9717_v14 = vadd.f32 %v5526_v22, %v1638_v44  ;;  %v11739_v41 = vand.u32 4294901760, %v11738_v60  ;;  %v4606_v44 = vand.u32 4294901760, %v4605_v49  ;;  %v4618_v55 = vand.u32 4294901760, %v4617_v36 }
 0x3b6   : > { %v4611_v53 = vsub.f32 %v11736_v57, %v11737_v21  ;;  %v4600_v10 = vand.u32 4294901760, %v4599_v39  ;;  %v6014_v22 = vpack.c.bf16 %v4594_v6, %v4582_v11  ;;  %v11741_v25 = vand.u32 4294901760, %v11740_v40  ;;  %5861 = vmatpush1.bf16.msra.mxu0 %v5860_v27  ;;  %v11744_v39 = vld [vmem:[#allocation110_spill] sm:$0xff]  ;;  %v11747_v21 = vld [vmem:[#allocation180_spill] sm:$0xff] }
 0x3b7   : > { %v4623_v42 = vsub.f32 %v11738_v60, %v11739_v41  ;;  %v11743_v56 = vand.u32 4294901760, %v11742_v15  ;;  %6013 = vmatpush1.bf16.msra.mxu1 %v6012_v52  ;;  %5863 = vmatprep.subr.bf16.mxu0 %v5862_v13  ;;  %v5864_v33 = vpack.c.bf16 %v11683_v50, %v11681_v48  ;;  %v5866_v49 = vpack.c.bf16 %v11744_v39, %v11686_v26  ;;  %v11751_v50 = vld [vmem:[#allocation182_spill] sm:$0xff]  ;;  %v11756_v39 = vld [vmem:[#allocation183_spill] sm:$0xff] }
 0x3b8   : > { %v4629_v62 = vsub.f32 %v11740_v40, %v11741_v25  ;;  %6015 = vmatprep.subr.bf16.mxu1 %v6014_v22  ;;  %v4612_v28 = vand.u32 4294901760, %v4611_v53  ;;  %v6016_v29 = vpack.c.bf16 %v4600_v10, %v4588_v51  ;;  %v6018_v36 = vpack.c.bf16 %v4618_v55, %v4606_v44  ;;  %v11749_v22 = vld [vmem:[#allocation181_spill] sm:$0xff] }
 0x3b9   : > { %v4641_v17 = vsub.f32 %v11742_v15, %v11743_v56  ;;  %v4624_v2 = vand.u32 4294901760, %v4623_v42  ;;  %v11746_v11 = vand.u32 4294901760, %v11745_v30  ;;  %v11748_v41 = vand.u32 4294901760, %v11747_v21  ;;  %v11753_v42 = vld [vmem:[#allocation154_spill] sm:$0xff] }
 0x3ba   : > { %v4630_v52 = vand.u32 4294901760, %v4629_v62  ;;  %v11750_v25 = vand.u32 4294901760, %v11749_v22  ;;  %v11752_v26 = vand.u32 4294901760, %v11751_v50  ;;  %5865 = vmatpush1.bf16.msra.mxu0 %v5864_v33  ;;  %v5868_v51 = vpack.c.bf16 %v11692_v20, %v11753_v42  ;;  %v11754_v62 = vld [vmem:[#allocation31_spill] sm:$0xff] }
 0x3bb   : > { %v4635_v6 = vsub.f32 %v11745_v30, %v11746_v11  ;;  %v4647_v27 = vsub.f32 %v11747_v21, %v11748_v41  ;;  %v4642_v13 = vand.u32 4294901760, %v4641_v17  ;;  %6017 = vmatpush1.bf16.msra.mxu1 %v6016_v29  ;;  %5867 = vmatprep.subr.bf16.mxu0 %v5866_v49  ;;  %v6020_v10 = vpack.c.bf16 %v4624_v2, %v4612_v28  ;;  %v11758_v49 = vld [vmem:[#allocation23_spill] sm:$0xff] }
 0x3bc   : > { %v4653_v48 = vsub.f32 %v11749_v22, %v11750_v25  ;;  %v4665_v53 = vsub.f32 %v11751_v50, %v11752_v26  ;;  %6019 = vmatprep.subr.bf16.mxu1 %v6018_v36  ;;  %v11755_v56 = vand.u32 4294901760, %v11754_v62  ;;  %v11757_v11 = vand.u32 4294901760, %v11756_v39  ;;  %v11759_v36 = vld [vmem:[#allocation64_spill] sm:$0xff] }
 0x3bd   : > { %v4636_v44 = vand.u32 4294901760, %v4635_v6  ;;  %v4648_v55 = vand.u32 4294901760, %v4647_v27  ;;  %v6022_v25 = vpack.c.bf16 %v4642_v13, %v4630_v52  ;;  %v11760_v6 = vld [vmem:[#allocation65_spill] sm:$0xff]  ;;  %v11761_v52 = vld [vmem:[#allocation26_spill] sm:$0xff]  ;;  %v11762_v13 = vld [vmem:[#allocation27_spill] sm:$0xff] }
 0x3be   : > { %v4659_v17 = vsub.f32 %v11754_v62, %v11755_v56  ;;  %v4671_v41 = vsub.f32 %v11756_v39, %v11757_v11  ;;  %v4654_v26 = vand.u32 4294901760, %v4653_v48  ;;  %v4666_v33 = vand.u32 4294901760, %v4665_v53  ;;  %5869 = vmatpush1.bf16.msra.mxu0 %v5868_v51  ;;  %v11763_v48 = vld [vmem:[#allocation87_spill] sm:$0xff]  ;;  %v11764_v53 = vld [vmem:[#allocation85_spill] sm:$0xff] }
 0x3bf   : > { %6021 = vmatpush1.bf16.msra.mxu1 %v6020_v10  ;;  %5871 = vmatprep.subr.bf16.mxu0 %v11758_v49  ;;  %v6024_v20 = vpack.c.bf16 %v4648_v55, %v4636_v44  ;;  %v11765_v42 = vpack.c.bf16 %v11763_v48, %v11764_v53  ;;  %v6032_v10 = vpack.c.bf16 %v11698_v5, %v11696_v18  ;;  %v11766_v55 = vmov 1.0   ;;  %v11768_v11 = vld [vmem:[#allocation39_spill] sm:$0xff] }
 0x3c0   : > { %6023 = vmatprep.subr.bf16.mxu1 %v6022_v25  ;;  %v4660_v28 = vand.u32 4294901760, %v4659_v17  ;;  %v4672_v2 = vand.u32 4294901760, %v4671_v41  ;;  %v6026_v29 = vpack.c.bf16 %v4666_v33, %v4654_v26  ;;  %v6034_v56 = vpack.c.bf16 %v11702_v59, %v11700_v4  ;;  %v11767_v17 = vld [vmem:[#allocation83_spill] sm:$0xff]  ;;  %v11769_v26 = vld [vmem:[#allocation48_spill] sm:$0xff] }
 0x3c1   : > { %3968 = vmatmul.mubr.f32.vlgmr.msra.gmra.mrb[104].mxu0 %v11628_v31  ;;  %v6036_v25 = vpack.c.bf16 %v11706_v35, %v11704_v3  ;;  %v6038_v33 = vpack.c.bf16 %v11710_v9, %v11708_v19  ;;  %v11770_v4 = vld [vmem:[#allocation55_spill] sm:$0xff]  ;;  %v11771_v59 = vld [vmem:[#allocation20_spill] sm:$0xff]  ;;  %v6040_v3 = vpack.c.bf16 %v11714_v43, %v11712_v38  ;;  %v6044_v38 = vpack.c.bf16 %v11722_v46, %v11720_v7 }
 0x3c2   : > { %5873 = vmatpush1.bf16.msra.mxu0 %v11759_v36  ;;  %v6028_v27 = vpack.c.bf16 %v4672_v2, %v4660_v28  ;;  %4070 = vmatprep.mubr.f32.mxu0 %v11628_v31  ;;  %v11772_v35 = vld [vmem:[#allocation32_spill] sm:$0xff]  ;;  %v11773_v9 = vld [vmem:[#allocation7_spill] sm:$0xff]  ;;  %v6048_v46 = vpack.c.bf16 %v11730_v47, %v11728_v63  ;;  %v6052_v63 = vpack.c.bf16 %v11738_v60, %v11736_v57  ;;  %v11781_v47 = vld [vmem:[#allocation101_spill] sm:$0xff] }
 0x3c3   : > { %6025 = vmatpush1.bf16.msra.mxu1 %v6024_v20  ;;  %5875 = vmatprep.subr.bf16.mxu0 %v11760_v6 }
 0x3c4   : > { %6027 = vmatprep.subr.bf16.mxu1 %v6026_v29 }
 0x3c5   : > { %v1645_v51 = vpop.f32.mrb[30].mxu1 }
 0x3c6   : > { %5877 = vmatpush1.bf16.msra.mxu0 %v11761_v52  ;;  %v1647_v44 = vpop.f32.mrb[31].mxu1 }
 0x3c7   : > { %6029 = vmatpush1.bf16.msra.mxu1 %v6028_v27  ;;  %5879 = vmatprep.subr.bf16.mxu0 %v11762_v13 }
 0x3c8   : > { %6031 = vmatprep.subr.bf16.mxu1 %v11765_v42  ;;  %v6042_v42 = vpack.c.bf16 %v11718_v34, %v11716_v54 }
 0x3c9   : > { %v1652_v41 = vpop.f32.mrb[32].mxu1 }
 0x3ca   : > { %4707 = vmatmul.mubr.f32.vlgmr.msra.gmra.mrb[120].mxu1 %v11766_v55  ;;  %5881 = vmatpush1.bf16.msra.mxu0 %v11767_v17  ;;  %v9780_v18 = vadd.f32 %v11769_v26, %v1652_v41  ;;  %v1654_v5 = vpop.f32.mrb[33].mxu1  ;;  %v11775_v41 = vld [vmem:[#allocation53_spill] sm:$0xff] }
 0x3cb   : > { %6033 = vmatpush1.bf16.msra.mxu1 %v6032_v10  ;;  %5883 = vmatprep.subr.bf16.mxu0 %v11768_v11  ;;  %v11774_v10 = vld [vmem:[#allocation46_spill] sm:$0xff]  ;;  %v6046_v5 = vpack.c.bf16 %v11726_v61, %v11724_v24  ;;  %v6050_v24 = vpack.c.bf16 %v11734_v32, %v11732_v0  ;;  %v11782_v0 = vand.u32 4294901760, %v11500_v16  ;;  %v11783_v32 = vand.u32 4294901760, %v11507_v23  ;;  %v11787_v23 = vld [vmem:[#allocation15_spill] sm:$0xff] }
 0x3cc   : > { %6035 = vmatprep.subr.bf16.mxu1 %v6034_v56  ;;  %4841 = vmatprep.mubr.f32.mxu1 %v11628_v31  ;;  %v11779_v61 = vld [vmem:[#allocation82_spill] sm:$0xff]  ;;  %v6056_v16 = vpack.c.bf16 %v11747_v21, %v11745_v30 }
 0x3cd   : > { %v5527_v20 = vpop.f32.mrb[38].mxu0  ;;  %v1659_v28 = vpop.f32.mrb[34].mxu1 }
 0x3ce   : > { %5885 = vmatpush1.bf16.msra.mxu0 %v11770_v4  ;;  %v9789_v2 = vadd.f32 %v11772_v35, %v1659_v28  ;;  %v5528_v29 = vpop.f32.mrb[39].mxu0  ;;  %v1661_v27 = vpop.f32.mrb[35].mxu1 }
 0x3cf   : > { %6037 = vmatpush1.bf16.msra.mxu1 %v6036_v25  ;;  %5887 = vmatprep.subr.bf16.mxu0 %v11771_v59  ;;  %v5529_v19 = vadd.f32 %v5528_v29, %v5527_v20  ;;  %v11777_v20 = vld [vmem:[#allocation22_spill] sm:$0xff]  ;;  %v11780_v27 = vld [vmem:[#allocation24_spill] sm:$0xff] }
 0x3d0   : > { %6039 = vmatprep.subr.bf16.mxu1 %v6038_v33  ;;  %v11776_v33 = vld [vmem:[#allocation21_spill] sm:$0xff] }
 0x3d1   : > { %v1666_v44 = vpop.f32.mrb[36].mxu1  ;;  %v1803_v56 = vpop.f32.mrb[40].mxu0  ;;  %v1646_v43 = vadd.f32 %v5529_v19, %v1645_v51  ;;  %v11778_v51 = vld [vmem:[#allocation45_spill] sm:$0xff] }
 0x3d2   : > { %5889 = vmatpush1.bf16.msra.mxu0 %v11773_v9  ;;  %v9798_v25 = vadd.f32 %v11775_v41, %v1666_v44  ;;  %v9801_v26 = vadd.f32 %v1803_v56, %v9621_v1  ;;  %v1668_v54 = vpop.f32.mrb[37].mxu1  ;;  %v1805_v34 = vpop.f32.mrb[41].mxu0  ;;  %v5902_v41 = vpack.c.bf16 %v11783_v32, %v11782_v0  ;;  %v11797_v0 = vld [vmem:[#allocation50_spill] sm:$0xff] }
 0x3d3   : > { %6041 = vmatpush1.bf16.msra.mxu1 %v6040_v3  ;;  %5891 = vmatprep.subr.bf16.mxu0 %v11774_v10  ;;  %v6054_v54 = vpack.c.bf16 %v11742_v15, %v11740_v40  ;;  %v11784_v34 = vld [vmem:[#allocation25_spill] sm:$0xff]  ;;  %v11798_v32 = vand.u32 4294901760, %v11797_v0  ;;  %v11813_v0 = vld [vmem:[#allocation186_spill] sm:$0xff] }
 0x3d4   : > { %6043 = vmatprep.subr.bf16.mxu1 %v6042_v42 }
 0x3d5   : > { %v1673_v28 = vpop.f32.mrb[38].mxu1  ;;  %v1812_v7 = vpop.f32.mrb[42].mxu0 }
 0x3d6   : > { %5893 = vmatpush1.bf16.msra.mxu0 %v11776_v33  ;;  %v9810_v3 = vadd.f32 %v11778_v51, %v1673_v28  ;;  %v9813_v1 = vadd.f32 %v1812_v7, %v9699_v45  ;;  %v1675_v35 = vpop.f32.mrb[39].mxu1  ;;  %v1814_v29 = vpop.f32.mrb[43].mxu0  ;;  %v11788_v51 = vand.u32 4294901760, %v9376_v58  ;;  %v6060_v58 = vpack.c.bf16 %v11756_v39, %v11754_v62 }
 0x3d7   : > { %6045 = vmatpush1.bf16.msra.mxu1 %v6044_v38  ;;  %5895 = vmatprep.subr.bf16.mxu0 %v11777_v20  ;;  %v11789_v35 = vand.u32 4294901760, %v9381_v37  ;;  %v11794_v37 = vld [vmem:[#allocation75_spill] sm:$0xff] }
 0x3d8   : > { %6047 = vmatprep.subr.bf16.mxu1 %v6046_v5  ;;  %v11786_v5 = vand.u32 4294901760, %v9361_v8  ;;  %v6058_v8 = vpack.c.bf16 %v11751_v50, %v11749_v22 }
 0x3d9   : > { %v1680_v42 = vpop.f32.mrb[40].mxu1  ;;  %v1821_v19 = vpop.f32.mrb[44].mxu0 }
 0x3da   : > { %5897 = vmatpush1.bf16.msra.mxu0 %v11779_v61  ;;  %v9822_v44 = vadd.f32 %v11781_v47, %v1680_v42  ;;  %v9825_v45 = vadd.f32 %v1821_v19, %v9717_v14  ;;  %v1682_v56 = vpop.f32.mrb[41].mxu1  ;;  %v1823_v38 = vpop.f32.mrb[45].mxu0  ;;  %v11785_v14 = vand.u32 4294901760, %v9356_v12  ;;  %v5906_v12 = vpack.c.bf16 %v11789_v35, %v11788_v51  ;;  %v11805_v35 = vld [vmem:[#allocation97_spill] sm:$0xff] }
 0x3db   : > { %6049 = vmatpush1.bf16.msra.mxu1 %v6048_v46  ;;  %5899 = vmatprep.subr.bf16.mxu0 %v11780_v27  ;;  %v11795_v56 = vld [vmem:[#allocation56_spill] sm:$0xff] }
 0x3dc   : > { %6051 = vmatprep.subr.bf16.mxu1 %v6050_v24  ;;  %v5904_v28 = vpack.c.bf16 %v11786_v5, %v11785_v14  ;;  %v11792_v24 = vld [vmem:[#allocation81_spill] sm:$0xff]  ;;  %v11796_v38 = vand.u32 4294901760, %v11795_v56 }
 0x3dd   : > { %v1687_v57 = vpop.f32.mrb[42].mxu1  ;;  %v1830_v60 = vpop.f32.mrb[46].mxu0  ;;  %v11793_v42 = vand.u32 4294901760, %v11792_v24  ;;  %v11809_v24 = vld [vmem:[#allocation14_spill] sm:$0xff]  ;;  %v11811_v56 = vld [vmem:[#allocation185_spill] sm:$0xff] }
 0x3de   : > { %5901 = vmatpush1.bf16.msra.mxu0 %v11784_v34  ;;  %v9841_v7 = vadd.f32 %v11787_v23, %v1687_v57  ;;  %v9843_v46 = vadd.f32 %v1830_v60, %v1646_v43  ;;  %v1689_v40 = vpop.f32.mrb[43].mxu1  ;;  %v1832_v15 = vpop.f32.mrb[47].mxu0  ;;  %v11790_v43 = vld [vmem:[#allocation41_spill] sm:$0xff]  ;;  %v11800_v57 = vld [vmem:[#allocation96_spill] sm:$0xff] }
 0x3df   : > { %6053 = vmatpush1.bf16.msra.mxu1 %v6052_v63  ;;  %5903 = vmatprep.subr.bf16.mxu0 %v5902_v41  ;;  %v11791_v29 = vand.u32 4294901760, %v11790_v43  ;;  %v5910_v41 = vpack.c.bf16 %v11798_v32, %v11796_v38  ;;  %v11803_v23 = vld [vmem:[#allocation84_spill] sm:$0xff]  ;;  %v11804_v40 = vld [vmem:[#allocation33_spill] sm:$0xff]  ;;  %v11814_v32 = vld [vmem:[#allocation34_spill] sm:$0xff] }
 0x3e0   : > { %6055 = vmatprep.subr.bf16.mxu1 %v6054_v54  ;;  %v11799_v54 = vld [vmem:[#allocation73_spill] sm:$0xff] }
 0x3e1   : > { %4071 = vmatmul.mubr.f32.vlgmr.msra.gmra.mrb[104].mxu0 %v11628_v31  ;;  %v1694_v30 = vpop.f32.mrb[44].mxu1  ;;  %v1839_v21 = vpop.f32.mrb[48].mxu0  ;;  %v5908_v19 = vpack.c.bf16 %v11793_v42, %v11791_v29  ;;  %v11807_v43 = vld [vmem:[#allocation9_spill] sm:$0xff]  ;;  %v11808_v29 = vld [vmem:[#allocation184_spill] sm:$0xff] }
 0x3e2   : > { %5905 = vmatpush1.bf16.msra.mxu0 %v5904_v28  ;;  %4237 = vmatprep.mubr.f32.mxu0 %v11628_v31  ;;  %v9860_v63 = vadd.f32 %v11794_v37, %v1694_v30  ;;  %v9863_v22 = vadd.f32 %v1839_v21, %v9780_v18  ;;  %v1696_v50 = vpop.f32.mrb[45].mxu1  ;;  %v1841_v47 = vpop.f32.mrb[49].mxu0  ;;  %v11801_v28 = vld [vmem:[#allocation80_spill] sm:$0xff]  ;;  %v11806_v21 = vld [vmem:[#allocation86_spill] sm:$0xff]  ;;  %v11812_v38 = vld [vmem:[#allocation49_spill] sm:$0xff] }
 0x3e3   : > { %6057 = vmatpush1.bf16.msra.mxu1 %v6056_v16  ;;  %5907 = vmatprep.subr.bf16.mxu0 %v5906_v12  ;;  %v11802_v16 = vld [vmem:[#allocation11_spill] sm:$0xff] }
 0x3e4   : > { %6059 = vmatprep.subr.bf16.mxu1 %v6058_v8 }
 0x3e5   : > { %v1701_v62 = vpop.f32.mrb[46].mxu1  ;;  %v1848_v39 = vpop.f32.mrb[50].mxu0 }
 0x3e6   : > { %5909 = vmatpush1.bf16.msra.mxu0 %v5908_v19  ;;  %v9871_v60 = vadd.f32 %v11800_v57, %v1701_v62  ;;  %v9874_v18 = vadd.f32 %v1848_v39, %v9789_v2  ;;  %v1703_v14 = vpop.f32.mrb[47].mxu1  ;;  %v1850_v5 = vpop.f32.mrb[51].mxu0  ;;  %v11815_v39 = vld [vmem:[#allocation113_spill] sm:$0xff] }
 0x3e7   : > { %6061 = vmatpush1.bf16.msra.mxu1 %v6060_v58  ;;  %5911 = vmatprep.subr.bf16.mxu0 %v5910_v41  ;;  %v11810_v58 = vld [vmem:[#allocation112_spill] sm:$0xff] }
 0x3e8   : > { %6063 = vmatprep.subr.bf16.mxu1 %v11799_v54 }
 0x3e9   : > { %v1708_v15 = vpop.f32.mrb[48].mxu1  ;;  %v1857_v51 = vpop.f32.mrb[52].mxu0 }
 0x3ea   : > { %4842 = vmatmul.mubr.f32.vlgmr.msra.gmra.mrb[120].mxu1 %v11628_v31  ;;  %5913 = vmatpush1.bf16.msra.mxu0 %v11801_v28  ;;  %v9883_v12 = vadd.f32 %v11805_v35, %v1708_v15  ;;  %v9886_v2 = vadd.f32 %v1857_v51, %v9798_v25  ;;  %v1710_v8 = vpop.f32.mrb[49].mxu1  ;;  %v1859_v30 = vpop.f32.mrb[53].mxu0  ;;  %v11816_v28 = vld [vmem:[#allocation187_spill] sm:$0xff]  ;;  %v11818_v15 = vld [vmem:[#allocation188_spill] sm:$0xff]  ;;  %v11819_v51 = vld [vmem:[#allocation89_spill] sm:$0xff] }
 0x3eb   : > { %6065 = vmatpush1.bf16.msra.mxu1 %v11802_v16  ;;  %5915 = vmatprep.subr.bf16.mxu0 %v11803_v23  ;;  %v11817_v23 = vld [vmem:[#allocation51_spill] sm:$0xff]  ;;  %v11820_v30 = vld [vmem:[#allocation114_spill] sm:$0xff] }
 0x3ec   : > { %6067 = vmatprep.subr.bf16.mxu1 %v11804_v40  ;;  %4944 = vmatprep.mubr.f32.mxu1 %v11628_v31 }
 0x3ed   : > { %v1715_v42 = vpop.f32.mrb[50].mxu1  ;;  %v1866_v19 = vpop.f32.mrb[54].mxu0 }
 0x3ee   : > { %5917 = vmatpush1.bf16.msra.mxu0 %v11806_v21  ;;  %v9893_v37 = vadd.f32 %v11810_v58, %v1715_v42  ;;  %v9896_v50 = vadd.f32 %v1866_v19, %v9810_v3  ;;  %v1717_v25 = vpop.f32.mrb[51].mxu1  ;;  %v1868_v47 = vpop.f32.mrb[55].mxu0  ;;  %v11821_v19 = vld [vmem:[#allocation189_spill] sm:$0xff]  ;;  %v11822_v58 = vld [vmem:[#allocation92_spill] sm:$0xff] }
 0x3ef   : > { %6069 = vmatpush1.bf16.msra.mxu1 %v11807_v43  ;;  %5919 = vmatprep.subr.bf16.mxu0 %v11808_v29  ;;  %v11823_v25 = vld [vmem:[#allocation190_spill] sm:$0xff]  ;;  %v11824_v47 = vld [vmem:[#allocation99_spill] sm:$0xff] }
 0x3f0   : > { %6071 = vmatprep.subr.bf16.mxu1 %v11809_v24 }
 0x3f1   : > { %v1722_v41 = vpop.f32.mrb[52].mxu1  ;;  %v1875_v62 = vpop.f32.mrb[56].mxu0 }
 0x3f2   : > { %5921 = vmatpush1.bf16.msra.mxu0 %v11811_v56  ;;  %v9903_v57 = vadd.f32 %v11815_v39, %v1722_v41  ;;  %v9906_v14 = vadd.f32 %v1875_v62, %v9822_v44  ;;  %v1724_v3 = vpop.f32.mrb[53].mxu1  ;;  %v1877_v5 = vpop.f32.mrb[57].mxu0 }
 0x3f3   : > { %6073 = vmatpush1.bf16.msra.mxu1 %v11812_v38  ;;  %5923 = vmatprep.subr.bf16.mxu0 %v11813_v0  ;;  %v11826_v5 = vld [vmem:[#allocation100_spill] sm:$0xff] }
 0x3f4   : > { %6075 = vmatprep.subr.bf16.mxu1 %v11814_v32 }
 0x3f5   : > { %v1729_v35 = vpop.f32.mrb[54].mxu1  ;;  %v1884_v8 = vpop.f32.mrb[58].mxu0 }
 0x3f6   : > { %5925 = vmatpush1.bf16.msra.mxu0 %v11816_v28  ;;  %v9913_v21 = vadd.f32 %v11820_v30, %v1729_v35  ;;  %v9916_v29 = vadd.f32 %v1884_v8, %v9841_v7  ;;  %v1731_v44 = vpop.f32.mrb[55].mxu1  ;;  %v1886_v42 = vpop.f32.mrb[59].mxu0  ;;  %v11825_v7 = vld [vmem:[#allocation191_spill] sm:$0xff]  ;;  %v11827_v28 = vld [vmem:[#allocation102_spill] sm:$0xff] }
 0x3f7   : > { %6077 = vmatpush1.bf16.msra.mxu1 %v11817_v23  ;;  %5927 = vmatprep.subr.bf16.mxu0 %v11818_v15 }
 0x3f8   : > { %6079 = vmatprep.subr.bf16.mxu1 %v11819_v51 }
 0x3f9   : > { %v1893_v56 = vpop.f32.mrb[60].mxu0  ;;  %v5598_v0 = vpop.f32.mrb[56].mxu1 }
 0x3fa   : > { %5929 = vmatpush1.bf16.msra.mxu0 %v11821_v19  ;;  %v9923_v41 = vadd.f32 %v1893_v56, %v9860_v63  ;;  %v1895_v62 = vpop.f32.mrb[61].mxu0  ;;  %v5599_v39 = vpop.f32.mrb[57].mxu1  ;;  %v11828_v19 = vld [vmem:[#allocation103_spill] sm:$0xff] }
 0x3fb   : > { %6081 = vmatpush1.bf16.msra.mxu1 %v11822_v58  ;;  %5931 = vmatprep.subr.bf16.mxu0 %v11823_v25  ;;  %v5600_v3 = vadd.f32 %v5599_v39, %v5598_v0  ;;  %v11830_v39 = vand.u32 4294901760, %v11764_v53 }
 0x3fc   : > { %6083 = vmatprep.subr.bf16.mxu1 %v11824_v47 }
 0x3fd   : > { %v1902_v15 = vpop.f32.mrb[62].mxu0  ;;  %v5601_v35 = vpop.f32.mrb[58].mxu1  ;;  %v2015_v8 = vadd.f32 %v5600_v3, %v9801_v26 }
 0x3fe   : > { %5933 = vmatpush1.bf16.msra.mxu0 %v11825_v7  ;;  %v9931_v30 = vadd.f32 %v1902_v15, %v9871_v60  ;;  %v1904_v63 = vpop.f32.mrb[63].mxu0  ;;  %v5602_v44 = vpop.f32.mrb[59].mxu1 }
 0x3ff   : > { %6085 = vmatpush1.bf16.msra.mxu1 %v11826_v5  ;;  %5935 = vmatprep.subr.bf16.mxu0 %v11758_v49  ;;  %v5603_v42 = vadd.f32 %v5602_v44, %v5601_v35  ;;  %v11829_v49 = vld [vmem:[#allocation94_spill] sm:$0xff] }
 0x400   : > { %6087 = vmatprep.subr.bf16.mxu1 %v11827_v28 }
 0x401   : > { %4238 = vmatmul.mubr.f32.vlgmr.msra.gmra.mrb[104].mxu0 %v11766_v55  ;;  %v1911_v25 = vpop.f32.mrb[64].mxu0  ;;  %v5604_v56 = vpop.f32.mrb[60].mxu1  ;;  %v2026_v26 = vadd.f32 %v5603_v42, %v9813_v1 }
 0x402   : > { %5937 = vmatpush1.bf16.msra.mxu0 %v11759_v36  ;;  %4340 = vmatprep.mubr.f32.mxu0 %v11628_v31  ;;  %v9941_v60 = vadd.f32 %v1911_v25, %v9883_v12  ;;  %v1913_v0 = vpop.f32.mrb[65].mxu0  ;;  %v5605_v62 = vpop.f32.mrb[61].mxu1  ;;  %v11831_v36 = vand.u32 4294901760, %v11763_v48 }
 0x403   : > { %6089 = vmatpush1.bf16.msra.mxu1 %v11828_v19  ;;  %5939 = vmatprep.subr.bf16.mxu0 %v11760_v6  ;;  %v5606_v7 = vadd.f32 %v5605_v62, %v5604_v56  ;;  %v11832_v6 = vld [vmem:[#allocation95_spill] sm:$0xff] }
 0x404   : > { %6091 = vmatprep.subr.bf16.mxu1 %v11829_v49  ;;  %v6094_v3 = vpack.c.bf16 %v11831_v36, %v11830_v39 }
 0x405   : > { %v1920_v1 = vpop.f32.mrb[66].mxu0  ;;  %v5607_v15 = vpop.f32.mrb[62].mxu1  ;;  %v2037_v12 = vadd.f32 %v5606_v7, %v9825_v45 }
 0x406   : > { %5941 = vmatpush1.bf16.msra.mxu0 %v11761_v52  ;;  %v9952_v35 = vadd.f32 %v1920_v1, %v9893_v37  ;;  %v1922_v63 = vpop.f32.mrb[67].mxu0  ;;  %v5608_v53 = vpop.f32.mrb[63].mxu1  ;;  %v11833_v52 = vld [vmem:[#allocation192_spill] sm:$0xff] }
 0x407   : > { %6093 = vmatpush1.bf16.msra.mxu1 %v11832_v6  ;;  %5943 = vmatprep.subr.bf16.mxu0 %v11762_v13  ;;  %v5609_v48 = vadd.f32 %v5608_v53, %v5607_v15  ;;  %v11834_v13 = vld [vmem:[#allocation193_spill] sm:$0xff]  ;;  %v11837_v1 = vld [vmem:[#allocation196_spill] sm:$0xff] }
 0x408   : > { %6095 = vmatprep.subr.bf16.mxu1 %v6094_v3 }
 0x409   : > { %v1929_v44 = vpop.f32.mrb[68].mxu0  ;;  %v5610_v42 = vpop.f32.mrb[64].mxu1  ;;  %v2048_v45 = vadd.f32 %v5609_v48, %v9843_v46 }
 0x40a   : > { %4945 = vmatmul.mubr.f32.vlgmr.msra.gmra.mrb[120].mxu1 %v11628_v31  ;;  %5945 = vmatpush1.bf16.msra.mxu0 %v11767_v17  ;;  %v9962_v37 = vadd.f32 %v1929_v44, %v9903_v57  ;;  %v1931_v25 = vpop.f32.mrb[69].mxu0  ;;  %v5611_v56 = vpop.f32.mrb[65].mxu1  ;;  %v11835_v17 = vld [vmem:[#allocation194_spill] sm:$0xff] }
 0x40b   : > { %6097 = vmatpush1.bf16.msra.mxu1 %v11833_v52  ;;  %5947 = vmatprep.subr.bf16.mxu0 %v11768_v11  ;;  %v5612_v0 = vadd.f32 %v5611_v56, %v5610_v42  ;;  %v11836_v11 = vld [vmem:[#allocation195_spill] sm:$0xff]  ;;  %v11839_v52 = vld [vmem:[#allocation198_spill] sm:$0xff]  ;;  %v11841_v56 = vld [vmem:[#allocation200_spill] sm:$0xff] }
 0x40c   : > { %6099 = vmatprep.subr.bf16.mxu1 %v11834_v13  ;;  %5111 = vmatprep.mubr.f32.mxu1 %v11628_v31 }
 0x40d   : > { %v1938_v62 = vpop.f32.mrb[70].mxu0  ;;  %v5613_v39 = vpop.f32.mrb[66].mxu1  ;;  %v2059_v46 = vadd.f32 %v5612_v0, %v9863_v22 }
 0x40e   : > { %5949 = vmatpush1.bf16.msra.mxu0 %v11770_v4  ;;  %v9970_v36 = vadd.f32 %v1938_v62, %v9913_v21  ;;  %v1940_v57 = vpop.f32.mrb[71].mxu0  ;;  %v5614_v3 = vpop.f32.mrb[67].mxu1  ;;  %v11838_v4 = vld [vmem:[#allocation197_spill] sm:$0xff] }
 0x40f   : > { %6101 = vmatpush1.bf16.msra.mxu1 %v11835_v17  ;;  %5951 = vmatprep.subr.bf16.mxu0 %v11771_v59  ;;  %v5615_v7 = vadd.f32 %v5614_v3, %v5613_v39  ;;  %v11843_v39 = vld [vmem:[#allocation202_spill] sm:$0xff] }
 0x410   : > { %6103 = vmatprep.subr.bf16.mxu1 %v11836_v11 }
 0x411   : > { %v5616_v59 = vpop.f32.mrb[68].mxu1  ;;  %v2251_v15 = vpop.f32.mrb[72].mxu0  ;;  %v2070_v63 = vadd.f32 %v5615_v7, %v9874_v18 }
 0x412   : > { %5953 = vmatpush1.bf16.msra.mxu0 %v11773_v9  ;;  %v9977_v53 = vadd.f32 %v2251_v15, %v2015_v8  ;;  %v5617_v22 = vpop.f32.mrb[69].mxu1  ;;  %v2253_v21 = vpop.f32.mrb[73].mxu0  ;;  %v11840_v9 = vld [vmem:[#allocation199_spill] sm:$0xff] }
 0x413   : > { %6105 = vmatpush1.bf16.msra.mxu1 %v11837_v1  ;;  %5955 = vmatprep.subr.bf16.mxu0 %v11774_v10  ;;  %v5618_v48 = vadd.f32 %v5617_v22, %v5616_v59  ;;  %v11846_v59 = vld [vmem:[#allocation205_spill] sm:$0xff] }
 0x414   : > { %6107 = vmatprep.subr.bf16.mxu1 %v11838_v4 }
 0x415   : > { %v5619_v10 = vpop.f32.mrb[70].mxu1  ;;  %v2258_v13 = vpop.f32.mrb[74].mxu0  ;;  %v2081_v44 = vadd.f32 %v5618_v48, %v9886_v2 }
 0x416   : > { %5957 = vmatpush1.bf16.msra.mxu0 %v11776_v33  ;;  %v9984_v42 = vadd.f32 %v2258_v13, %v2026_v26  ;;  %v5620_v18 = vpop.f32.mrb[71].mxu1  ;;  %v2260_v8 = vpop.f32.mrb[75].mxu0  ;;  %v11842_v33 = vld [vmem:[#allocation201_spill] sm:$0xff] }
 0x417   : > { %6109 = vmatpush1.bf16.msra.mxu1 %v11839_v52  ;;  %5959 = vmatprep.subr.bf16.mxu0 %v11777_v20  ;;  %v5621_v25 = vadd.f32 %v5620_v18, %v5619_v10 }
 0x418   : > { %6111 = vmatprep.subr.bf16.mxu1 %v11840_v9 }
 0x419   : > { %v5622_v20 = vpop.f32.mrb[72].mxu1  ;;  %v2265_v0 = vpop.f32.mrb[76].mxu0  ;;  %v2092_v17 = vadd.f32 %v5621_v25, %v9896_v50 }
 0x41a   : > { %5961 = vmatpush1.bf16.msra.mxu0 %v11779_v61  ;;  %v9991_v11 = vadd.f32 %v2265_v0, %v2037_v12  ;;  %v5623_v2 = vpop.f32.mrb[73].mxu1  ;;  %v2267_v26 = vpop.f32.mrb[77].mxu0  ;;  %v11844_v61 = vld [vmem:[#allocation203_spill] sm:$0xff]  ;;  %v11845_v12 = vld [vmem:[#allocation204_spill] sm:$0xff] }
 0x41b   : > { %6113 = vmatpush1.bf16.msra.mxu1 %v11841_v56  ;;  %5963 = vmatprep.subr.bf16.mxu0 %v11780_v27  ;;  %v5624_v62 = vadd.f32 %v5623_v2, %v5622_v20 }
 0x41c   : > { %6115 = vmatprep.subr.bf16.mxu1 %v11842_v33 }
 0x41d   : > { %v5625_v57 = vpop.f32.mrb[74].mxu1  ;;  %v2272_v3 = vpop.f32.mrb[78].mxu0  ;;  %v2103_v27 = vadd.f32 %v5624_v62, %v9906_v14 }
 0x41e   : > { %5965 = vmatpush1.bf16.msra.mxu0 %v11784_v34  ;;  %v9997_v7 = vadd.f32 %v2272_v3, %v2048_v45  ;;  %v5626_v1 = vpop.f32.mrb[75].mxu1  ;;  %v2274_v4 = vpop.f32.mrb[79].mxu0  ;;  %v11847_v45 = vld [vmem:[#allocation206_spill] sm:$0xff] }
 0x41f   : > { %6117 = vmatpush1.bf16.msra.mxu1 %v11843_v39  ;;  %v5627_v50 = vadd.f32 %v5626_v1, %v5625_v57 }
 0x420   : > { %6119 = vmatprep.subr.bf16.mxu1 %v11844_v61 }
 0x421   : > { %4341 = vmatmul.mubr.f32.vlgmr.msra.gmra.mrb[104].mxu0 %v11766_v55  ;;  %v5628_v34 = vpop.f32.mrb[76].mxu1  ;;  %v2279_v15 = vpop.f32.mrb[80].mxu0  ;;  %v2114_v22 = vadd.f32 %v5627_v50, %v9916_v29 }
 0x422   : > { %v10003_v21 = vadd.f32 %v2279_v15, %v2059_v46  ;;  %v5629_v48 = vpop.f32.mrb[77].mxu1  ;;  %v2281_v52 = vpop.f32.mrb[81].mxu0 }
 0x423   : > { %6121 = vmatpush1.bf16.msra.mxu1 %v11845_v12  ;;  %v5630_v14 = vadd.f32 %v5629_v48, %v5628_v34 }
 0x424   : > { %6123 = vmatprep.subr.bf16.mxu1 %v11846_v59  ;;  %v10045_v59 = vstv %s696_s11 }
 0x425   : > { %v5631_v9 = vpop.f32.mrb[78].mxu1  ;;  %v2286_v10 = vpop.f32.mrb[82].mxu0  ;;  %v2125_v13 = vadd.f32 %v5630_v14, %v9923_v41 }
 0x426   : > { %v10010_v18 = vadd.f32 %v2286_v10, %v2070_v63  ;;  %v5632_v8 = vpop.f32.mrb[79].mxu1  ;;  %v2288_v29 = vpop.f32.mrb[83].mxu0 }
 0x427   : > { %6125 = vmatpush1.bf16.msra.mxu1 %v11847_v45  ;;  %v5633_v46 = vadd.f32 %v5632_v8, %v5631_v9 }
 0x428   : > { %6127 = vmatprep.subr.bf16.mxu1 %v11799_v54 }
 0x429   : > { %v5634_v25 = vpop.f32.mrb[80].mxu1  ;;  %v2293_v54 = vpop.f32.mrb[84].mxu0  ;;  %v2136_v56 = vadd.f32 %v5633_v46, %v9931_v30 }
 0x42a   : > { %5112 = vmatmul.mubr.f32.vlgmr.msra.gmra.mrb[120].mxu1 %v11766_v55  ;;  %v10017_v33 = vadd.f32 %v2293_v54, %v2081_v44  ;;  %v5635_v41 = vpop.f32.mrb[81].mxu1  ;;  %v2295_v63 = vpop.f32.mrb[85].mxu0 }
 0x42b   : > { %6129 = vmatpush1.bf16.msra.mxu1 %v11802_v16  ;;  %5214 = vmatprep.mubr.f32.mxu1 %v11628_v31  ;;  %v5636_v20 = vadd.f32 %v5635_v41, %v5634_v25 }
 0x42c   : > { %6131 = vmatprep.subr.bf16.mxu1 %v11804_v40 }
 0x42d   : > { %v5637_v0 = vpop.f32.mrb[82].mxu1  ;;  %v2300_v16 = vpop.f32.mrb[86].mxu0  ;;  %v2147_v31 = vadd.f32 %v5636_v20, %v9941_v60 }
 0x42e   : > { %v10023_v2 = vadd.f32 %v2300_v16, %v2092_v17  ;;  %v5638_v40 = vpop.f32.mrb[83].mxu1  ;;  %v2302_v26 = vpop.f32.mrb[87].mxu0 }
 0x42f   : > { %6133 = vmatpush1.bf16.msra.mxu1 %v11807_v43  ;;  %v5639_v30 = vadd.f32 %v5638_v40, %v5637_v0 }
 0x430   : > { %6135 = vmatprep.subr.bf16.mxu1 %v11809_v24 }
 0x431   : > { %v5640_v44 = vpop.f32.mrb[84].mxu1  ;;  %v2307_v62 = vpop.f32.mrb[88].mxu0  ;;  %v2158_v43 = vadd.f32 %v5639_v30, %v9952_v35 }
 0x432   : > { %v10028_v39 = vadd.f32 %v2307_v62, %v2103_v27  ;;  %v5641_v24 = vpop.f32.mrb[85].mxu1  ;;  %v2309_v61 = vpop.f32.mrb[89].mxu0 }
 0x433   : > { %6137 = vmatpush1.bf16.msra.mxu1 %v11812_v38  ;;  %v5642_v60 = vadd.f32 %v5641_v24, %v5640_v44 }
 0x434   : > { %6139 = vmatprep.subr.bf16.mxu1 %v11814_v32 }
 0x435   : > { %v5643_v17 = vpop.f32.mrb[86].mxu1  ;;  %v2314_v57 = vpop.f32.mrb[90].mxu0  ;;  %v2169_v38 = vadd.f32 %v5642_v60, %v9962_v37 }
 0x436   : > { %v10033_v3 = vadd.f32 %v2314_v57, %v2114_v22  ;;  %v5644_v32 = vpop.f32.mrb[87].mxu1  ;;  %v2316_v1 = vpop.f32.mrb[91].mxu0 }
 0x437   : > { %6141 = vmatpush1.bf16.msra.mxu1 %v11817_v23  ;;  %v5645_v35 = vadd.f32 %v5644_v32, %v5643_v17 }
 0x438   : > { %6143 = vmatprep.subr.bf16.mxu1 %v11819_v51 }
 0x439   : > { %v2321_v23 = vpop.f32.mrb[92].mxu0  ;;  %v5678_v27 = vpop.f32.mrb[88].mxu1  ;;  %v2180_v51 = vadd.f32 %v5645_v35, %v9970_v36 }
 0x43a   : > { %v10041_v4 = vadd.f32 %v2321_v23, %v2125_v13  ;;  %v2323_v37 = vpop.f32.mrb[93].mxu0  ;;  %v5679_v50 = vpop.f32.mrb[89].mxu1 }
 0x43b   : > { %6145 = vmatpush1.bf16.msra.mxu1 %v11822_v58  ;;  %v5680_v12 = vadd.f32 %v5679_v50, %v5678_v27 }
 0x43c   : > { %6147 = vmatprep.subr.bf16.mxu1 %v11824_v47 }
 0x43d   : > { %v2429_v58 = vadd.f32 %v5680_v12, %v9977_v53  ;;  %v2328_v34 = vpop.f32.mrb[94].mxu0  ;;  %v5681_v47 = vpop.f32.mrb[90].mxu1 }
 0x43e   : > { %v10048_v15 = vadd.f32 %v2328_v34, %v2136_v56  ;;  %v2330_v22 = vpop.f32.mrb[95].mxu0  ;;  %v5682_v48 = vpop.f32.mrb[91].mxu1 }
 0x43f   : > { %6149 = vmatpush1.bf16.msra.mxu1 %v11826_v5  ;;  %v5683_v36 = vadd.f32 %v5682_v48, %v5681_v47  ;;  %v2734_v52 = vmul.f32 %v10045_v59, %v2429_v58 }
 0x440   : > { %6151 = vmatprep.subr.bf16.mxu1 %v11827_v28 }
 0x441   : > { %v2436_v5 = vadd.f32 %v5683_v36, %v9984_v42  ;;  %v2335_v28 = vpop.f32.mrb[96].mxu0  ;;  %v5684_v14 = vpop.f32.mrb[92].mxu1  ;;  %2767 = vperm.xlu1 %6246, %v2734_v52  }
 0x442   : > { %v10054_v45 = vadd.f32 %v2335_v28, %v2147_v31  ;;  %v2337_v53 = vpop.f32.mrb[97].mxu0  ;;  %v5685_v9 = vpop.f32.mrb[93].mxu1 }
 0x443   : > { %6153 = vmatpush1.bf16.msra.mxu1 %v11828_v19  ;;  %v5686_v10 = vadd.f32 %v5685_v9, %v5684_v14  ;;  %v2735_v13 = vmul.f32 %v10045_v59, %v2436_v5 }
 0x444   : > { %6155 = vmatprep.subr.bf16.mxu1 %v11829_v49 }
 0x445   : > { %v2443_v19 = vadd.f32 %v5686_v10, %v9991_v11  ;;  %v2342_v8 = vpop.f32.mrb[98].mxu0  ;;  %v5687_v29 = vpop.f32.mrb[94].mxu1  ;;  %2770 = vperm.xlu0 %6247, %v2735_v13  }
 0x446   : > { %v10059_v49 = vadd.f32 %v2342_v8, %v2158_v43  ;;  %v2344_v42 = vpop.f32.mrb[99].mxu0  ;;  %v5688_v46 = vpop.f32.mrb[95].mxu1 }
 0x447   : > { %6157 = vmatpush1.bf16.msra.mxu1 %v11832_v6  ;;  %v5689_v25 = vadd.f32 %v5688_v46, %v5687_v29  ;;  %v2736_v54 = vmul.f32 %v10045_v59, %v2443_v19 }
 0x449   : > { %v2450_v56 = vadd.f32 %v5689_v25, %v9997_v7  ;;  %v2349_v41 = vpop.f32.mrb[100].mxu0  ;;  %v5690_v6 = vpop.f32.mrb[96].mxu1  ;;  %2773 = vperm.xlu1 %6246, %v2736_v54  }
 0x44a   : > { %5215 = vmatmul.mubr.f32.vlgmr.msra.gmra.mrb[120].mxu1 %v11766_v55  ;;  %v10064_v63 = vadd.f32 %v2349_v41, %v2169_v38  ;;  %v2351_v11 = vpop.f32.mrb[101].mxu0  ;;  %v5691_v20 = vpop.f32.mrb[97].mxu1 }
 0x44b   : > { %v5692_v0 = vadd.f32 %v5691_v20, %v5690_v6  ;;  %v2737_v16 = vmul.f32 %v10045_v59, %v2450_v56 }
 0x44d   : > { %v2457_v31 = vadd.f32 %v5692_v0, %v10003_v21  ;;  %v2356_v40 = vpop.f32.mrb[102].mxu0  ;;  %v5693_v26 = vpop.f32.mrb[98].mxu1  ;;  %2776 = vperm.xlu0 %6247, %v2737_v16   ;;  %v11849_v16 = vld [vmem:[#allocation28_spill] sm:$0xff] }
 0x44e   : > { %v10068_v55 = vadd.f32 %v2356_v40, %v2180_v51  ;;  %v2358_v30 = vpop.f32.mrb[103].mxu0  ;;  %v5694_v44 = vpop.f32.mrb[99].mxu1  ;;  %v11851_v40 = vld [vmem:[#allocation10_spill] sm:$0xff] }
 0x44f   : > { %v5695_v7 = vadd.f32 %v5694_v44, %v5693_v26  ;;  %v2738_v62 = vmul.f32 %v10045_v59, %v2457_v31  ;;  %v11850_v31 = vld [vmem:[#allocation29_spill] sm:$0xff]  ;;  %v11853_v26 = vld [vmem:[#allocation78_spill] sm:$0xff]  ;;  %v11854_v30 = vld [vmem:[#allocation59_spill] sm:$0xff] }
 0x450   : > { %v11855_v44 = vld [vmem:[#allocation30_spill] sm:$0xff] }
 0x451   : > { %v2464_v43 = vadd.f32 %v5695_v7, %v10010_v18  ;;  %v5696_v24 = vpop.f32.mrb[100].mxu1  ;;  %2779 = vperm.xlu1 %6246, %v2738_v62   ;;  %v11858_v7 = vld [vmem:[#allocation209_spill] sm:$0xff]  ;;  %v11859_v62 = vld [vmem:[#allocation54_spill] sm:$0xff] }
 0x452   : > { %v5697_v61 = vpop.f32.mrb[101].mxu1 }
 0x453   : > { %v5698_v60 = vadd.f32 %v5697_v61, %v5696_v24  ;;  %v2739_v17 = vmul.f32 %v10045_v59, %v2464_v43  ;;  %v10105_v43 = vpop.xlane.xlu1 %2570  ;;  %v10107_v24 = vpop.xlane.xlu0 %2573 }
 0x455   : > { %v2471_v21 = vadd.f32 %v5698_v60, %v10017_v33  ;;  %2782 = vperm.xlu0 %6247, %v2739_v17  }
 0x456   : > { %v5699_v57 = vpop.f32.mrb[102].mxu1 }
 0x457   : > { %v5700_v38 = vpop.f32.mrb[103].mxu1  ;;  %v2740_v1 = vmul.f32 %v10045_v59, %v2471_v21  ;;  %v10109_v61 = vpop.xlane.xlu1 %2579 }
 0x458   : > { %v5701_v32 = vadd.f32 %v5700_v38, %v5699_v57  ;;  %v10111_v60 = vpop.xlane.xlu0 %2576 }
 0x459   : > { %2785 = vperm.xlu1 %6246, %v2740_v1  }
 0x45a   : > { %v2478_v35 = vadd.f32 %v5701_v32, %v10023_v2 }
 0x45b   : > { %v5702_v23 = vpop.f32.mrb[104].mxu1 }
 0x45c   : > { %v5703_v27 = vpop.f32.mrb[105].mxu1  ;;  %v2741_v51 = vmul.f32 %v10045_v59, %v2478_v35 }
 0x45d   : > { %v5704_v18 = vadd.f32 %v5703_v27, %v5702_v23  ;;  %v6410_v23 = vld [vmem:[%s6612_s17 + $0x1] sm:$0x1]  ;;  %v11860_v27 = vld [vmem:[#allocation19_spill] sm:$0xff] }
 0x45e   : > { %2788 = vperm.xlu0 %6247, %v2741_v51  }
 0x45f   : > { %v2485_v37 = vadd.f32 %v5704_v18, %v10028_v39  ;;  %v5705_v50 = vpop.f32.mrb[106].mxu1  ;;  %v2729_v18 = vsub.f32 %v6410_v23, %v11860_v27 }
 0x460   : > { %v5706_v12 = vpop.f32.mrb[107].mxu1 }
 0x461   : > { %v5707_v33 = vadd.f32 %v5706_v12, %v5705_v50  ;;  %v2742_v58 = vmul.f32 %v10045_v59, %v2485_v37  ;;  %v11861_v50 = vld [vmem:[#allocation76_spill] sm:$0xff] }
 0x463   : > { %v2492_v34 = vadd.f32 %v5707_v33, %v10033_v3  ;;  %v5708_v47 = vpop.f32.mrb[108].mxu1  ;;  %2791 = vperm.xlu1 %6246, %v2742_v58   ;;  %v2730_v33 = vmul.f32 1.442695, %v2729_v18  ;;  %v11862_v58 = vld [vmem:[#allocation17_spill] sm:$0xff] }
 0x464   : > { %v5709_v22 = vpop.f32.mrb[109].mxu1 }
 0x465   : > { %v5710_v2 = vadd.f32 %v5709_v22, %v5708_v47  ;;  %v2743_v48 = vmul.f32 %v10045_v59, %v2492_v34  ;;  %v11863_v22 = vld [vmem:[#allocation18_spill] sm:$0xff]  ;;  %6404 = vpow2.f32 %v2730_v33 }
 0x467   : > { %v2499_v36 = vadd.f32 %v5710_v2, %v10041_v4  ;;  %v5711_v52 = vpop.f32.mrb[110].mxu1  ;;  %2794 = vperm.xlu0 %6247, %v2743_v48   ;;  %v11864_v48 = vld [vmem:[#allocation210_spill] sm:$0xff] }
 0x468   : > { %v5712_v5 = vpop.f32.mrb[111].mxu1 }
 0x469   : > { %v5713_v39 = vadd.f32 %v5712_v5, %v5711_v52  ;;  %v2744_v28 = vmul.f32 %v10045_v59, %v2499_v36  ;;  %v11865_v52 = vld [vmem:[#allocation211_spill] sm:$0xff] }
 0x46b   : > { %v2506_v14 = vadd.f32 %v5713_v39, %v10048_v15  ;;  %v5714_v53 = vpop.f32.mrb[112].mxu1  ;;  %2797 = vperm.xlu1 %6246, %v2744_v28  }
 0x46c   : > { %v5715_v9 = vpop.f32.mrb[113].mxu1 }
 0x46d   : > { %v5716_v3 = vadd.f32 %v5715_v9, %v5714_v53  ;;  %v2745_v10 = vmul.f32 %v10045_v59, %v2506_v14  ;;  %v11866_v14 = vld [vmem:[#allocation212_spill] sm:$0xff] }
 0x46f   : > { %v2513_v13 = vadd.f32 %v5716_v3, %v10054_v45  ;;  %v5717_v19 = vpop.f32.mrb[114].mxu1  ;;  %2800 = vperm.xlu0 %6247, %v2745_v10   ;;  %v11867_v10 = vld [vmem:[#allocation213_spill] sm:$0xff] }
 0x470   : > { %v5718_v8 = vpop.f32.mrb[115].mxu1 }
 0x471   : > { %v5719_v4 = vadd.f32 %v5718_v8, %v5717_v19  ;;  %v2746_v29 = vmul.f32 %v10045_v59, %v2513_v13 }
 0x473   : > { %v2520_v42 = vadd.f32 %v5719_v4, %v10059_v49  ;;  %v5720_v46 = vpop.f32.mrb[116].mxu1  ;;  %2803 = vperm.xlu1 %6246, %v2746_v29   ;;  %v11848_v49 = vld [vmem:[#allocation12_spill] sm:$0xff]  ;;  %v11868_v29 = vld [vmem:[#allocation61_spill] sm:$0xff] }
 0x474   : > { %v5721_v25 = vpop.f32.mrb[117].mxu1 }
 0x475   : > { %v5722_v15 = vadd.f32 %v5721_v25, %v5720_v46  ;;  %v2747_v54 = vmul.f32 %v10045_v59, %v2520_v42 }
 0x477   : > { %v2527_v56 = vadd.f32 %v5722_v15, %v10064_v63  ;;  %v5723_v41 = vpop.f32.mrb[118].mxu1  ;;  %2806 = vperm.xlu0 %6247, %v2747_v54   ;;  %v11852_v63 = vld [vmem:[#allocation58_spill] sm:$0xff]  ;;  %v11869_v15 = vld [vmem:[#allocation215_spill] sm:$0xff] }
 0x478   : > { %v5724_v6 = vpop.f32.mrb[119].mxu1 }
 0x479   : > { %v2748_v45 = vmul.f32 %v10045_v59, %v2527_v56  ;;  %v5725_v11 = vadd.f32 %v5724_v6, %v5723_v41  ;;  %v11870_v6 = vld [vmem:[#allocation62_spill] sm:$0xff] }
 0x47b   : > { %v2534_v20 = vadd.f32 %v5725_v11, %v10068_v55  ;;  %2809 = vperm.xlu1 %6246, %v2748_v45   ;;  %v11856_v55 = vld [vmem:[#allocation208_spill] sm:$0xff] }
 0x47c   : > { %v11871_v11 = vld [vmem:[#allocation52_spill] sm:$0xff] }
 0x47d   : > { %v2749_v0 = vmul.f32 %v10045_v59, %v2534_v20  ;;  %v11857_v59 = vld [vmem:[#allocation79_spill] sm:$0xff] }
 0x47f   : > { %2812 = vperm.xlu0 %6247, %v2749_v0  }
 0x49e   : > { %2582 = vadd.xlane.f32.xlu0 %v11848_v49  ;;  %v11872_v49 = vld [vmem:[#allocation216_spill] sm:$0xff] }
 0x49f   : > { %2585 = vadd.xlane.f32.xlu1 %v11849_v16 }
 0x4a2   : > { %2588 = vadd.xlane.f32.xlu0 %v11850_v31 }
 0x4a3   : > { %2591 = vadd.xlane.f32.xlu1 %v11851_v40 }
 0x4a6   : > { %2594 = vadd.xlane.f32.xlu0 %v11852_v63  ;;  %v11873_v63 = vld [vmem:[#allocation214_spill] sm:$0xff] }
 0x4a7   : > { %2597 = vadd.xlane.f32.xlu1 %v11853_v26 }
 0x4aa   : > { %2600 = vadd.xlane.f32.xlu0 %v11854_v30  ;;  %v261_v30 = vld [vmem:[%s6612_s17 + $0x2] sm:$0x1] }
 0x4ab   : > { %2603 = vadd.xlane.f32.xlu1 %v11855_v44  ;;  %v2617_v44 = vstv %s10035_s29 }
 0x4ac   : > { %v2618_v18 = vmul.f32 %v2617_v44, %v261_v30 }
 0x4ae   : > { %2606 = vadd.xlane.f32.xlu0 %v11856_v55 }
 0x4af   : > { %2609 = vadd.xlane.f32.xlu1 %v11857_v59 }
 0x4b2   : > { %2612 = vadd.xlane.f32.xlu0 %v11858_v7  ;;  %v11874_v7 = vld [vmem:[#allocation219_spill] sm:$0xff] }
 0x4b3   : > { %2615 = vadd.xlane.f32.xlu1 %v11859_v62 }
 0x4c0   : > { %v2768_v17 = vpop.permute.xlu1 %2767 }
 0x4c1   : > { %v2817_v2 = vrot.slane %v2768_v17, %v11863_v22 }
 0x4c4   : > { %v2771_v21 = vpop.permute.xlu0 %2770 }
 0x4c5   : > { %v2821_v12 = vrot.slane %v2771_v21, %v11861_v50 }
 0x4c7   : > { %v2822_v28 = vsel %vm2628_vm6, %v2821_v12, %v2817_v2 }
 0x4c8   : > { %v2774_v57 = vpop.permute.xlu1 %2773 }
 0x4c9   : > { %v2826_v34 = vrot.slane %v2774_v57, %v11862_v58  ;;  %v11875_v57 = vld [vmem:[#allocation217_spill] sm:$0xff] }
 0x4cb   : > { %v2827_v3 = vsel %vm2635_vm4, %v2826_v34, %v2822_v28 }
 0x4cc   : > { %v2777_v38 = vpop.permute.xlu0 %2776 }
 0x4cd   : > { %v2831_v36 = vrot.slane %v2777_v38, %v11864_v48 }
 0x4cf   : > { %v2832_v4 = vsel %vm2642_vm2, %v2831_v36, %v2827_v3  ;;  %v11879_v3 = vld [vmem:[#allocation8_spill] sm:$0xff] }
 0x4d0   : > { %v2780_v32 = vpop.permute.xlu1 %2779 }
 0x4d1   : > { %v2836_v5 = vrot.slane %v2780_v32, %v11865_v52 }
 0x4d3   : > { %v2837_v25 = vsel %vm2649_vm3, %v2836_v5, %v2832_v4 }
 0x4d4   : > { %v2783_v1 = vpop.permute.xlu0 %2782 }
 0x4d5   : > { %v2841_v53 = vrot.slane %v2783_v1, %v11866_v14 }
 0x4d7   : > { %v2842_v41 = vsel %vm2656_vm5, %v2841_v53, %v2837_v25  ;;  %v2920_v25 = vrot.slane %v10107_v24, %v11861_v50 }
 0x4d8   : > { %v2786_v35 = vpop.permute.xlu1 %2785 }
 0x4d9   : > { %v2846_v13 = vrot.slane %v2786_v35, %v11867_v10  ;;  %v11877_v35 = vld [vmem:[#allocation220_spill] sm:$0xff] }
 0x4db   : > { %v2847_v0 = vsel %vm2663_vm7, %v2846_v13, %v2842_v41  ;;  %v2930_v41 = vrot.slane %v10109_v61, %v11864_v48 }
 0x4dd   : > { %v2789_v51 = vpop.permute.xlu0 %2788 }
 0x4de   : > { %v2851_v42 = vrot.slane %v2789_v51, %v11868_v29  ;;  %v6405_v51 = vpop.eup %6404 }
 0x4df   : > { %v2732_v5 = vmul.f32 %v6405_v51, %v2618_v18 }
 0x4e0   : > { %v2852_v40 = vsel %vm2670_vm1, %v2851_v42, %v2847_v0 }
 0x4e2   : > { %v2792_v37 = vpop.permute.xlu1 %2791 }
 0x4e3   : > { %v2856_v54 = vrot.slane %v2792_v37, %v11869_v15 }
 0x4e5   : > { %v2857_v59 = vsel %vm2677_vm9, %v2856_v54, %v2852_v40  ;;  %v2925_v54 = vrot.slane %v10111_v60, %v11862_v58 }
 0x4e6   : > { %v2795_v47 = vpop.permute.xlu0 %2794 }
 0x4e7   : > { %v2861_v45 = vrot.slane %v2795_v47, %v11870_v6  ;;  %v11878_v47 = vld [vmem:[#allocation218_spill] sm:$0xff] }
 0x4e9   : > { %v2862_v21 = vsel %vm2684_vm11, %v2861_v45, %v2857_v59 }
 0x4ea   : > { %v2798_v39 = vpop.permute.xlu1 %2797 }
 0x4eb   : > { %v2866_v16 = vrot.slane %v2798_v39, %v11872_v49 }
 0x4ed   : > { %v2867_v1 = vsel %vm2691_vm12, %v2866_v16, %v2862_v21 }
 0x4ee   : > { %v2801_v19 = vpop.permute.xlu0 %2800 }
 0x4ef   : > { %v2871_v26 = vrot.slane %v2801_v19, %v11873_v63 }
 0x4f1   : > { %v2872_v37 = vsel %vm2698_vm13, %v2871_v26, %v2867_v1 }
 0x4f2   : > { %v2804_v56 = vpop.permute.xlu1 %2803 }
 0x4f3   : > { %v2876_v62 = vrot.slane %v2804_v56, %v11874_v7  ;;  %v2916_v56 = vrot.slane %v10105_v43, %v11863_v22 }
 0x4f4   : > { %v4342_v9 = vpop.f32.mrb[104].mxu0 }
 0x4f5   : > { %v4344_v8 = vpop.f32.mrb[105].mxu0  ;;  %v2877_v12 = vsel %vm2705_vm14, %v2876_v62, %v2872_v37  ;;  %v2921_v45 = vsel %vm2628_vm6, %v2920_v25, %v2916_v56 }
 0x4f6   : > { %v5246_v46 = vcombine.low %v4342_v9, %v4344_v8  ;;  %v2807_v31 = vpop.permute.xlu0 %2806 }
 0x4f7   : > { %v2881_v38 = vrot.slane %v2807_v31, %v11875_v57 }
 0x4f8   : > { %v5253_v20 = vrot.slane %v5246_v46, %v11871_v11 }
 0x4f9   : > { %v2882_v34 = vsel %vm2712_vm15, %v2881_v38, %v2877_v12 }
 0x4fa   : > { %v5260_v55 = vrot.slane %v5253_v20, %v11871_v11  ;;  %v2810_v17 = vpop.permute.xlu1 %2809  ;;  %v2926_v20 = vsel %vm2635_vm4, %v2925_v54, %v2921_v45 }
 0x4fb   : > { %v2886_v23 = vrot.slane %v2810_v17, %v11877_v35  ;;  %v2931_v31 = vsel %vm2642_vm2, %v2930_v41, %v2926_v20  ;;  %v6411_v41 = vld [vmem:[%s6612_s17] sm:$0x1]  ;;  %s5450_s17 = sshll.u32 %s6542_s0, 6  ;;  %s5285_s0 = scalar_lea.sflag [#allocation5], %s232_s22 }
 0x4fc   : > { %5447 = vst.msk [vmem:[%s8294_s16 + $0x1] ss:$4 sm:$0x3] %vm8297_vm0, %v5260_v55  ;;  %s10250_s13 = scalar_lea.hbm %s10300_s5, %s5450_s17 }
 0x4fd   : > { %v2887_v36 = vsel %vm2719_vm8, %v2886_v23, %v2882_v34 }
 0x4fe   : > { %v2813_v33 = vpop.permute.xlu0 %2812 }
 0x4ff   : > { %v2891_v2 = vrot.slane %v2813_v33, %v11878_v47 }
 0x501   : > { %v2892_v39 = vsel %vm2726_vm10, %v2891_v2, %v2887_v36 }
 0x502   : > { %v10153_v28 = vadd.f32 %v2892_v39, %v2732_v5 }
 0x504   : > { %v2895_v53 = vmax.f32 %v10153_v28, 1e-14  ;;  %2997 = vst [vmem:[%s9025_s19 + $0x2] sm:$0x1] %v10153_v28 }
 0x506   : > { %6406 = vrcp.f32 %v2895_v53 }
 0x510   : > { %v10160_v9 = vpop.eup %6406 }
 0x511   : > { %v3007_v13 = vrot.slane %v10160_v9, %v11879_v3 }
 0x513   : > { %3013 = vbcast.lane.b32.xlu1 %v3007_v13, 264  ;;  %3009 = vbcast.lane.b32.xlu0 %v3007_v13, 256 }
 0x517   : > { %3017 = vbcast.lane.b32.xlu1 %v3007_v13, 272  ;;  %3021 = vbcast.lane.b32.xlu0 %v3007_v13, 280 }
 0x51b   : > { %3025 = vbcast.lane.b32.xlu1 %v3007_v13, 288  ;;  %3029 = vbcast.lane.b32.xlu0 %v3007_v13, 296 }
 0x51d   : > { %v5216_v19 = vpop.f32.mrb[120].mxu1 }
 0x51e   : > { %v5218_v8 = vpop.f32.mrb[121].mxu1 }
 0x51f   : > { %v5266_v4 = vcombine.low %v5216_v19, %v5218_v8  ;;  %3033 = vbcast.lane.b32.xlu1 %v3007_v13, 304  ;;  %3037 = vbcast.lane.b32.xlu0 %v3007_v13, 312 }
 0x521   : > { %v5273_v42 = vrot.slane %v5266_v4, %v11871_v11 }
 0x523   : > { %v5280_v46 = vrot.slane %v5273_v42, %v11871_v11  ;;  %3041 = vbcast.lane.b32.xlu1 %v3007_v13, 320  ;;  %3045 = vbcast.lane.b32.xlu0 %v3007_v13, 328 }
 0x525   : > { %5448 = vst.msk [vmem:[%s8294_s16 + $0x2] ss:$4 sm:$0x3] %vm8297_vm0, %v5280_v46  ;;  %s6417_s16 = sshll.u32 %s6482_s15, 4  ;;  %s6418_s16 = int_to_ptr.vmem [resolvable:$false] %s6417_s16 }
 0x526   : > { %s6419_s18 = scalar_lea.vmem %s6418_s16, 128  ;;  %p6420_p2 = scmp.lt.s32.totalorder %s10252_s30, %s6418_s16 }
 0x527   : > { %3049 = vbcast.lane.b32.xlu1 %v3007_v13, 336  ;;  %3053 = vbcast.lane.b32.xlu0 %v3007_v13, 344  ;;  %p6421_p3 = scmp.lt.s32.totalorder %s6419_s18, %s6413_s14 }
 0x529   : > { %p6422_p4 = por %p6421_p3, %p6420_p2 }
 0x52b   : > { %3057 = vbcast.lane.b32.xlu1 %v3007_v13, 352  ;;  %3061 = vbcast.lane.b32.xlu0 %v3007_v13, 360  ;;  %v2583_v11 = vpop.xlane.xlu0 %2582  ;;  %p6423_p7 = pnand %p6422_p4, %p6416_p1 }
 0x52c   : > { %v2935_v0 = vrot.slane %v2583_v11, %v11865_v52  ;;  %v2586_v16 = vpop.xlane.xlu1 %2585 }
 0x52d   : > { %v2940_v40 = vrot.slane %v2586_v16, %v11866_v14 }
 0x52e   : > { %v2936_v26 = vsel %vm2649_vm3, %v2935_v0, %v2931_v31 }
 0x52f   : > { %3065 = vbcast.lane.b32.xlu1 %v3007_v13, 368  ;;  %3069 = vbcast.lane.b32.xlu0 %v3007_v13, 376  ;;  %v2589_v30 = vpop.xlane.xlu0 %2588  ;;  %v2941_v59 = vsel %vm2656_vm5, %v2940_v40, %v2936_v26 }
 0x530   : > { %v2945_v44 = vrot.slane %v2589_v30, %v11867_v10  ;;  %v2592_v55 = vpop.xlane.xlu1 %2591 }
 0x531   : > { %v2950_v62 = vrot.slane %v2592_v55, %v11868_v29 }
 0x532   : > { %v2946_v17 = vsel %vm2663_vm7, %v2945_v44, %v2941_v59 }
 0x533   : > { %v2595_v21 = vpop.xlane.xlu0 %2594  ;;  %v2951_v1 = vsel %vm2670_vm1, %v2950_v62, %v2946_v17 }
 0x534   : > { %v2955_v38 = vrot.slane %v2595_v21, %v11869_v15  ;;  %v2598_v32 = vpop.xlane.xlu1 %2597 }
 0x535   : > { %v2960_v23 = vrot.slane %v2598_v32, %v11870_v6 }
 0x536   : > { %v2956_v18 = vsel %vm2677_vm9, %v2955_v38, %v2951_v1 }
 0x537   : > { %v2601_v51 = vpop.xlane.xlu0 %2600  ;;  %v2961_v33 = vsel %vm2684_vm11, %v2960_v23, %v2956_v18 }
 0x538   : > { %v2965_v37 = vrot.slane %v2601_v51, %v11872_v49  ;;  %v2604_v12 = vpop.xlane.xlu1 %2603 }
 0x539   : > { %v2970_v34 = vrot.slane %v2604_v12, %v11873_v63 }
 0x53a   : > { %v2966_v2 = vsel %vm2691_vm12, %v2965_v37, %v2961_v33 }
 0x53b   : > { %v2607_v36 = vpop.xlane.xlu0 %2606  ;;  %v2971_v3 = vsel %vm2698_vm13, %v2970_v34, %v2966_v2 }
 0x53c   : > { %v2975_v5 = vrot.slane %v2607_v36, %v11874_v7  ;;  %v2610_v39 = vpop.xlane.xlu1 %2609 }
 0x53d   : > { %v2980_v13 = vrot.slane %v2610_v39, %v11875_v57 }
 0x53e   : > { %v2976_v19 = vsel %vm2705_vm14, %v2975_v5, %v2971_v3 }
 0x53f   : > { %v2613_v8 = vpop.xlane.xlu0 %2612  ;;  %v2981_v46 = vsel %vm2712_vm15, %v2980_v13, %v2976_v19 }
 0x540   : > { %v2985_v4 = vrot.slane %v2613_v8, %v11877_v35  ;;  %v2616_v42 = vpop.xlane.xlu1 %2615 }
 0x541   : > { %v2990_v25 = vrot.slane %v2616_v42, %v11878_v47 }
 0x542   : > { %v2986_v54 = vsel %vm2719_vm8, %v2985_v4, %v2981_v46 }
 0x543   : > { %v2991_v56 = vsel %vm2726_vm10, %v2990_v25, %v2986_v54 }
 0x544   : > { %v2993_v45 = vmul.f32 %v6411_v41, %v2991_v56 }
 0x546   : > { %v2994_v20 = vmul.f32 %v10160_v9, %v2993_v45 }
 0x548   : > { %2995 = vst [vmem:[%s9025_s19] sm:$0x1] %v2994_v20 }
 0x585   : > { %v3014_v0 = vpop.permute.xlu1 %3013  ;;  %v3010_v31 = vpop.permute.xlu0 %3009 }
 0x586   : > { %v3088_v40 = vmul.f32 %v3014_v0, %v10107_v24  ;;  %v3087_v26 = vmul.f32 %v3010_v31, %v10105_v43 }
 0x588   : > { %3123 = vperm.xlu0 %6247, %v3088_v40   ;;  %3120 = vperm.xlu1 %6246, %v3087_v26  }
 0x589   : > { %v3018_v44 = vpop.permute.xlu1 %3017  ;;  %v3022_v59 = vpop.permute.xlu0 %3021 }
 0x58a   : > { %v3089_v62 = vmul.f32 %v3018_v44, %v10111_v60  ;;  %v3090_v17 = vmul.f32 %v3022_v59, %v10109_v61 }
 0x58c   : > { %3126 = vperm.xlu1 %6246, %v3089_v62   ;;  %3129 = vperm.xlu0 %6247, %v3090_v17  }
 0x58d   : > { %v3026_v38 = vpop.permute.xlu1 %3025  ;;  %v3030_v1 = vpop.permute.xlu0 %3029 }
 0x58e   : > { %v3091_v9 = vmul.f32 %v3026_v38, %v2583_v11  ;;  %v3092_v23 = vmul.f32 %v3030_v1, %v2586_v16 }
 0x590   : > { %3132 = vperm.xlu1 %6246, %v3091_v9   ;;  %3135 = vperm.xlu0 %6247, %v3092_v23  }
 0x591   : > { %v3034_v18 = vpop.permute.xlu1 %3033  ;;  %v3038_v24 = vpop.permute.xlu0 %3037 }
 0x592   : > { %v3093_v37 = vmul.f32 %v3034_v18, %v2589_v30  ;;  %v3094_v43 = vmul.f32 %v3038_v24, %v2592_v55 }
 0x594   : > { %3138 = vperm.xlu1 %6246, %v3093_v37   ;;  %3141 = vperm.xlu0 %6247, %v3094_v43  }
 0x595   : > { %v3042_v33 = vpop.permute.xlu1 %3041  ;;  %v3046_v34 = vpop.permute.xlu0 %3045 }
 0x596   : > { %v3095_v2 = vmul.f32 %v3042_v33, %v2595_v21  ;;  %v3096_v60 = vmul.f32 %v3046_v34, %v2598_v32 }
 0x598   : > { %3144 = vperm.xlu1 %6246, %v3095_v2   ;;  %3147 = vperm.xlu0 %6247, %v3096_v60  }
 0x599   : > { %v3050_v61 = vpop.permute.xlu1 %3049  ;;  %v3054_v5 = vpop.permute.xlu0 %3053 }
 0x59a   : > { %v3097_v3 = vmul.f32 %v3050_v61, %v2601_v51  ;;  %v3098_v13 = vmul.f32 %v3054_v5, %v2604_v12 }
 0x59c   : > { %3150 = vperm.xlu1 %6246, %v3097_v3   ;;  %3153 = vperm.xlu0 %6247, %v3098_v13  }
 0x59d   : > { %v3058_v11 = vpop.permute.xlu1 %3057  ;;  %v3062_v16 = vpop.permute.xlu0 %3061 }
 0x59e   : > { %v3099_v19 = vmul.f32 %v3058_v11, %v2607_v36  ;;  %v3100_v4 = vmul.f32 %v3062_v16, %v2610_v39  ;;  %v2998_v36 = vmul.f32 0.003921569, %v2895_v53 }
 0x5a0   : > { %3156 = vperm.xlu1 %6246, %v3099_v19   ;;  %3159 = vperm.xlu0 %6247, %v3100_v4   ;;  %6408 = vlog2.f32 %v2998_v36 }
 0x5a1   : > { %v3066_v30 = vpop.permute.xlu1 %3065  ;;  %v3070_v55 = vpop.permute.xlu0 %3069 }
 0x5a2   : > { %v3101_v46 = vmul.f32 %v3066_v30, %v2613_v8  ;;  %v3102_v25 = vmul.f32 %v3070_v55, %v2616_v42 }
 0x5a4   : > { %3162 = vperm.xlu1 %6246, %v3101_v46   ;;  %3165 = vperm.xlu0 %6247, %v3102_v25  }
 0x5aa   : > { %v6409_v38 = vpop.eup %6408 }
 0x607   : > { %v3121_v21 = vpop.permute.xlu1 %3120  ;;  %v3124_v32 = vpop.permute.xlu0 %3123 }
 0x608   : > { %v3170_v54 = vrot.slane %v3121_v21, %v11863_v22  ;;  %v3174_v51 = vrot.slane %v3124_v32, %v11861_v50 }
 0x60a   : > { %v3175_v39 = vsel %vm2628_vm6, %v3174_v51, %v3170_v54 }
 0x60b   : > { %v3127_v12 = vpop.permute.xlu1 %3126  ;;  %v3130_v56 = vpop.permute.xlu0 %3129 }
 0x60c   : > { %v3179_v41 = vrot.slane %v3127_v12, %v11862_v58  ;;  %v3184_v8 = vrot.slane %v3130_v56, %v11864_v48 }
 0x60e   : > { %v3180_v42 = vsel %vm2635_vm4, %v3179_v41, %v3175_v39 }
 0x60f   : > { %v3133_v45 = vpop.permute.xlu1 %3132  ;;  %v3136_v20 = vpop.permute.xlu0 %3135  ;;  %v3185_v50 = vsel %vm2642_vm2, %v3184_v8, %v3180_v42 }
 0x610   : > { %v3189_v0 = vrot.slane %v3133_v45, %v11865_v52  ;;  %v3194_v22 = vrot.slane %v3136_v20, %v11866_v14 }
 0x612   : > { %v3190_v58 = vsel %vm2649_vm3, %v3189_v0, %v3185_v50 }
 0x613   : > { %v3139_v31 = vpop.permute.xlu1 %3138  ;;  %v3142_v28 = vpop.permute.xlu0 %3141  ;;  %v3195_v40 = vsel %vm2656_vm5, %v3194_v22, %v3190_v58 }
 0x614   : > { %v3199_v53 = vrot.slane %v3139_v31, %v11867_v10  ;;  %v3204_v48 = vrot.slane %v3142_v28, %v11868_v29 }
 0x616   : > { %v3200_v26 = vsel %vm2663_vm7, %v3199_v53, %v3195_v40 }
 0x617   : > { %v3145_v44 = vpop.permute.xlu1 %3144  ;;  %v3148_v59 = vpop.permute.xlu0 %3147  ;;  %v3205_v62 = vsel %vm2670_vm1, %v3204_v48, %v3200_v26 }
 0x618   : > { %v3209_v52 = vrot.slane %v3145_v44, %v11869_v15  ;;  %v3214_v14 = vrot.slane %v3148_v59, %v11870_v6  ;;  %v3000_v15 = vmul.f32 0.6931472, %v6409_v38 }
 0x61a   : > { %v3210_v17 = vsel %vm2677_vm9, %v3209_v52, %v3205_v62  ;;  %v3001_v34 = vadd.f32 %v3000_v15, %v11860_v27 }
 0x61b   : > { %v3151_v1 = vpop.permute.xlu1 %3150  ;;  %v3154_v9 = vpop.permute.xlu0 %3153  ;;  %v3215_v23 = vsel %vm2684_vm11, %v3214_v14, %v3210_v17 }
 0x61c   : > { %v3219_v10 = vrot.slane %v3151_v1, %v11872_v49  ;;  %v3224_v29 = vrot.slane %v3154_v9, %v11873_v63 }
 0x61e   : > { %v3220_v18 = vsel %vm2691_vm12, %v3219_v10, %v3215_v23 }
 0x61f   : > { %v3157_v24 = vpop.permute.xlu1 %3156  ;;  %v3160_v37 = vpop.permute.xlu0 %3159  ;;  %v3225_v43 = vsel %vm2698_vm13, %v3224_v29, %v3220_v18 }
 0x620   : > { %v3229_v6 = vrot.slane %v3157_v24, %v11874_v7  ;;  %v3234_v33 = vrot.slane %v3160_v37, %v11875_v57  ;;  %v3002_v57 = vadd.f32 8.0, %v3001_v34 }
 0x622   : > { %v3230_v49 = vsel %vm2705_vm14, %v3229_v6, %v3225_v43 }
 0x623   : > { %v3163_v2 = vpop.permute.xlu1 %3162  ;;  %v3166_v63 = vpop.permute.xlu0 %3165  ;;  %v3235_v5 = vsel %vm2712_vm15, %v3234_v33, %v3230_v49 }
 0x624   : > { %v3239_v60 = vrot.slane %v3163_v2, %v11877_v35  ;;  %v3244_v61 = vrot.slane %v3166_v63, %v11878_v47 }
 0x626   : > { %v3240_v7 = vsel %vm2719_vm8, %v3239_v60, %v3235_v5 }
 0x627   : > { %v3245_v3 = vsel %vm2726_vm10, %v3244_v61, %v3240_v7 }
 0x628   : > { %v3247_v13 = vsub.f32 %v3002_v57, %v3245_v3 }
 0x62a   : > { %3248 = vst [vmem:[%s9025_s19 + $0x3] sm:$0x1] %v3247_v13 }
 0x62b   : > { %6426 = shalt.err (!%p6423_p7)
}
 0x62c   : > { %s6427_s22 = scalar_lea.hbm %s10250_s13, 64  ;;  %s6431_s21 = scalar_lea.hbm %s10300_s5, 128 }
 0x62d   : > { %p6428_p8 = scmp.ne.s32.totalorder %s10250_s13, %s6427_s22  ;;  %p6432_p11 = scmp.lt.u32.totalorder %s10250_s13, %s10300_s5 }
 0x62e   : > { %p6433_p12 = scmp.lt.u32.totalorder %s6431_s21, %s6427_s22  ;;  %p6435_p0 = scmp.lt.u32.totalorder %s6427_s22, %s10250_s13 }
 0x62f   : > { %p6429_p9 = pnand %p6428_p8, %p6559_p5 }
 0x630   : > { %p6434_p13 = por %p6433_p12, %p6432_p11 }
 0x631   : > { %p6430_p10 = pneg %p6429_p9 }
 0x632   : > { %p6436_p1 = por %p6435_p0, %p6434_p13 }
 0x634   : > { %p6437_p2 = pnand %p6436_p1, %p6430_p10 }
 0x636   : > { %6440 = shalt.err (!%p6437_p2)
}
 0x637   : > { %6202 = dma.vmem_to_hbm [thread:$0]  (%p6559_p5), %s10252_s30, 64, %s10250_s13, %s5285_s0  }
 0x638 PF: > { %p6208_p3 = scmp.ge.s32.totalorder %s6475_s26, 2  ;;  %s5318_s11 = sand.u32 1, %s6463_s23  }
 0x639   : > { %s5319_s17 = scalar_lea.sflag [#allocation5], %s5318_s11 }
 0x63a   : > { %p6205_p4 = pnand %p6208_p3, %p6563_p6 }
 0x63c   : > { %6458 = dma.done.wait (!%p6205_p4), %s5319_s17, 64  }
 0x63d   : > { %6460 = vsyncadd (!%p6205_p4), %s5319_s17, 4294967232  ;;  %p18_p7 = scmp.ge.s32.totalorder %s6546_s28, 4   ;;  %s11880_s23 = smov %s6467_s24 }
 0x63e   : > { %s11881_s24 = smov %s6471_s25  ;;  %s11882_s25 = smov %s6557_s7 }
 0x63f   : > { %s11883_s26 = smov %s6546_s28  ;;  %20 = sbr.rel (!%p18_p7) target bundleno = 5 (0x5), region = 89 }
 0x646   :  { %5332 = vsyncpa [#allocation5], 1 }
 0x647   :  { %5334 = vsyncpa [#allocation5 + $0x1], 1 }

</bundles_post_ra>
